<compile_context>
chip_gen: v6e
topology: v6e:2x2x1
jax: 0.10.0
libtpu: 0.0.40
codegen_flags: <defaults>
</compile_context>

<pallas_src>
import functools

import jax
import jax.numpy as jnp
from jax import lax
from jax.experimental import pallas as pl
from jax.experimental.pallas import tpu as pltpu


# ---------------------------------------------------------------------------
# Fused kernel: one grid step == TB batch elements, full forward pass.
# ---------------------------------------------------------------------------
def _fused_kernel(x_ref, cos_ref, sin_ref, rot_ref,
                  g1_ref, wqkv_ref, wo_ref,
                  g2_ref, w13_ref, w2_ref,
                  gc_ref, wcat_ref, bab_ref, gn_ref, wout_ref,
                  o_ref, pool_ref,
                  *, TB, S0, D, H, NL, NH, Dh, K, Sf, eps, approx_softmax):
    f32 = jnp.float32
    bf16 = jnp.bfloat16
    scale = 1.0 / (Dh ** 0.5)
    rot = rot_ref[...]                                   # (D, D) block-diag pair swap

    # (batch*seq, channels) activations; channels stay on lanes.
    x = x_ref[...].reshape(TB * S0, D).astype(f32)

    S = S0
    for l in range(NL):                                  # static unroll (shapes shrink)
        N = TB * S
        cos_l = cos_ref[0:S, :]                          # (S, D) head-tiled tables
        sin_l = sin_ref[0:S, :]

        # ---- pre-attention RMSNorm ----
        ms = jnp.mean(x * x, axis=-1, keepdims=True)
        h = (x * lax.rsqrt(ms + eps) * g1_ref[l]).astype(bf16)           # (N, D)

        # ---- fused QKV projection: one (N, D) @ (D, 3D) push ----
        qkv = jnp.dot(h, wqkv_ref[l], preferred_element_type=f32)        # (N, 3D)
        q = qkv[:, 0:D]
        k = qkv[:, D:2 * D]
        v = qkv[:, 2 * D:3 * D]

        # ---- interleaved RoPE on full-width Q/K (one rot matmul each) ----
        q_rot = jnp.dot(q.astype(bf16), rot, preferred_element_type=f32)
        k_rot = jnp.dot(k.astype(bf16), rot, preferred_element_type=f32)
        q3 = q.reshape(TB, S, D) * cos_l[None] + q_rot.reshape(TB, S, D) * sin_l[None]
        k3 = k.reshape(TB, S, D) * cos_l[None] + k_rot.reshape(TB, S, D) * sin_l[None]
        v3 = v.reshape(TB, S, D)

        # ---- per-head scores / softmax / PV (MXU work is head-local either way) ----
        heads = []
        for hd in range(NH):                             # static unroll over heads
            sl = slice(hd * Dh, (hd + 1) * Dh)
            qh = q3[:, :, sl].astype(bf16)
            kh = k3[:, :, sl].astype(bf16)
            vh = v3[:, :, sl].astype(bf16)
            s = jnp.einsum('bqd,bkd->bqk', qh, kh,
                           preferred_element_type=f32) * scale           # (TB,S,S)
            s = s - jnp.max(s, axis=-1, keepdims=True)
            p = jnp.exp(s)
            den = jnp.sum(p, axis=-1, keepdims=True)
            if approx_softmax:
                p = p * pl.reciprocal(den, approx=True)
            else:
                p = p / den
            oh = jnp.einsum('bqk,bkd->bqd', p.astype(bf16), vh,
                            preferred_element_type=f32)                  # (TB,S,Dh)
            heads.append(oh.reshape(N, Dh))

        # ---- fused output projection: one (N, D) @ (D, D) push ----
        attn = jnp.concatenate(heads, axis=-1).astype(bf16)              # (N, D)
        x1 = x + jnp.dot(attn, wo_ref[l], preferred_element_type=f32)

        # ---- pre-FFN RMSNorm + SwiGLU (w1|w3 fused into (D, 2H)) ----
        ms2 = jnp.mean(x1 * x1, axis=-1, keepdims=True)
        h2 = (x1 * lax.rsqrt(ms2 + eps) * g2_ref[l]).astype(bf16)
        ab = jnp.dot(h2, w13_ref[l], preferred_element_type=f32)         # (N, 2H)
        a = ab[:, 0:H]
        b = ab[:, H:2 * H]
        ff = (a * jax.nn.sigmoid(a) * b).astype(bf16)
        y = x1 + jnp.dot(ff, w2_ref[l], preferred_element_type=f32)      # (N, D)

        # ---- downsample: average adjacent sequence positions (S -> S // 2) ----
        pool_ref[0:N, :] = y
        half = N // 2
        x = 0.5 * (pool_ref[pl.ds(0, half, 2), :] + pool_ref[pl.ds(1, half, 2), :])
        S = S // 2

    # -------------------- head: GatedDilatedModule + RMSNorm + Linear ----------
    Nf = TB * Sf
    pad = K // 2

    ms = jnp.mean(x * x, axis=-1, keepdims=True)
    hh = x * lax.rsqrt(ms + eps) * gc_ref[...]                           # (Nf, D)

    # zero-padded scratch copy -> each conv tap is a contiguous (Nf, D) read
    zpad = jnp.zeros((pad, D), f32)
    pool_ref[0:pad, :] = zpad
    pool_ref[pad:pad + Nf, :] = hh
    pool_ref[pad + Nf:pad + Nf + pad, :] = zpad

    # per-row position inside the sample, generated in-kernel (no mask DMA)
    row = lax.broadcasted_iota(jnp.int32, (Nf, 1), 0)
    if Sf & (Sf - 1) == 0:
        pos = jnp.bitwise_and(row, Sf - 1)
    else:
        pos = row % Sf

    acc = jnp.zeros((Nf, 2), f32)
    for kk in range(K):                                  # static unroll over taps
        off = kk - pad
        valid = ((pos + off >= 0) & (pos + off < Sf)).astype(f32)        # (Nf, 1)
        seg = pool_ref[pl.ds(kk, Nf), :]
        tap = jnp.dot(seg.astype(bf16), wcat_ref[kk],
                      preferred_element_type=f32)                        # (Nf, 2)
        acc = acc + valid * tap              # mask post-matmul (commutes over D)
    acc = acc + bab_ref[...]

    av = acc[:, 0:1]
    bv = acc[:, 1:2]
    g = av * jax.nn.sigmoid(bv)                          # gate
    g = g * jax.nn.sigmoid(g)                            # act_out=True -> SiLU

    # (Nf, 1) -> (TB, Sf): selection matmuls; matrices built with iota in-kernel
    n1 = lax.broadcasted_iota(jnp.int32, (TB, Nf), 1)
    b1 = lax.broadcasted_iota(jnp.int32, (TB, Nf), 0)
    ind = ((n1 >= b1 * Sf) & (n1 < (b1 + 1) * Sf)).astype(f32)           # (TB, Nf)
    n2 = lax.broadcasted_iota(jnp.int32, (Nf, Sf), 0)
    s2 = lax.broadcasted_iota(jnp.int32, (Nf, Sf), 1)
    if Sf & (Sf - 1) == 0:
        p2 = jnp.bitwise_and(n2, Sf - 1)
    else:
        p2 = n2 % Sf
    pos1h = (p2 == s2).astype(f32)                                       # (Nf, Sf)
    gmat = jnp.dot(ind, g * pos1h, preferred_element_type=f32)           # (TB, Sf)

    msn = jnp.mean(gmat * gmat, axis=-1, keepdims=True)
    normed = gmat * lax.rsqrt(msn + eps) * gn_ref[...]
    o_ref[:, 0, :] = jnp.dot(normed, wout_ref[...], preferred_element_type=f32)


def _inv_spec(arr):
    """Grid-invariant input: whole array, constant block index, single-buffered."""
    nd = arr.ndim
    imap = lambda b, _n=nd: (0,) * _n
    buffered = getattr(pl, "Buffered", None)
    if buffered is not None:
        try:
            return pl.BlockSpec(arr.shape, imap, pipeline_mode=buffered(1))
        except Exception:
            pass
    return pl.BlockSpec(arr.shape, imap)


# ---------------------------------------------------------------------------
# Wrapper: host-side weight fusion/repacking + a single pallas_call.
# ---------------------------------------------------------------------------
def intermediate_blocks_forward(x, params, *, n_heads, eps, approx_softmax=True):
    B, S0, D = x.shape
    layers = params["layers"]
    head = params["head"]
    NL = len(layers)
    NH = n_heads
    Dh = D // NH
    Sf = S0 // (2 ** NL)
    K = head["wa"].shape[1]
    H = layers[0]["w1"].shape[1]
    target = head["wout"].shape[0]
    pad = K // 2

    assert S0 % (2 ** NL) == 0, "seq_len must be divisible by 2**n_layers"
    assert NH * Dh == D and Dh % 2 == 0, "head_dim must be even for RoPE pairs"

    f32 = jnp.float32
    bf16 = jnp.bfloat16

    # ---- stack / fuse per-layer weights on the host (free) ----
    g1_all = jnp.stack([lp["g1"].reshape(1, D) for lp in layers]).astype(f32)
    g2_all = jnp.stack([lp["g2"].reshape(1, D) for lp in layers]).astype(f32)
    wqkv_all = jnp.stack(
        [jnp.concatenate([lp["wq"], lp["wk"], lp["wv"]], axis=1) for lp in layers]
    ).astype(bf16)                                                       # (NL, D, 3D)
    wo_all = jnp.stack([lp["wo"] for lp in layers]).astype(bf16)         # (NL, D, D)
    w13_all = jnp.stack(
        [jnp.concatenate([lp["w1"], lp["w3"]], axis=1) for lp in layers]
    ).astype(bf16)                                                       # (NL, D, 2H)
    w2_all = jnp.stack([lp["w2"] for lp in layers]).astype(bf16)         # (NL, H, D)

    # ---- RoPE tables (interleaved complex-pair convention), tiled over heads ----
    half = Dh // 2
    inv_freq = 1.0 / (10000.0 ** (jnp.arange(half, dtype=f32) * 2.0 / Dh))
    ang = jnp.arange(S0, dtype=f32)[:, None] * inv_freq[None, :]         # (S0, Dh/2)
    cos_t = jnp.tile(jnp.repeat(jnp.cos(ang), 2, axis=-1), (1, NH))      # (S0, D)
    sin_t = jnp.tile(jnp.repeat(jnp.sin(ang), 2, axis=-1), (1, NH))
    idx = jnp.arange(D // 2)
    rot = jnp.zeros((D, D), f32)
    rot = rot.at[2 * idx + 1, 2 * idx].set(-1.0)
    rot = rot.at[2 * idx, 2 * idx + 1].set(1.0)
    rot = rot.astype(bf16)                   # block-diagonal over heads (Dh even)

    # ---- head constants ----
    wcat = jnp.stack([head["wa"].T, head["wb"].T], axis=-1).astype(bf16)     # (K, D, 2)
    bab = jnp.concatenate([head["ba"].reshape(1, 1), head["bb"].reshape(1, 1)],
                          axis=-1).astype(f32)                               # (1, 2)
    gc = head["gc"].reshape(1, D).astype(f32)
    gn = head["gn"].reshape(1, Sf).astype(f32)
    wout_t = head["wout"].T.astype(f32)                                      # (Sf, target)

    inv_inputs = (cos_t, sin_t, rot, g1_all, wqkv_all, wo_all,
                  g2_all, w13_all, w2_all, gc, wcat, bab, gn, wout_t)

    # ---- batch-tile selection ----
    # TB is a leading block dim (output is (B, 1, target)), so any divisor of B
    # is legal; >= num_cores grid steps on multi-TC parts (v7x), single/few steps
    # on single-TC parts (v5e/v6e), bounded by a VMEM-footprint estimate.
    try:
        n_tc = int(getattr(jax.devices()[0], "num_cores", 1) or 1)
    except Exception:
        n_tc = 1

    inv_bytes = sum(int(a.size) * a.dtype.itemsize for a in inv_inputs)

    def step_bytes(tb):
        n = tb * S0
        act = n * (8 * D + 4 * H) * 4 + tb * NH * S0 * S0 * 4     # generous f32 transients
        scratch = max(n, tb * Sf + 2 * pad) * D * 4
        io = 2 * (n * D * 4 + tb * target * 4)
        return inv_bytes + act + scratch + io

    divisors = [t for t in range(1, B + 1) if B % t == 0]
    cap = 32                       # bound static-unroll / vreg pressure
    cands = [t for t in divisors if t <= cap] or [1]
    if n_tc > 1 and B > 1:
        multi = [t for t in cands if B // t >= n_tc]
        TB = max(multi) if multi else max(cands)
    else:
        TB = max(cands)
    budget = 24 << 20
    while TB > 1 and step_bytes(TB) > budget:
        TB = max([t for t in divisors if t < TB] or [1])

    grid = (B // TB,)
    scratch_rows = max(TB * S0, TB * Sf + 2 * pad)
    vmem_limit = int(1.5 * step_bytes(TB)) + (8 << 20)
    vmem_limit = max(32 << 20, min(64 << 20, vmem_limit))

    kern = functools.partial(_fused_kernel, TB=TB, S0=S0, D=D, H=H, NL=NL, NH=NH,
                             Dh=Dh, K=K, Sf=Sf, eps=eps,
                             approx_softmax=approx_softmax)

    out3 = pl.pallas_call(
        kern,
        out_shape=jax.ShapeDtypeStruct((B, 1, target), jnp.float32),
        grid=grid,
        in_specs=[pl.BlockSpec((TB, S0, D), lambda b: (b, 0, 0))]
                 + [_inv_spec(a) for a in inv_inputs],
        out_specs=pl.BlockSpec((TB, 1, target), lambda b: (b, 0, 0)),
        scratch_shapes=[pltpu.VMEM((scratch_rows, D), jnp.float32)],
        compiler_params=pltpu.CompilerParams(
            dimension_semantics=("parallel",),
            vmem_limit_bytes=vmem_limit),
    )(x, *inv_inputs)
    return out3.reshape(B, target)


if __name__ == "__main__":
    # ModelArgs-consistent small shapes:
    # dim=32, n_heads=4, n_layers=2, seq_len=16, num_target_classes=2 -> target=1
    B, S, D, NH, NL = 2, 16, 32, 4, 2
    H = 2 * D
    K, TARGET, EPS = 5, 1, 1e-5
    S_FINAL = S // (2 ** NL)

    key = jax.random.PRNGKey(0)
    k_x, k_p = jax.random.split(key)
    x = jax.random.normal(k_x, (B, S, D), jnp.float32)

    def nrm(k, shape, fan_in):
        return jax.random.normal(k, shape, jnp.float32) / jnp.sqrt(float(fan_in))

    keys = jax.random.split(k_p, NL * 7 + 3)
    layers = []
    ki = 0
    for _ in range(NL):
        layers.append(dict(
            g1=jnp.ones((1, D), jnp.float32),
            wq=nrm(keys[ki + 0], (D, D), D),
            wk=nrm(keys[ki + 1], (D, D), D),
            wv=nrm(keys[ki + 2], (D, D), D),
            wo=nrm(keys[ki + 3], (D, D), D),
            g2=jnp.ones((1, D), jnp.float32),
            w1=nrm(keys[ki + 4], (D, H), D),
            w3=nrm(keys[ki + 5], (D, H), D),
            w2=nrm(keys[ki + 6], (H, D), H),
        ))
        ki += 7

    head = dict(
        gc=jnp.ones((1, D), jnp.float32),
        wa=nrm(keys[ki + 0], (D, K), D * K),
        ba=jnp.zeros((1, 1), jnp.float32),
        wb=nrm(keys[ki + 1], (D, K), D * K),
        bb=jnp.zeros((1, 1), jnp.float32),
        gn=jnp.ones((S_FINAL,), jnp.float32),
        wout=nrm(keys[ki + 2], (TARGET, S_FINAL), S_FINAL),
    )

    params = dict(layers=layers, head=head)

    out = intermediate_blocks_forward(x, params, n_heads=NH, eps=EPS)
    out = jax.block_until_ready(out)
    assert out.shape == (B, TARGET), out.shape
    assert out.dtype == jnp.float32, out.dtype
    print("KERNEL_OK")
</pallas_src>

<mosaic_0001>
module attributes {stable_mosaic.version = 11 : i64} {
  func.func @_fused_kernel(%arg0: i32, %arg1: memref<2x16x32xf32, #tpu.memory_space<vmem>>, %arg2: memref<16x32xf32, #tpu.memory_space<vmem>>, %arg3: memref<16x32xf32, #tpu.memory_space<vmem>>, %arg4: memref<32x32xbf16, #tpu.memory_space<vmem>>, %arg5: memref<2x1x32xf32, #tpu.memory_space<vmem>>, %arg6: memref<2x32x96xbf16, #tpu.memory_space<vmem>>, %arg7: memref<2x32x32xbf16, #tpu.memory_space<vmem>>, %arg8: memref<2x1x32xf32, #tpu.memory_space<vmem>>, %arg9: memref<2x32x128xbf16, #tpu.memory_space<vmem>>, %arg10: memref<2x64x32xbf16, #tpu.memory_space<vmem>>, %arg11: memref<1x32xf32, #tpu.memory_space<vmem>>, %arg12: memref<5x32x2xbf16, #tpu.memory_space<vmem>>, %arg13: memref<1x2xf32, #tpu.memory_space<vmem>>, %arg14: memref<1x4xf32, #tpu.memory_space<vmem>>, %arg15: memref<4x1xf32, #tpu.memory_space<vmem>>, %arg16: memref<2x1x1xf32, #tpu.memory_space<vmem>>, %arg17: memref<32x32xf32, #tpu.memory_space<vmem>>) attributes {dimension_semantics = [#tpu.dimension_semantics<parallel>], iteration_bounds = array<i64: 1>, scalar_prefetch = 0 : i64, scratch_operands = 1 : i64, tpu.core_type = #tpu.core_type<tc>, window_params = [{transform_indices = @transform_0, window_bounds = array<i64: 2, 16, 32>}, {pipeline_mode = #tpu.pipeline_mode<synchronous>, transform_indices = @transform_1, window_bounds = array<i64: 16, 32>}, {pipeline_mode = #tpu.pipeline_mode<synchronous>, transform_indices = @transform_2, window_bounds = array<i64: 16, 32>}, {pipeline_mode = #tpu.pipeline_mode<synchronous>, transform_indices = @transform_3, window_bounds = array<i64: 32, 32>}, {pipeline_mode = #tpu.pipeline_mode<synchronous>, transform_indices = @transform_4, window_bounds = array<i64: 2, 1, 32>}, {pipeline_mode = #tpu.pipeline_mode<synchronous>, transform_indices = @transform_5, window_bounds = array<i64: 2, 32, 96>}, {pipeline_mode = #tpu.pipeline_mode<synchronous>, transform_indices = @transform_6, window_bounds = array<i64: 2, 32, 32>}, {pipeline_mode = #tpu.pipeline_mode<synchronous>, transform_indices = @transform_7, window_bounds = array<i64: 2, 1, 32>}, {pipeline_mode = #tpu.pipeline_mode<synchronous>, transform_indices = @transform_8, window_bounds = array<i64: 2, 32, 128>}, {pipeline_mode = #tpu.pipeline_mode<synchronous>, transform_indices = @transform_9, window_bounds = array<i64: 2, 64, 32>}, {pipeline_mode = #tpu.pipeline_mode<synchronous>, transform_indices = @transform_10, window_bounds = array<i64: 1, 32>}, {pipeline_mode = #tpu.pipeline_mode<synchronous>, transform_indices = @transform_11, window_bounds = array<i64: 5, 32, 2>}, {pipeline_mode = #tpu.pipeline_mode<synchronous>, transform_indices = @transform_12, window_bounds = array<i64: 1, 2>}, {pipeline_mode = #tpu.pipeline_mode<synchronous>, transform_indices = @transform_13, window_bounds = array<i64: 1, 4>}, {pipeline_mode = #tpu.pipeline_mode<synchronous>, transform_indices = @transform_14, window_bounds = array<i64: 4, 1>}, {transform_indices = @transform_15, window_bounds = array<i64: 2, 1, 1>}]} {
    %c0 = arith.constant 0 : index
    %c0_0 = arith.constant 0 : index
    %0 = vector.load %arg4[%c0, %c0_0] : memref<32x32xbf16, #tpu.memory_space<vmem>>, vector<32x32xbf16>
    %c0_1 = arith.constant 0 : index
    %c0_2 = arith.constant 0 : index
    %c0_3 = arith.constant 0 : index
    %1 = vector.load %arg1[%c0_1, %c0_2, %c0_3] : memref<2x16x32xf32, #tpu.memory_space<vmem>>, vector<2x16x32xf32>
    %2 = vector.shape_cast %1 : vector<2x16x32xf32> to vector<32x32xf32>
    %c0_4 = arith.constant 0 : index
    %c0_5 = arith.constant 0 : index
    %3 = vector.load %arg2[%c0_4, %c0_5] : memref<16x32xf32, #tpu.memory_space<vmem>>, vector<16x32xf32>
    %c0_6 = arith.constant 0 : index
    %c0_7 = arith.constant 0 : index
    %4 = vector.load %arg3[%c0_6, %c0_7] : memref<16x32xf32, #tpu.memory_space<vmem>>, vector<16x32xf32>
    %5 = arith.mulf %2, %2 : vector<32x32xf32>
    %cst = arith.constant dense<0.000000e+00> : vector<32xf32>
    %6 = vector.multi_reduction <add>, %5, %cst [1] : vector<32x32xf32> to vector<32xf32>
    %7 = vector.shape_cast %6 : vector<32xf32> to vector<32x1xf32>
    %cst_8 = arith.constant 3.200000e+01 : f32
    %8 = vector.broadcast %cst_8 : f32 to vector<32x1xf32>
    %9 = arith.divf %7, %8 : vector<32x1xf32>
    %cst_9 = arith.constant 9.99999974E-6 : f32
    %10 = vector.broadcast %cst_9 : f32 to vector<32x1xf32>
    %11 = arith.addf %9, %10 : vector<32x1xf32>
    %12 = math.rsqrt %11 : vector<32x1xf32>
    %13 = vector.broadcast %12 : vector<32x1xf32> to vector<32x32xf32>
    %14 = arith.mulf %2, %13 : vector<32x32xf32>
    %c0_10 = arith.constant 0 : index
    %c0_11 = arith.constant 0 : index
    %c0_12 = arith.constant 0 : index
    %15 = vector.load %arg5[%c0_10, %c0_11, %c0_12] : memref<2x1x32xf32, #tpu.memory_space<vmem>>, vector<1x1x32xf32>
    %16 = vector.shape_cast %15 : vector<1x1x32xf32> to vector<1x32xf32>
    %17 = vector.broadcast %16 : vector<1x32xf32> to vector<32x32xf32>
    %18 = arith.mulf %14, %17 : vector<32x32xf32>
    %19 = arith.truncf %18 : vector<32x32xf32> to vector<32x32xbf16>
    %c0_13 = arith.constant 0 : index
    %c0_14 = arith.constant 0 : index
    %c0_15 = arith.constant 0 : index
    %20 = vector.load %arg6[%c0_13, %c0_14, %c0_15] : memref<2x32x96xbf16, #tpu.memory_space<vmem>>, vector<1x32x96xbf16>
    %21 = vector.shape_cast %20 : vector<1x32x96xbf16> to vector<32x96xbf16>
    %cst_16 = arith.constant dense<0.000000e+00> : vector<32x96xf32>
    %22 = tpu.matmul %19, %21, %cst_16 {dimension_numbers = #tpu.dot_dimension_numbers<[1], [0], [0], [1], [0, 0, 1, 1], [], []>} : vector<32x32xbf16>, vector<32x96xbf16>, vector<32x96xf32> -> vector<32x96xf32>
    %23 = vector.extract_strided_slice %22 {offsets = [0, 0], sizes = [32, 32], strides = [1, 1]} : vector<32x96xf32> to vector<32x32xf32>
    %24 = vector.extract_strided_slice %22 {offsets = [0, 32], sizes = [32, 32], strides = [1, 1]} : vector<32x96xf32> to vector<32x32xf32>
    %25 = vector.extract_strided_slice %22 {offsets = [0, 64], sizes = [32, 32], strides = [1, 1]} : vector<32x96xf32> to vector<32x32xf32>
    %26 = arith.truncf %23 : vector<32x32xf32> to vector<32x32xbf16>
    %cst_17 = arith.constant dense<0.000000e+00> : vector<32x32xf32>
    %27 = tpu.matmul %26, %0, %cst_17 {dimension_numbers = #tpu.dot_dimension_numbers<[1], [0], [0], [1], [0, 0, 1, 1], [], []>} : vector<32x32xbf16>, vector<32x32xbf16>, vector<32x32xf32> -> vector<32x32xf32>
    %28 = arith.truncf %24 : vector<32x32xf32> to vector<32x32xbf16>
    %cst_18 = arith.constant dense<0.000000e+00> : vector<32x32xf32>
    %29 = tpu.matmul %28, %0, %cst_18 {dimension_numbers = #tpu.dot_dimension_numbers<[1], [0], [0], [1], [0, 0, 1, 1], [], []>} : vector<32x32xbf16>, vector<32x32xbf16>, vector<32x32xf32> -> vector<32x32xf32>
    %30 = vector.shape_cast %23 : vector<32x32xf32> to vector<2x16x32xf32>
    %31 = vector.shape_cast %3 : vector<16x32xf32> to vector<1x16x32xf32>
    %32 = vector.broadcast %31 : vector<1x16x32xf32> to vector<2x16x32xf32>
    %33 = arith.mulf %30, %32 : vector<2x16x32xf32>
    %34 = vector.shape_cast %27 : vector<32x32xf32> to vector<2x16x32xf32>
    %35 = vector.shape_cast %4 : vector<16x32xf32> to vector<1x16x32xf32>
    %36 = vector.broadcast %35 : vector<1x16x32xf32> to vector<2x16x32xf32>
    %37 = arith.mulf %34, %36 : vector<2x16x32xf32>
    %38 = arith.addf %33, %37 : vector<2x16x32xf32>
    %39 = vector.shape_cast %24 : vector<32x32xf32> to vector<2x16x32xf32>
    %40 = vector.shape_cast %3 : vector<16x32xf32> to vector<1x16x32xf32>
    %41 = vector.broadcast %40 : vector<1x16x32xf32> to vector<2x16x32xf32>
    %42 = arith.mulf %39, %41 : vector<2x16x32xf32>
    %43 = vector.shape_cast %29 : vector<32x32xf32> to vector<2x16x32xf32>
    %44 = vector.shape_cast %4 : vector<16x32xf32> to vector<1x16x32xf32>
    %45 = vector.broadcast %44 : vector<1x16x32xf32> to vector<2x16x32xf32>
    %46 = arith.mulf %43, %45 : vector<2x16x32xf32>
    %47 = arith.addf %42, %46 : vector<2x16x32xf32>
    %48 = vector.shape_cast %25 : vector<32x32xf32> to vector<2x16x32xf32>
    %49 = vector.extract_strided_slice %38 {offsets = [0, 0, 0], sizes = [2, 16, 8], strides = [1, 1, 1]} : vector<2x16x32xf32> to vector<2x16x8xf32>
    %50 = arith.truncf %49 : vector<2x16x8xf32> to vector<2x16x8xbf16>
    %51 = vector.extract_strided_slice %47 {offsets = [0, 0, 0], sizes = [2, 16, 8], strides = [1, 1, 1]} : vector<2x16x32xf32> to vector<2x16x8xf32>
    %52 = arith.truncf %51 : vector<2x16x8xf32> to vector<2x16x8xbf16>
    %53 = vector.extract_strided_slice %48 {offsets = [0, 0, 0], sizes = [2, 16, 8], strides = [1, 1, 1]} : vector<2x16x32xf32> to vector<2x16x8xf32>
    %54 = arith.truncf %53 : vector<2x16x8xf32> to vector<2x16x8xbf16>
    "tpu.trace_start"() <{level = 10 : i32, message = "bqd,bkd->bqk"}> : () -> ()
    %cst_19 = arith.constant dense<0.000000e+00> : vector<2x16x16xf32>
    %55 = tpu.matmul %50, %52, %cst_19 {dimension_numbers = #tpu.dot_dimension_numbers<[2], [2], [1], [1], [0, 0, 0, 1, 1, 1], [0], [0]>} : vector<2x16x8xbf16>, vector<2x16x8xbf16>, vector<2x16x16xf32> -> vector<2x16x16xf32>
    "tpu.trace_stop"() : () -> ()
    %cst_20 = arith.constant 0.353553385 : f32
    %56 = vector.broadcast %cst_20 : f32 to vector<2x16x16xf32>
    %57 = arith.mulf %55, %56 : vector<2x16x16xf32>
    %cst_21 = arith.constant dense<0xFF800000> : vector<2x16xf32>
    %58 = vector.multi_reduction <maximumf>, %57, %cst_21 [2] : vector<2x16x16xf32> to vector<2x16xf32>
    %59 = vector.shape_cast %58 : vector<2x16xf32> to vector<2x16x1xf32>
    %60 = vector.broadcast %59 : vector<2x16x1xf32> to vector<2x16x16xf32>
    %61 = arith.subf %57, %60 : vector<2x16x16xf32>
    %62 = math.exp %61 : vector<2x16x16xf32>
    %cst_22 = arith.constant dense<0.000000e+00> : vector<2x16xf32>
    %63 = vector.multi_reduction <add>, %62, %cst_22 [2] : vector<2x16x16xf32> to vector<2x16xf32>
    %64 = vector.shape_cast %63 : vector<2x16xf32> to vector<2x16x1xf32>
    %65 = tpu.reciprocal %64 {approx = true} : vector<2x16x1xf32> -> vector<2x16x1xf32>
    %66 = vector.broadcast %65 : vector<2x16x1xf32> to vector<2x16x16xf32>
    %67 = arith.mulf %62, %66 : vector<2x16x16xf32>
    %68 = arith.truncf %67 : vector<2x16x16xf32> to vector<2x16x16xbf16>
    "tpu.trace_start"() <{level = 10 : i32, message = "bqk,bkd->bqd"}> : () -> ()
    %cst_23 = arith.constant dense<0.000000e+00> : vector<2x16x8xf32>
    %69 = tpu.matmul %68, %54, %cst_23 {dimension_numbers = #tpu.dot_dimension_numbers<[2], [1], [1], [2], [0, 0, 0, 1, 1, 2], [0], [0]>} : vector<2x16x16xbf16>, vector<2x16x8xbf16>, vector<2x16x8xf32> -> vector<2x16x8xf32>
    "tpu.trace_stop"() : () -> ()
    %70 = vector.shape_cast %69 : vector<2x16x8xf32> to vector<32x8xf32>
    %71 = vector.extract_strided_slice %38 {offsets = [0, 0, 8], sizes = [2, 16, 8], strides = [1, 1, 1]} : vector<2x16x32xf32> to vector<2x16x8xf32>
    %72 = arith.truncf %71 : vector<2x16x8xf32> to vector<2x16x8xbf16>
    %73 = vector.extract_strided_slice %47 {offsets = [0, 0, 8], sizes = [2, 16, 8], strides = [1, 1, 1]} : vector<2x16x32xf32> to vector<2x16x8xf32>
    %74 = arith.truncf %73 : vector<2x16x8xf32> to vector<2x16x8xbf16>
    %75 = vector.extract_strided_slice %48 {offsets = [0, 0, 8], sizes = [2, 16, 8], strides = [1, 1, 1]} : vector<2x16x32xf32> to vector<2x16x8xf32>
    %76 = arith.truncf %75 : vector<2x16x8xf32> to vector<2x16x8xbf16>
    "tpu.trace_start"() <{level = 10 : i32, message = "bqd,bkd->bqk"}> : () -> ()
    %cst_24 = arith.constant dense<0.000000e+00> : vector<2x16x16xf32>
    %77 = tpu.matmul %72, %74, %cst_24 {dimension_numbers = #tpu.dot_dimension_numbers<[2], [2], [1], [1], [0, 0, 0, 1, 1, 1], [0], [0]>} : vector<2x16x8xbf16>, vector<2x16x8xbf16>, vector<2x16x16xf32> -> vector<2x16x16xf32>
    "tpu.trace_stop"() : () -> ()
    %cst_25 = arith.constant 0.353553385 : f32
    %78 = vector.broadcast %cst_25 : f32 to vector<2x16x16xf32>
    %79 = arith.mulf %77, %78 : vector<2x16x16xf32>
    %cst_26 = arith.constant dense<0xFF800000> : vector<2x16xf32>
    %80 = vector.multi_reduction <maximumf>, %79, %cst_26 [2] : vector<2x16x16xf32> to vector<2x16xf32>
    %81 = vector.shape_cast %80 : vector<2x16xf32> to vector<2x16x1xf32>
    %82 = vector.broadcast %81 : vector<2x16x1xf32> to vector<2x16x16xf32>
    %83 = arith.subf %79, %82 : vector<2x16x16xf32>
    %84 = math.exp %83 : vector<2x16x16xf32>
    %cst_27 = arith.constant dense<0.000000e+00> : vector<2x16xf32>
    %85 = vector.multi_reduction <add>, %84, %cst_27 [2] : vector<2x16x16xf32> to vector<2x16xf32>
    %86 = vector.shape_cast %85 : vector<2x16xf32> to vector<2x16x1xf32>
    %87 = tpu.reciprocal %86 {approx = true} : vector<2x16x1xf32> -> vector<2x16x1xf32>
    %88 = vector.broadcast %87 : vector<2x16x1xf32> to vector<2x16x16xf32>
    %89 = arith.mulf %84, %88 : vector<2x16x16xf32>
    %90 = arith.truncf %89 : vector<2x16x16xf32> to vector<2x16x16xbf16>
    "tpu.trace_start"() <{level = 10 : i32, message = "bqk,bkd->bqd"}> : () -> ()
    %cst_28 = arith.constant dense<0.000000e+00> : vector<2x16x8xf32>
    %91 = tpu.matmul %90, %76, %cst_28 {dimension_numbers = #tpu.dot_dimension_numbers<[2], [1], [1], [2], [0, 0, 0, 1, 1, 2], [0], [0]>} : vector<2x16x16xbf16>, vector<2x16x8xbf16>, vector<2x16x8xf32> -> vector<2x16x8xf32>
    "tpu.trace_stop"() : () -> ()
    %92 = vector.shape_cast %91 : vector<2x16x8xf32> to vector<32x8xf32>
    %93 = vector.extract_strided_slice %38 {offsets = [0, 0, 16], sizes = [2, 16, 8], strides = [1, 1, 1]} : vector<2x16x32xf32> to vector<2x16x8xf32>
    %94 = arith.truncf %93 : vector<2x16x8xf32> to vector<2x16x8xbf16>
    %95 = vector.extract_strided_slice %47 {offsets = [0, 0, 16], sizes = [2, 16, 8], strides = [1, 1, 1]} : vector<2x16x32xf32> to vector<2x16x8xf32>
    %96 = arith.truncf %95 : vector<2x16x8xf32> to vector<2x16x8xbf16>
    %97 = vector.extract_strided_slice %48 {offsets = [0, 0, 16], sizes = [2, 16, 8], strides = [1, 1, 1]} : vector<2x16x32xf32> to vector<2x16x8xf32>
    %98 = arith.truncf %97 : vector<2x16x8xf32> to vector<2x16x8xbf16>
    "tpu.trace_start"() <{level = 10 : i32, message = "bqd,bkd->bqk"}> : () -> ()
    %cst_29 = arith.constant dense<0.000000e+00> : vector<2x16x16xf32>
    %99 = tpu.matmul %94, %96, %cst_29 {dimension_numbers = #tpu.dot_dimension_numbers<[2], [2], [1], [1], [0, 0, 0, 1, 1, 1], [0], [0]>} : vector<2x16x8xbf16>, vector<2x16x8xbf16>, vector<2x16x16xf32> -> vector<2x16x16xf32>
    "tpu.trace_stop"() : () -> ()
    %cst_30 = arith.constant 0.353553385 : f32
    %100 = vector.broadcast %cst_30 : f32 to vector<2x16x16xf32>
    %101 = arith.mulf %99, %100 : vector<2x16x16xf32>
    %cst_31 = arith.constant dense<0xFF800000> : vector<2x16xf32>
    %102 = vector.multi_reduction <maximumf>, %101, %cst_31 [2] : vector<2x16x16xf32> to vector<2x16xf32>
    %103 = vector.shape_cast %102 : vector<2x16xf32> to vector<2x16x1xf32>
    %104 = vector.broadcast %103 : vector<2x16x1xf32> to vector<2x16x16xf32>
    %105 = arith.subf %101, %104 : vector<2x16x16xf32>
    %106 = math.exp %105 : vector<2x16x16xf32>
    %cst_32 = arith.constant dense<0.000000e+00> : vector<2x16xf32>
    %107 = vector.multi_reduction <add>, %106, %cst_32 [2] : vector<2x16x16xf32> to vector<2x16xf32>
    %108 = vector.shape_cast %107 : vector<2x16xf32> to vector<2x16x1xf32>
    %109 = tpu.reciprocal %108 {approx = true} : vector<2x16x1xf32> -> vector<2x16x1xf32>
    %110 = vector.broadcast %109 : vector<2x16x1xf32> to vector<2x16x16xf32>
    %111 = arith.mulf %106, %110 : vector<2x16x16xf32>
    %112 = arith.truncf %111 : vector<2x16x16xf32> to vector<2x16x16xbf16>
    "tpu.trace_start"() <{level = 10 : i32, message = "bqk,bkd->bqd"}> : () -> ()
    %cst_33 = arith.constant dense<0.000000e+00> : vector<2x16x8xf32>
    %113 = tpu.matmul %112, %98, %cst_33 {dimension_numbers = #tpu.dot_dimension_numbers<[2], [1], [1], [2], [0, 0, 0, 1, 1, 2], [0], [0]>} : vector<2x16x16xbf16>, vector<2x16x8xbf16>, vector<2x16x8xf32> -> vector<2x16x8xf32>
    "tpu.trace_stop"() : () -> ()
    %114 = vector.shape_cast %113 : vector<2x16x8xf32> to vector<32x8xf32>
    %115 = vector.extract_strided_slice %38 {offsets = [0, 0, 24], sizes = [2, 16, 8], strides = [1, 1, 1]} : vector<2x16x32xf32> to vector<2x16x8xf32>
    %116 = arith.truncf %115 : vector<2x16x8xf32> to vector<2x16x8xbf16>
    %117 = vector.extract_strided_slice %47 {offsets = [0, 0, 24], sizes = [2, 16, 8], strides = [1, 1, 1]} : vector<2x16x32xf32> to vector<2x16x8xf32>
    %118 = arith.truncf %117 : vector<2x16x8xf32> to vector<2x16x8xbf16>
    %119 = vector.extract_strided_slice %48 {offsets = [0, 0, 24], sizes = [2, 16, 8], strides = [1, 1, 1]} : vector<2x16x32xf32> to vector<2x16x8xf32>
    %120 = arith.truncf %119 : vector<2x16x8xf32> to vector<2x16x8xbf16>
    "tpu.trace_start"() <{level = 10 : i32, message = "bqd,bkd->bqk"}> : () -> ()
    %cst_34 = arith.constant dense<0.000000e+00> : vector<2x16x16xf32>
    %121 = tpu.matmul %116, %118, %cst_34 {dimension_numbers = #tpu.dot_dimension_numbers<[2], [2], [1], [1], [0, 0, 0, 1, 1, 1], [0], [0]>} : vector<2x16x8xbf16>, vector<2x16x8xbf16>, vector<2x16x16xf32> -> vector<2x16x16xf32>
    "tpu.trace_stop"() : () -> ()
    %cst_35 = arith.constant 0.353553385 : f32
    %122 = vector.broadcast %cst_35 : f32 to vector<2x16x16xf32>
    %123 = arith.mulf %121, %122 : vector<2x16x16xf32>
    %cst_36 = arith.constant dense<0xFF800000> : vector<2x16xf32>
    %124 = vector.multi_reduction <maximumf>, %123, %cst_36 [2] : vector<2x16x16xf32> to vector<2x16xf32>
    %125 = vector.shape_cast %124 : vector<2x16xf32> to vector<2x16x1xf32>
    %126 = vector.broadcast %125 : vector<2x16x1xf32> to vector<2x16x16xf32>
    %127 = arith.subf %123, %126 : vector<2x16x16xf32>
    %128 = math.exp %127 : vector<2x16x16xf32>
    %cst_37 = arith.constant dense<0.000000e+00> : vector<2x16xf32>
    %129 = vector.multi_reduction <add>, %128, %cst_37 [2] : vector<2x16x16xf32> to vector<2x16xf32>
    %130 = vector.shape_cast %129 : vector<2x16xf32> to vector<2x16x1xf32>
    %131 = tpu.reciprocal %130 {approx = true} : vector<2x16x1xf32> -> vector<2x16x1xf32>
    %132 = vector.broadcast %131 : vector<2x16x1xf32> to vector<2x16x16xf32>
    %133 = arith.mulf %128, %132 : vector<2x16x16xf32>
    %134 = arith.truncf %133 : vector<2x16x16xf32> to vector<2x16x16xbf16>
    "tpu.trace_start"() <{level = 10 : i32, message = "bqk,bkd->bqd"}> : () -> ()
    %cst_38 = arith.constant dense<0.000000e+00> : vector<2x16x8xf32>
    %135 = tpu.matmul %134, %120, %cst_38 {dimension_numbers = #tpu.dot_dimension_numbers<[2], [1], [1], [2], [0, 0, 0, 1, 1, 2], [0], [0]>} : vector<2x16x16xbf16>, vector<2x16x8xbf16>, vector<2x16x8xf32> -> vector<2x16x8xf32>
    "tpu.trace_stop"() : () -> ()
    %136 = vector.shape_cast %135 : vector<2x16x8xf32> to vector<32x8xf32>
    %137 = tpu.concatenate %70, %92, %114, %136 in 1 : vector<32x8xf32>, vector<32x8xf32>, vector<32x8xf32>, vector<32x8xf32> -> vector<32x32xf32>
    %138 = arith.truncf %137 : vector<32x32xf32> to vector<32x32xbf16>
    %c0_39 = arith.constant 0 : index
    %c0_40 = arith.constant 0 : index
    %c0_41 = arith.constant 0 : index
    %139 = vector.load %arg7[%c0_39, %c0_40, %c0_41] : memref<2x32x32xbf16, #tpu.memory_space<vmem>>, vector<1x32x32xbf16>
    %140 = vector.shape_cast %139 : vector<1x32x32xbf16> to vector<32x32xbf16>
    %cst_42 = arith.constant dense<0.000000e+00> : vector<32x32xf32>
    %141 = tpu.matmul %138, %140, %cst_42 {dimension_numbers = #tpu.dot_dimension_numbers<[1], [0], [0], [1], [0, 0, 1, 1], [], []>} : vector<32x32xbf16>, vector<32x32xbf16>, vector<32x32xf32> -> vector<32x32xf32>
    %142 = arith.addf %2, %141 : vector<32x32xf32>
    %143 = arith.mulf %142, %142 : vector<32x32xf32>
    %cst_43 = arith.constant dense<0.000000e+00> : vector<32xf32>
    %144 = vector.multi_reduction <add>, %143, %cst_43 [1] : vector<32x32xf32> to vector<32xf32>
    %145 = vector.shape_cast %144 : vector<32xf32> to vector<32x1xf32>
    %cst_44 = arith.constant 3.200000e+01 : f32
    %146 = vector.broadcast %cst_44 : f32 to vector<32x1xf32>
    %147 = arith.divf %145, %146 : vector<32x1xf32>
    %cst_45 = arith.constant 9.99999974E-6 : f32
    %148 = vector.broadcast %cst_45 : f32 to vector<32x1xf32>
    %149 = arith.addf %147, %148 : vector<32x1xf32>
    %150 = math.rsqrt %149 : vector<32x1xf32>
    %151 = vector.broadcast %150 : vector<32x1xf32> to vector<32x32xf32>
    %152 = arith.mulf %142, %151 : vector<32x32xf32>
    %c0_46 = arith.constant 0 : index
    %c0_47 = arith.constant 0 : index
    %c0_48 = arith.constant 0 : index
    %153 = vector.load %arg8[%c0_46, %c0_47, %c0_48] : memref<2x1x32xf32, #tpu.memory_space<vmem>>, vector<1x1x32xf32>
    %154 = vector.shape_cast %153 : vector<1x1x32xf32> to vector<1x32xf32>
    %155 = vector.broadcast %154 : vector<1x32xf32> to vector<32x32xf32>
    %156 = arith.mulf %152, %155 : vector<32x32xf32>
    %157 = arith.truncf %156 : vector<32x32xf32> to vector<32x32xbf16>
    %c0_49 = arith.constant 0 : index
    %c0_50 = arith.constant 0 : index
    %c0_51 = arith.constant 0 : index
    %158 = vector.load %arg9[%c0_49, %c0_50, %c0_51] : memref<2x32x128xbf16, #tpu.memory_space<vmem>>, vector<1x32x128xbf16>
    %159 = vector.shape_cast %158 : vector<1x32x128xbf16> to vector<32x128xbf16>
    %cst_52 = arith.constant dense<0.000000e+00> : vector<32x128xf32>
    %160 = tpu.matmul %157, %159, %cst_52 {dimension_numbers = #tpu.dot_dimension_numbers<[1], [0], [0], [1], [0, 0, 1, 1], [], []>} : vector<32x32xbf16>, vector<32x128xbf16>, vector<32x128xf32> -> vector<32x128xf32>
    %161 = vector.extract_strided_slice %160 {offsets = [0, 0], sizes = [32, 64], strides = [1, 1]} : vector<32x128xf32> to vector<32x64xf32>
    %162 = vector.extract_strided_slice %160 {offsets = [0, 64], sizes = [32, 64], strides = [1, 1]} : vector<32x128xf32> to vector<32x64xf32>
    %163 = arith.negf %161 : vector<32x64xf32>
    %164 = math.exp %163 : vector<32x64xf32>
    %cst_53 = arith.constant 1.000000e+00 : f32
    %165 = vector.broadcast %cst_53 : f32 to vector<32x64xf32>
    %166 = arith.addf %165, %164 : vector<32x64xf32>
    %167 = arith.divf %165, %166 : vector<32x64xf32>
    %168 = arith.mulf %161, %167 : vector<32x64xf32>
    %169 = arith.mulf %168, %162 : vector<32x64xf32>
    %170 = arith.truncf %169 : vector<32x64xf32> to vector<32x64xbf16>
    %c0_54 = arith.constant 0 : index
    %c0_55 = arith.constant 0 : index
    %c0_56 = arith.constant 0 : index
    %171 = vector.load %arg10[%c0_54, %c0_55, %c0_56] : memref<2x64x32xbf16, #tpu.memory_space<vmem>>, vector<1x64x32xbf16>
    %172 = vector.shape_cast %171 : vector<1x64x32xbf16> to vector<64x32xbf16>
    %cst_57 = arith.constant dense<0.000000e+00> : vector<32x32xf32>
    %173 = tpu.matmul %170, %172, %cst_57 {dimension_numbers = #tpu.dot_dimension_numbers<[1], [0], [0], [1], [0, 0, 1, 1], [], []>} : vector<32x64xbf16>, vector<64x32xbf16>, vector<32x32xf32> -> vector<32x32xf32>
    %174 = arith.addf %142, %173 : vector<32x32xf32>
    %c0_58 = arith.constant 0 : index
    %c0_59 = arith.constant 0 : index
    %175 = vector.load %arg17[%c0_58, %c0_59] : memref<32x32xf32, #tpu.memory_space<vmem>>, vector<32x32xf32>
    tpu.vector_store %arg17[%c0_58, %c0_59], %174 {strides = array<i32>} : memref<32x32xf32, #tpu.memory_space<vmem>>, vector<32x32xf32>,
    %c0_60 = arith.constant 0 : index
    %c0_61 = arith.constant 0 : index
    %176 = tpu.strided_load %arg17[%c0_60, %c0_61] {strides = array<i32: 2, 1>} : memref<32x32xf32, #tpu.memory_space<vmem>>, vector<16x32xf32>
    %c1 = arith.constant 1 : index
    %c0_62 = arith.constant 0 : index
    %177 = tpu.strided_load %arg17[%c1, %c0_62] {strides = array<i32: 2, 1>} : memref<32x32xf32, #tpu.memory_space<vmem>>, vector<16x32xf32>
    %178 = arith.addf %176, %177 : vector<16x32xf32>
    %cst_63 = arith.constant 5.000000e-01 : f32
    %179 = vector.broadcast %cst_63 : f32 to vector<16x32xf32>
    %180 = arith.mulf %179, %178 : vector<16x32xf32>
    %c0_64 = arith.constant 0 : index
    %c0_65 = arith.constant 0 : index
    %181 = vector.load %arg2[%c0_64, %c0_65] : memref<16x32xf32, #tpu.memory_space<vmem>>, vector<8x32xf32>
    %c0_66 = arith.constant 0 : index
    %c0_67 = arith.constant 0 : index
    %182 = vector.load %arg3[%c0_66, %c0_67] : memref<16x32xf32, #tpu.memory_space<vmem>>, vector<8x32xf32>
    %183 = arith.mulf %180, %180 : vector<16x32xf32>
    %cst_68 = arith.constant dense<0.000000e+00> : vector<16xf32>
    %184 = vector.multi_reduction <add>, %183, %cst_68 [1] : vector<16x32xf32> to vector<16xf32>
    %185 = vector.shape_cast %184 : vector<16xf32> to vector<16x1xf32>
    %cst_69 = arith.constant 3.200000e+01 : f32
    %186 = vector.broadcast %cst_69 : f32 to vector<16x1xf32>
    %187 = arith.divf %185, %186 : vector<16x1xf32>
    %cst_70 = arith.constant 9.99999974E-6 : f32
    %188 = vector.broadcast %cst_70 : f32 to vector<16x1xf32>
    %189 = arith.addf %187, %188 : vector<16x1xf32>
    %190 = math.rsqrt %189 : vector<16x1xf32>
    %191 = vector.broadcast %190 : vector<16x1xf32> to vector<16x32xf32>
    %192 = arith.mulf %180, %191 : vector<16x32xf32>
    %c1_71 = arith.constant 1 : index
    %c0_72 = arith.constant 0 : index
    %c0_73 = arith.constant 0 : index
    %193 = vector.load %arg5[%c1_71, %c0_72, %c0_73] : memref<2x1x32xf32, #tpu.memory_space<vmem>>, vector<1x1x32xf32>
    %194 = vector.shape_cast %193 : vector<1x1x32xf32> to vector<1x32xf32>
    %195 = vector.broadcast %194 : vector<1x32xf32> to vector<16x32xf32>
    %196 = arith.mulf %192, %195 : vector<16x32xf32>
    %197 = arith.truncf %196 : vector<16x32xf32> to vector<16x32xbf16>
    %c1_74 = arith.constant 1 : index
    %c0_75 = arith.constant 0 : index
    %c0_76 = arith.constant 0 : index
    %198 = vector.load %arg6[%c1_74, %c0_75, %c0_76] : memref<2x32x96xbf16, #tpu.memory_space<vmem>>, vector<1x32x96xbf16>
    %199 = vector.shape_cast %198 : vector<1x32x96xbf16> to vector<32x96xbf16>
    %cst_77 = arith.constant dense<0.000000e+00> : vector<16x96xf32>
    %200 = tpu.matmul %197, %199, %cst_77 {dimension_numbers = #tpu.dot_dimension_numbers<[1], [0], [0], [1], [0, 0, 1, 1], [], []>} : vector<16x32xbf16>, vector<32x96xbf16>, vector<16x96xf32> -> vector<16x96xf32>
    %201 = vector.extract_strided_slice %200 {offsets = [0, 0], sizes = [16, 32], strides = [1, 1]} : vector<16x96xf32> to vector<16x32xf32>
    %202 = vector.extract_strided_slice %200 {offsets = [0, 32], sizes = [16, 32], strides = [1, 1]} : vector<16x96xf32> to vector<16x32xf32>
    %203 = vector.extract_strided_slice %200 {offsets = [0, 64], sizes = [16, 32], strides = [1, 1]} : vector<16x96xf32> to vector<16x32xf32>
    %204 = arith.truncf %201 : vector<16x32xf32> to vector<16x32xbf16>
    %cst_78 = arith.constant dense<0.000000e+00> : vector<16x32xf32>
    %205 = tpu.matmul %204, %0, %cst_78 {dimension_numbers = #tpu.dot_dimension_numbers<[1], [0], [0], [1], [0, 0, 1, 1], [], []>} : vector<16x32xbf16>, vector<32x32xbf16>, vector<16x32xf32> -> vector<16x32xf32>
    %206 = arith.truncf %202 : vector<16x32xf32> to vector<16x32xbf16>
    %cst_79 = arith.constant dense<0.000000e+00> : vector<16x32xf32>
    %207 = tpu.matmul %206, %0, %cst_79 {dimension_numbers = #tpu.dot_dimension_numbers<[1], [0], [0], [1], [0, 0, 1, 1], [], []>} : vector<16x32xbf16>, vector<32x32xbf16>, vector<16x32xf32> -> vector<16x32xf32>
    %208 = vector.shape_cast %201 : vector<16x32xf32> to vector<2x8x32xf32>
    %209 = vector.shape_cast %181 : vector<8x32xf32> to vector<1x8x32xf32>
    %210 = vector.broadcast %209 : vector<1x8x32xf32> to vector<2x8x32xf32>
    %211 = arith.mulf %208, %210 : vector<2x8x32xf32>
    %212 = vector.shape_cast %205 : vector<16x32xf32> to vector<2x8x32xf32>
    %213 = vector.shape_cast %182 : vector<8x32xf32> to vector<1x8x32xf32>
    %214 = vector.broadcast %213 : vector<1x8x32xf32> to vector<2x8x32xf32>
    %215 = arith.mulf %212, %214 : vector<2x8x32xf32>
    %216 = arith.addf %211, %215 : vector<2x8x32xf32>
    %217 = vector.shape_cast %202 : vector<16x32xf32> to vector<2x8x32xf32>
    %218 = vector.shape_cast %181 : vector<8x32xf32> to vector<1x8x32xf32>
    %219 = vector.broadcast %218 : vector<1x8x32xf32> to vector<2x8x32xf32>
    %220 = arith.mulf %217, %219 : vector<2x8x32xf32>
    %221 = vector.shape_cast %207 : vector<16x32xf32> to vector<2x8x32xf32>
    %222 = vector.shape_cast %182 : vector<8x32xf32> to vector<1x8x32xf32>
    %223 = vector.broadcast %222 : vector<1x8x32xf32> to vector<2x8x32xf32>
    %224 = arith.mulf %221, %223 : vector<2x8x32xf32>
    %225 = arith.addf %220, %224 : vector<2x8x32xf32>
    %226 = vector.shape_cast %203 : vector<16x32xf32> to vector<2x8x32xf32>
    %227 = vector.extract_strided_slice %216 {offsets = [0, 0, 0], sizes = [2, 8, 8], strides = [1, 1, 1]} : vector<2x8x32xf32> to vector<2x8x8xf32>
    %228 = arith.truncf %227 : vector<2x8x8xf32> to vector<2x8x8xbf16>
    %229 = vector.extract_strided_slice %225 {offsets = [0, 0, 0], sizes = [2, 8, 8], strides = [1, 1, 1]} : vector<2x8x32xf32> to vector<2x8x8xf32>
    %230 = arith.truncf %229 : vector<2x8x8xf32> to vector<2x8x8xbf16>
    %231 = vector.extract_strided_slice %226 {offsets = [0, 0, 0], sizes = [2, 8, 8], strides = [1, 1, 1]} : vector<2x8x32xf32> to vector<2x8x8xf32>
    %232 = arith.truncf %231 : vector<2x8x8xf32> to vector<2x8x8xbf16>
    "tpu.trace_start"() <{level = 10 : i32, message = "bqd,bkd->bqk"}> : () -> ()
    %cst_80 = arith.constant dense<0.000000e+00> : vector<2x8x8xf32>
    %233 = tpu.matmul %228, %230, %cst_80 {dimension_numbers = #tpu.dot_dimension_numbers<[2], [2], [1], [1], [0, 0, 0, 1, 1, 1], [0], [0]>} : vector<2x8x8xbf16>, vector<2x8x8xbf16>, vector<2x8x8xf32> -> vector<2x8x8xf32>
    "tpu.trace_stop"() : () -> ()
    %cst_81 = arith.constant 0.353553385 : f32
    %234 = vector.broadcast %cst_81 : f32 to vector<2x8x8xf32>
    %235 = arith.mulf %233, %234 : vector<2x8x8xf32>
    %cst_82 = arith.constant dense<0xFF800000> : vector<2x8xf32>
    %236 = vector.multi_reduction <maximumf>, %235, %cst_82 [2] : vector<2x8x8xf32> to vector<2x8xf32>
    %237 = vector.shape_cast %236 : vector<2x8xf32> to vector<2x8x1xf32>
    %238 = vector.broadcast %237 : vector<2x8x1xf32> to vector<2x8x8xf32>
    %239 = arith.subf %235, %238 : vector<2x8x8xf32>
    %240 = math.exp %239 : vector<2x8x8xf32>
    %cst_83 = arith.constant dense<0.000000e+00> : vector<2x8xf32>
    %241 = vector.multi_reduction <add>, %240, %cst_83 [2] : vector<2x8x8xf32> to vector<2x8xf32>
    %242 = vector.shape_cast %241 : vector<2x8xf32> to vector<2x8x1xf32>
    %243 = tpu.reciprocal %242 {approx = true} : vector<2x8x1xf32> -> vector<2x8x1xf32>
    %244 = vector.broadcast %243 : vector<2x8x1xf32> to vector<2x8x8xf32>
    %245 = arith.mulf %240, %244 : vector<2x8x8xf32>
    %246 = arith.truncf %245 : vector<2x8x8xf32> to vector<2x8x8xbf16>
    "tpu.trace_start"() <{level = 10 : i32, message = "bqk,bkd->bqd"}> : () -> ()
    %cst_84 = arith.constant dense<0.000000e+00> : vector<2x8x8xf32>
    %247 = tpu.matmul %246, %232, %cst_84 {dimension_numbers = #tpu.dot_dimension_numbers<[2], [1], [1], [2], [0, 0, 0, 1, 1, 2], [0], [0]>} : vector<2x8x8xbf16>, vector<2x8x8xbf16>, vector<2x8x8xf32> -> vector<2x8x8xf32>
    "tpu.trace_stop"() : () -> ()
    %248 = vector.shape_cast %247 : vector<2x8x8xf32> to vector<16x8xf32>
    %249 = vector.extract_strided_slice %216 {offsets = [0, 0, 8], sizes = [2, 8, 8], strides = [1, 1, 1]} : vector<2x8x32xf32> to vector<2x8x8xf32>
    %250 = arith.truncf %249 : vector<2x8x8xf32> to vector<2x8x8xbf16>
    %251 = vector.extract_strided_slice %225 {offsets = [0, 0, 8], sizes = [2, 8, 8], strides = [1, 1, 1]} : vector<2x8x32xf32> to vector<2x8x8xf32>
    %252 = arith.truncf %251 : vector<2x8x8xf32> to vector<2x8x8xbf16>
    %253 = vector.extract_strided_slice %226 {offsets = [0, 0, 8], sizes = [2, 8, 8], strides = [1, 1, 1]} : vector<2x8x32xf32> to vector<2x8x8xf32>
    %254 = arith.truncf %253 : vector<2x8x8xf32> to vector<2x8x8xbf16>
    "tpu.trace_start"() <{level = 10 : i32, message = "bqd,bkd->bqk"}> : () -> ()
    %cst_85 = arith.constant dense<0.000000e+00> : vector<2x8x8xf32>
    %255 = tpu.matmul %250, %252, %cst_85 {dimension_numbers = #tpu.dot_dimension_numbers<[2], [2], [1], [1], [0, 0, 0, 1, 1, 1], [0], [0]>} : vector<2x8x8xbf16>, vector<2x8x8xbf16>, vector<2x8x8xf32> -> vector<2x8x8xf32>
    "tpu.trace_stop"() : () -> ()
    %cst_86 = arith.constant 0.353553385 : f32
    %256 = vector.broadcast %cst_86 : f32 to vector<2x8x8xf32>
    %257 = arith.mulf %255, %256 : vector<2x8x8xf32>
    %cst_87 = arith.constant dense<0xFF800000> : vector<2x8xf32>
    %258 = vector.multi_reduction <maximumf>, %257, %cst_87 [2] : vector<2x8x8xf32> to vector<2x8xf32>
    %259 = vector.shape_cast %258 : vector<2x8xf32> to vector<2x8x1xf32>
    %260 = vector.broadcast %259 : vector<2x8x1xf32> to vector<2x8x8xf32>
    %261 = arith.subf %257, %260 : vector<2x8x8xf32>
    %262 = math.exp %261 : vector<2x8x8xf32>
    %cst_88 = arith.constant dense<0.000000e+00> : vector<2x8xf32>
    %263 = vector.multi_reduction <add>, %262, %cst_88 [2] : vector<2x8x8xf32> to vector<2x8xf32>
    %264 = vector.shape_cast %263 : vector<2x8xf32> to vector<2x8x1xf32>
    %265 = tpu.reciprocal %264 {approx = true} : vector<2x8x1xf32> -> vector<2x8x1xf32>
    %266 = vector.broadcast %265 : vector<2x8x1xf32> to vector<2x8x8xf32>
    %267 = arith.mulf %262, %266 : vector<2x8x8xf32>
    %268 = arith.truncf %267 : vector<2x8x8xf32> to vector<2x8x8xbf16>
    "tpu.trace_start"() <{level = 10 : i32, message = "bqk,bkd->bqd"}> : () -> ()
    %cst_89 = arith.constant dense<0.000000e+00> : vector<2x8x8xf32>
    %269 = tpu.matmul %268, %254, %cst_89 {dimension_numbers = #tpu.dot_dimension_numbers<[2], [1], [1], [2], [0, 0, 0, 1, 1, 2], [0], [0]>} : vector<2x8x8xbf16>, vector<2x8x8xbf16>, vector<2x8x8xf32> -> vector<2x8x8xf32>
    "tpu.trace_stop"() : () -> ()
    %270 = vector.shape_cast %269 : vector<2x8x8xf32> to vector<16x8xf32>
    %271 = vector.extract_strided_slice %216 {offsets = [0, 0, 16], sizes = [2, 8, 8], strides = [1, 1, 1]} : vector<2x8x32xf32> to vector<2x8x8xf32>
    %272 = arith.truncf %271 : vector<2x8x8xf32> to vector<2x8x8xbf16>
    %273 = vector.extract_strided_slice %225 {offsets = [0, 0, 16], sizes = [2, 8, 8], strides = [1, 1, 1]} : vector<2x8x32xf32> to vector<2x8x8xf32>
    %274 = arith.truncf %273 : vector<2x8x8xf32> to vector<2x8x8xbf16>
    %275 = vector.extract_strided_slice %226 {offsets = [0, 0, 16], sizes = [2, 8, 8], strides = [1, 1, 1]} : vector<2x8x32xf32> to vector<2x8x8xf32>
    %276 = arith.truncf %275 : vector<2x8x8xf32> to vector<2x8x8xbf16>
    "tpu.trace_start"() <{level = 10 : i32, message = "bqd,bkd->bqk"}> : () -> ()
    %cst_90 = arith.constant dense<0.000000e+00> : vector<2x8x8xf32>
    %277 = tpu.matmul %272, %274, %cst_90 {dimension_numbers = #tpu.dot_dimension_numbers<[2], [2], [1], [1], [0, 0, 0, 1, 1, 1], [0], [0]>} : vector<2x8x8xbf16>, vector<2x8x8xbf16>, vector<2x8x8xf32> -> vector<2x8x8xf32>
    "tpu.trace_stop"() : () -> ()
    %cst_91 = arith.constant 0.353553385 : f32
    %278 = vector.broadcast %cst_91 : f32 to vector<2x8x8xf32>
    %279 = arith.mulf %277, %278 : vector<2x8x8xf32>
    %cst_92 = arith.constant dense<0xFF800000> : vector<2x8xf32>
    %280 = vector.multi_reduction <maximumf>, %279, %cst_92 [2] : vector<2x8x8xf32> to vector<2x8xf32>
    %281 = vector.shape_cast %280 : vector<2x8xf32> to vector<2x8x1xf32>
    %282 = vector.broadcast %281 : vector<2x8x1xf32> to vector<2x8x8xf32>
    %283 = arith.subf %279, %282 : vector<2x8x8xf32>
    %284 = math.exp %283 : vector<2x8x8xf32>
    %cst_93 = arith.constant dense<0.000000e+00> : vector<2x8xf32>
    %285 = vector.multi_reduction <add>, %284, %cst_93 [2] : vector<2x8x8xf32> to vector<2x8xf32>
    %286 = vector.shape_cast %285 : vector<2x8xf32> to vector<2x8x1xf32>
    %287 = tpu.reciprocal %286 {approx = true} : vector<2x8x1xf32> -> vector<2x8x1xf32>
    %288 = vector.broadcast %287 : vector<2x8x1xf32> to vector<2x8x8xf32>
    %289 = arith.mulf %284, %288 : vector<2x8x8xf32>
    %290 = arith.truncf %289 : vector<2x8x8xf32> to vector<2x8x8xbf16>
    "tpu.trace_start"() <{level = 10 : i32, message = "bqk,bkd->bqd"}> : () -> ()
    %cst_94 = arith.constant dense<0.000000e+00> : vector<2x8x8xf32>
    %291 = tpu.matmul %290, %276, %cst_94 {dimension_numbers = #tpu.dot_dimension_numbers<[2], [1], [1], [2], [0, 0, 0, 1, 1, 2], [0], [0]>} : vector<2x8x8xbf16>, vector<2x8x8xbf16>, vector<2x8x8xf32> -> vector<2x8x8xf32>
    "tpu.trace_stop"() : () -> ()
    %292 = vector.shape_cast %291 : vector<2x8x8xf32> to vector<16x8xf32>
    %293 = vector.extract_strided_slice %216 {offsets = [0, 0, 24], sizes = [2, 8, 8], strides = [1, 1, 1]} : vector<2x8x32xf32> to vector<2x8x8xf32>
    %294 = arith.truncf %293 : vector<2x8x8xf32> to vector<2x8x8xbf16>
    %295 = vector.extract_strided_slice %225 {offsets = [0, 0, 24], sizes = [2, 8, 8], strides = [1, 1, 1]} : vector<2x8x32xf32> to vector<2x8x8xf32>
    %296 = arith.truncf %295 : vector<2x8x8xf32> to vector<2x8x8xbf16>
    %297 = vector.extract_strided_slice %226 {offsets = [0, 0, 24], sizes = [2, 8, 8], strides = [1, 1, 1]} : vector<2x8x32xf32> to vector<2x8x8xf32>
    %298 = arith.truncf %297 : vector<2x8x8xf32> to vector<2x8x8xbf16>
    "tpu.trace_start"() <{level = 10 : i32, message = "bqd,bkd->bqk"}> : () -> ()
    %cst_95 = arith.constant dense<0.000000e+00> : vector<2x8x8xf32>
    %299 = tpu.matmul %294, %296, %cst_95 {dimension_numbers = #tpu.dot_dimension_numbers<[2], [2], [1], [1], [0, 0, 0, 1, 1, 1], [0], [0]>} : vector<2x8x8xbf16>, vector<2x8x8xbf16>, vector<2x8x8xf32> -> vector<2x8x8xf32>
    "tpu.trace_stop"() : () -> ()
    %cst_96 = arith.constant 0.353553385 : f32
    %300 = vector.broadcast %cst_96 : f32 to vector<2x8x8xf32>
    %301 = arith.mulf %299, %300 : vector<2x8x8xf32>
    %cst_97 = arith.constant dense<0xFF800000> : vector<2x8xf32>
    %302 = vector.multi_reduction <maximumf>, %301, %cst_97 [2] : vector<2x8x8xf32> to vector<2x8xf32>
    %303 = vector.shape_cast %302 : vector<2x8xf32> to vector<2x8x1xf32>
    %304 = vector.broadcast %303 : vector<2x8x1xf32> to vector<2x8x8xf32>
    %305 = arith.subf %301, %304 : vector<2x8x8xf32>
    %306 = math.exp %305 : vector<2x8x8xf32>
    %cst_98 = arith.constant dense<0.000000e+00> : vector<2x8xf32>
    %307 = vector.multi_reduction <add>, %306, %cst_98 [2] : vector<2x8x8xf32> to vector<2x8xf32>
    %308 = vector.shape_cast %307 : vector<2x8xf32> to vector<2x8x1xf32>
    %309 = tpu.reciprocal %308 {approx = true} : vector<2x8x1xf32> -> vector<2x8x1xf32>
    %310 = vector.broadcast %309 : vector<2x8x1xf32> to vector<2x8x8xf32>
    %311 = arith.mulf %306, %310 : vector<2x8x8xf32>
    %312 = arith.truncf %311 : vector<2x8x8xf32> to vector<2x8x8xbf16>
    "tpu.trace_start"() <{level = 10 : i32, message = "bqk,bkd->bqd"}> : () -> ()
    %cst_99 = arith.constant dense<0.000000e+00> : vector<2x8x8xf32>
    %313 = tpu.matmul %312, %298, %cst_99 {dimension_numbers = #tpu.dot_dimension_numbers<[2], [1], [1], [2], [0, 0, 0, 1, 1, 2], [0], [0]>} : vector<2x8x8xbf16>, vector<2x8x8xbf16>, vector<2x8x8xf32> -> vector<2x8x8xf32>
    "tpu.trace_stop"() : () -> ()
    %314 = vector.shape_cast %313 : vector<2x8x8xf32> to vector<16x8xf32>
    %315 = tpu.concatenate %248, %270, %292, %314 in 1 : vector<16x8xf32>, vector<16x8xf32>, vector<16x8xf32>, vector<16x8xf32> -> vector<16x32xf32>
    %316 = arith.truncf %315 : vector<16x32xf32> to vector<16x32xbf16>
    %c1_100 = arith.constant 1 : index
    %c0_101 = arith.constant 0 : index
    %c0_102 = arith.constant 0 : index
    %317 = vector.load %arg7[%c1_100, %c0_101, %c0_102] : memref<2x32x32xbf16, #tpu.memory_space<vmem>>, vector<1x32x32xbf16>
    %318 = vector.shape_cast %317 : vector<1x32x32xbf16> to vector<32x32xbf16>
    %cst_103 = arith.constant dense<0.000000e+00> : vector<16x32xf32>
    %319 = tpu.matmul %316, %318, %cst_103 {dimension_numbers = #tpu.dot_dimension_numbers<[1], [0], [0], [1], [0, 0, 1, 1], [], []>} : vector<16x32xbf16>, vector<32x32xbf16>, vector<16x32xf32> -> vector<16x32xf32>
    %320 = arith.addf %180, %319 : vector<16x32xf32>
    %321 = arith.mulf %320, %320 : vector<16x32xf32>
    %cst_104 = arith.constant dense<0.000000e+00> : vector<16xf32>
    %322 = vector.multi_reduction <add>, %321, %cst_104 [1] : vector<16x32xf32> to vector<16xf32>
    %323 = vector.shape_cast %322 : vector<16xf32> to vector<16x1xf32>
    %cst_105 = arith.constant 3.200000e+01 : f32
    %324 = vector.broadcast %cst_105 : f32 to vector<16x1xf32>
    %325 = arith.divf %323, %324 : vector<16x1xf32>
    %cst_106 = arith.constant 9.99999974E-6 : f32
    %326 = vector.broadcast %cst_106 : f32 to vector<16x1xf32>
    %327 = arith.addf %325, %326 : vector<16x1xf32>
    %328 = math.rsqrt %327 : vector<16x1xf32>
    %329 = vector.broadcast %328 : vector<16x1xf32> to vector<16x32xf32>
    %330 = arith.mulf %320, %329 : vector<16x32xf32>
    %c1_107 = arith.constant 1 : index
    %c0_108 = arith.constant 0 : index
    %c0_109 = arith.constant 0 : index
    %331 = vector.load %arg8[%c1_107, %c0_108, %c0_109] : memref<2x1x32xf32, #tpu.memory_space<vmem>>, vector<1x1x32xf32>
    %332 = vector.shape_cast %331 : vector<1x1x32xf32> to vector<1x32xf32>
    %333 = vector.broadcast %332 : vector<1x32xf32> to vector<16x32xf32>
    %334 = arith.mulf %330, %333 : vector<16x32xf32>
    %335 = arith.truncf %334 : vector<16x32xf32> to vector<16x32xbf16>
    %c1_110 = arith.constant 1 : index
    %c0_111 = arith.constant 0 : index
    %c0_112 = arith.constant 0 : index
    %336 = vector.load %arg9[%c1_110, %c0_111, %c0_112] : memref<2x32x128xbf16, #tpu.memory_space<vmem>>, vector<1x32x128xbf16>
    %337 = vector.shape_cast %336 : vector<1x32x128xbf16> to vector<32x128xbf16>
    %cst_113 = arith.constant dense<0.000000e+00> : vector<16x128xf32>
    %338 = tpu.matmul %335, %337, %cst_113 {dimension_numbers = #tpu.dot_dimension_numbers<[1], [0], [0], [1], [0, 0, 1, 1], [], []>} : vector<16x32xbf16>, vector<32x128xbf16>, vector<16x128xf32> -> vector<16x128xf32>
    %339 = vector.extract_strided_slice %338 {offsets = [0, 0], sizes = [16, 64], strides = [1, 1]} : vector<16x128xf32> to vector<16x64xf32>
    %340 = vector.extract_strided_slice %338 {offsets = [0, 64], sizes = [16, 64], strides = [1, 1]} : vector<16x128xf32> to vector<16x64xf32>
    %341 = arith.negf %339 : vector<16x64xf32>
    %342 = math.exp %341 : vector<16x64xf32>
    %cst_114 = arith.constant 1.000000e+00 : f32
    %343 = vector.broadcast %cst_114 : f32 to vector<16x64xf32>
    %344 = arith.addf %343, %342 : vector<16x64xf32>
    %345 = arith.divf %343, %344 : vector<16x64xf32>
    %346 = arith.mulf %339, %345 : vector<16x64xf32>
    %347 = arith.mulf %346, %340 : vector<16x64xf32>
    %348 = arith.truncf %347 : vector<16x64xf32> to vector<16x64xbf16>
    %c1_115 = arith.constant 1 : index
    %c0_116 = arith.constant 0 : index
    %c0_117 = arith.constant 0 : index
    %349 = vector.load %arg10[%c1_115, %c0_116, %c0_117] : memref<2x64x32xbf16, #tpu.memory_space<vmem>>, vector<1x64x32xbf16>
    %350 = vector.shape_cast %349 : vector<1x64x32xbf16> to vector<64x32xbf16>
    %cst_118 = arith.constant dense<0.000000e+00> : vector<16x32xf32>
    %351 = tpu.matmul %348, %350, %cst_118 {dimension_numbers = #tpu.dot_dimension_numbers<[1], [0], [0], [1], [0, 0, 1, 1], [], []>} : vector<16x64xbf16>, vector<64x32xbf16>, vector<16x32xf32> -> vector<16x32xf32>
    %352 = arith.addf %320, %351 : vector<16x32xf32>
    %c0_119 = arith.constant 0 : index
    %c0_120 = arith.constant 0 : index
    %353 = vector.load %arg17[%c0_119, %c0_120] : memref<32x32xf32, #tpu.memory_space<vmem>>, vector<16x32xf32>
    tpu.vector_store %arg17[%c0_119, %c0_120], %352 {strides = array<i32>} : memref<32x32xf32, #tpu.memory_space<vmem>>, vector<16x32xf32>,
    %c0_121 = arith.constant 0 : index
    %c0_122 = arith.constant 0 : index
    %354 = tpu.strided_load %arg17[%c0_121, %c0_122] {strides = array<i32: 2, 1>} : memref<32x32xf32, #tpu.memory_space<vmem>>, vector<8x32xf32>
    %c1_123 = arith.constant 1 : index
    %c0_124 = arith.constant 0 : index
    %355 = tpu.strided_load %arg17[%c1_123, %c0_124] {strides = array<i32: 2, 1>} : memref<32x32xf32, #tpu.memory_space<vmem>>, vector<8x32xf32>
    %356 = arith.addf %354, %355 : vector<8x32xf32>
    %cst_125 = arith.constant 5.000000e-01 : f32
    %357 = vector.broadcast %cst_125 : f32 to vector<8x32xf32>
    %358 = arith.mulf %357, %356 : vector<8x32xf32>
    %359 = arith.mulf %358, %358 : vector<8x32xf32>
    %cst_126 = arith.constant dense<0.000000e+00> : vector<8xf32>
    %360 = vector.multi_reduction <add>, %359, %cst_126 [1] : vector<8x32xf32> to vector<8xf32>
    %361 = vector.shape_cast %360 : vector<8xf32> to vector<8x1xf32>
    %cst_127 = arith.constant 3.200000e+01 : f32
    %362 = vector.broadcast %cst_127 : f32 to vector<8x1xf32>
    %363 = arith.divf %361, %362 : vector<8x1xf32>
    %cst_128 = arith.constant 9.99999974E-6 : f32
    %364 = vector.broadcast %cst_128 : f32 to vector<8x1xf32>
    %365 = arith.addf %363, %364 : vector<8x1xf32>
    %366 = math.rsqrt %365 : vector<8x1xf32>
    %367 = vector.broadcast %366 : vector<8x1xf32> to vector<8x32xf32>
    %368 = arith.mulf %358, %367 : vector<8x32xf32>
    %c0_129 = arith.constant 0 : index
    %c0_130 = arith.constant 0 : index
    %369 = vector.load %arg11[%c0_129, %c0_130] : memref<1x32xf32, #tpu.memory_space<vmem>>, vector<1x32xf32>
    %370 = vector.broadcast %369 : vector<1x32xf32> to vector<8x32xf32>
    %371 = arith.mulf %368, %370 : vector<8x32xf32>
    %cst_131 = arith.constant 0.000000e+00 : f32
    %372 = vector.broadcast %cst_131 : f32 to vector<2x32xf32>
    %c0_132 = arith.constant 0 : index
    %c0_133 = arith.constant 0 : index
    %373 = vector.load %arg17[%c0_132, %c0_133] : memref<32x32xf32, #tpu.memory_space<vmem>>, vector<2x32xf32>
    tpu.vector_store %arg17[%c0_132, %c0_133], %372 {strides = array<i32>} : memref<32x32xf32, #tpu.memory_space<vmem>>, vector<2x32xf32>,
    %c2 = arith.constant 2 : index
    %c0_134 = arith.constant 0 : index
    %374 = vector.load %arg17[%c2, %c0_134] : memref<32x32xf32, #tpu.memory_space<vmem>>, vector<8x32xf32>
    tpu.vector_store %arg17[%c2, %c0_134], %371 {strides = array<i32>} : memref<32x32xf32, #tpu.memory_space<vmem>>, vector<8x32xf32>,
    %c10 = arith.constant 10 : index
    %c0_135 = arith.constant 0 : index
    %375 = vector.load %arg17[%c10, %c0_135] : memref<32x32xf32, #tpu.memory_space<vmem>>, vector<2x32xf32>
    tpu.vector_store %arg17[%c10, %c0_135], %372 {strides = array<i32>} : memref<32x32xf32, #tpu.memory_space<vmem>>, vector<2x32xf32>,
    %376 = tpu.iota {dimensions = array<i32: 0>} : vector<8x1xi32>
    %c3_i32 = arith.constant 3 : i32
    %377 = vector.broadcast %c3_i32 : i32 to vector<8x1xi32>
    %378 = arith.andi %376, %377 : vector<8x1xi32>
    %cst_136 = arith.constant 0.000000e+00 : f32
    %379 = vector.broadcast %cst_136 : f32 to vector<8x2xf32>
    %c-2_i32 = arith.constant -2 : i32
    %380 = vector.broadcast %c-2_i32 : i32 to vector<8x1xi32>
    %381 = arith.addi %378, %380 : vector<8x1xi32>
    %c0_i32 = arith.constant 0 : i32
    %382 = vector.broadcast %c0_i32 : i32 to vector<8x1xi32>
    %383 = arith.cmpi sge, %381, %382 : vector<8x1xi32>
    %c-2_i32_137 = arith.constant -2 : i32
    %384 = vector.broadcast %c-2_i32_137 : i32 to vector<8x1xi32>
    %385 = arith.addi %378, %384 : vector<8x1xi32>
    %c4_i32 = arith.constant 4 : i32
    %386 = vector.broadcast %c4_i32 : i32 to vector<8x1xi32>
    %387 = arith.cmpi slt, %385, %386 : vector<8x1xi32>
    %388 = arith.andi %383, %387 : vector<8x1xi1>
    %389 = arith.extui %388 : vector<8x1xi1> to vector<8x1xi32>
    %390 = arith.sitofp %389 : vector<8x1xi32> to vector<8x1xf32>
    %c0_138 = arith.constant 0 : index
    %c0_139 = arith.constant 0 : index
    %391 = vector.load %arg17[%c0_138, %c0_139] : memref<32x32xf32, #tpu.memory_space<vmem>>, vector<8x32xf32>
    %392 = arith.truncf %391 : vector<8x32xf32> to vector<8x32xbf16>
    %c0_140 = arith.constant 0 : index
    %c0_141 = arith.constant 0 : index
    %c0_142 = arith.constant 0 : index
    %393 = vector.load %arg12[%c0_140, %c0_141, %c0_142] : memref<5x32x2xbf16, #tpu.memory_space<vmem>>, vector<1x32x2xbf16>
    %394 = vector.shape_cast %393 : vector<1x32x2xbf16> to vector<32x2xbf16>
    %cst_143 = arith.constant dense<0.000000e+00> : vector<8x2xf32>
    %395 = tpu.matmul %392, %394, %cst_143 {dimension_numbers = #tpu.dot_dimension_numbers<[1], [0], [0], [1], [0, 0, 1, 1], [], []>} : vector<8x32xbf16>, vector<32x2xbf16>, vector<8x2xf32> -> vector<8x2xf32>
    %396 = vector.broadcast %390 : vector<8x1xf32> to vector<8x2xf32>
    %397 = arith.mulf %396, %395 : vector<8x2xf32>
    %398 = arith.addf %379, %397 : vector<8x2xf32>
    %c-1_i32 = arith.constant -1 : i32
    %399 = vector.broadcast %c-1_i32 : i32 to vector<8x1xi32>
    %400 = arith.addi %378, %399 : vector<8x1xi32>
    %c0_i32_144 = arith.constant 0 : i32
    %401 = vector.broadcast %c0_i32_144 : i32 to vector<8x1xi32>
    %402 = arith.cmpi sge, %400, %401 : vector<8x1xi32>
    %c-1_i32_145 = arith.constant -1 : i32
    %403 = vector.broadcast %c-1_i32_145 : i32 to vector<8x1xi32>
    %404 = arith.addi %378, %403 : vector<8x1xi32>
    %c4_i32_146 = arith.constant 4 : i32
    %405 = vector.broadcast %c4_i32_146 : i32 to vector<8x1xi32>
    %406 = arith.cmpi slt, %404, %405 : vector<8x1xi32>
    %407 = arith.andi %402, %406 : vector<8x1xi1>
    %408 = arith.extui %407 : vector<8x1xi1> to vector<8x1xi32>
    %409 = arith.sitofp %408 : vector<8x1xi32> to vector<8x1xf32>
    %c1_147 = arith.constant 1 : index
    %c0_148 = arith.constant 0 : index
    %410 = vector.load %arg17[%c1_147, %c0_148] : memref<32x32xf32, #tpu.memory_space<vmem>>, vector<8x32xf32>
    %411 = arith.truncf %410 : vector<8x32xf32> to vector<8x32xbf16>
    %c1_149 = arith.constant 1 : index
    %c0_150 = arith.constant 0 : index
    %c0_151 = arith.constant 0 : index
    %412 = vector.load %arg12[%c1_149, %c0_150, %c0_151] : memref<5x32x2xbf16, #tpu.memory_space<vmem>>, vector<1x32x2xbf16>
    %413 = vector.shape_cast %412 : vector<1x32x2xbf16> to vector<32x2xbf16>
    %cst_152 = arith.constant dense<0.000000e+00> : vector<8x2xf32>
    %414 = tpu.matmul %411, %413, %cst_152 {dimension_numbers = #tpu.dot_dimension_numbers<[1], [0], [0], [1], [0, 0, 1, 1], [], []>} : vector<8x32xbf16>, vector<32x2xbf16>, vector<8x2xf32> -> vector<8x2xf32>
    %415 = vector.broadcast %409 : vector<8x1xf32> to vector<8x2xf32>
    %416 = arith.mulf %415, %414 : vector<8x2xf32>
    %417 = arith.addf %398, %416 : vector<8x2xf32>
    %c0_i32_153 = arith.constant 0 : i32
    %418 = vector.broadcast %c0_i32_153 : i32 to vector<8x1xi32>
    %419 = arith.addi %378, %418 : vector<8x1xi32>
    %c0_i32_154 = arith.constant 0 : i32
    %420 = vector.broadcast %c0_i32_154 : i32 to vector<8x1xi32>
    %421 = arith.cmpi sge, %419, %420 : vector<8x1xi32>
    %c0_i32_155 = arith.constant 0 : i32
    %422 = vector.broadcast %c0_i32_155 : i32 to vector<8x1xi32>
    %423 = arith.addi %378, %422 : vector<8x1xi32>
    %c4_i32_156 = arith.constant 4 : i32
    %424 = vector.broadcast %c4_i32_156 : i32 to vector<8x1xi32>
    %425 = arith.cmpi slt, %423, %424 : vector<8x1xi32>
    %426 = arith.andi %421, %425 : vector<8x1xi1>
    %427 = arith.extui %426 : vector<8x1xi1> to vector<8x1xi32>
    %428 = arith.sitofp %427 : vector<8x1xi32> to vector<8x1xf32>
    %c2_157 = arith.constant 2 : index
    %c0_158 = arith.constant 0 : index
    %429 = vector.load %arg17[%c2_157, %c0_158] : memref<32x32xf32, #tpu.memory_space<vmem>>, vector<8x32xf32>
    %430 = arith.truncf %429 : vector<8x32xf32> to vector<8x32xbf16>
    %c2_159 = arith.constant 2 : index
    %c0_160 = arith.constant 0 : index
    %c0_161 = arith.constant 0 : index
    %431 = vector.load %arg12[%c2_159, %c0_160, %c0_161] : memref<5x32x2xbf16, #tpu.memory_space<vmem>>, vector<1x32x2xbf16>
    %432 = vector.shape_cast %431 : vector<1x32x2xbf16> to vector<32x2xbf16>
    %cst_162 = arith.constant dense<0.000000e+00> : vector<8x2xf32>
    %433 = tpu.matmul %430, %432, %cst_162 {dimension_numbers = #tpu.dot_dimension_numbers<[1], [0], [0], [1], [0, 0, 1, 1], [], []>} : vector<8x32xbf16>, vector<32x2xbf16>, vector<8x2xf32> -> vector<8x2xf32>
    %434 = vector.broadcast %428 : vector<8x1xf32> to vector<8x2xf32>
    %435 = arith.mulf %434, %433 : vector<8x2xf32>
    %436 = arith.addf %417, %435 : vector<8x2xf32>
    %c1_i32 = arith.constant 1 : i32
    %437 = vector.broadcast %c1_i32 : i32 to vector<8x1xi32>
    %438 = arith.addi %378, %437 : vector<8x1xi32>
    %c0_i32_163 = arith.constant 0 : i32
    %439 = vector.broadcast %c0_i32_163 : i32 to vector<8x1xi32>
    %440 = arith.cmpi sge, %438, %439 : vector<8x1xi32>
    %c1_i32_164 = arith.constant 1 : i32
    %441 = vector.broadcast %c1_i32_164 : i32 to vector<8x1xi32>
    %442 = arith.addi %378, %441 : vector<8x1xi32>
    %c4_i32_165 = arith.constant 4 : i32
    %443 = vector.broadcast %c4_i32_165 : i32 to vector<8x1xi32>
    %444 = arith.cmpi slt, %442, %443 : vector<8x1xi32>
    %445 = arith.andi %440, %444 : vector<8x1xi1>
    %446 = arith.extui %445 : vector<8x1xi1> to vector<8x1xi32>
    %447 = arith.sitofp %446 : vector<8x1xi32> to vector<8x1xf32>
    %c3 = arith.constant 3 : index
    %c0_166 = arith.constant 0 : index
    %448 = vector.load %arg17[%c3, %c0_166] : memref<32x32xf32, #tpu.memory_space<vmem>>, vector<8x32xf32>
    %449 = arith.truncf %448 : vector<8x32xf32> to vector<8x32xbf16>
    %c3_167 = arith.constant 3 : index
    %c0_168 = arith.constant 0 : index
    %c0_169 = arith.constant 0 : index
    %450 = vector.load %arg12[%c3_167, %c0_168, %c0_169] : memref<5x32x2xbf16, #tpu.memory_space<vmem>>, vector<1x32x2xbf16>
    %451 = vector.shape_cast %450 : vector<1x32x2xbf16> to vector<32x2xbf16>
    %cst_170 = arith.constant dense<0.000000e+00> : vector<8x2xf32>
    %452 = tpu.matmul %449, %451, %cst_170 {dimension_numbers = #tpu.dot_dimension_numbers<[1], [0], [0], [1], [0, 0, 1, 1], [], []>} : vector<8x32xbf16>, vector<32x2xbf16>, vector<8x2xf32> -> vector<8x2xf32>
    %453 = vector.broadcast %447 : vector<8x1xf32> to vector<8x2xf32>
    %454 = arith.mulf %453, %452 : vector<8x2xf32>
    %455 = arith.addf %436, %454 : vector<8x2xf32>
    %c2_i32 = arith.constant 2 : i32
    %456 = vector.broadcast %c2_i32 : i32 to vector<8x1xi32>
    %457 = arith.addi %378, %456 : vector<8x1xi32>
    %c0_i32_171 = arith.constant 0 : i32
    %458 = vector.broadcast %c0_i32_171 : i32 to vector<8x1xi32>
    %459 = arith.cmpi sge, %457, %458 : vector<8x1xi32>
    %c2_i32_172 = arith.constant 2 : i32
    %460 = vector.broadcast %c2_i32_172 : i32 to vector<8x1xi32>
    %461 = arith.addi %378, %460 : vector<8x1xi32>
    %c4_i32_173 = arith.constant 4 : i32
    %462 = vector.broadcast %c4_i32_173 : i32 to vector<8x1xi32>
    %463 = arith.cmpi slt, %461, %462 : vector<8x1xi32>
    %464 = arith.andi %459, %463 : vector<8x1xi1>
    %465 = arith.extui %464 : vector<8x1xi1> to vector<8x1xi32>
    %466 = arith.sitofp %465 : vector<8x1xi32> to vector<8x1xf32>
    %c4 = arith.constant 4 : index
    %c0_174 = arith.constant 0 : index
    %467 = vector.load %arg17[%c4, %c0_174] : memref<32x32xf32, #tpu.memory_space<vmem>>, vector<8x32xf32>
    %468 = arith.truncf %467 : vector<8x32xf32> to vector<8x32xbf16>
    %c4_175 = arith.constant 4 : index
    %c0_176 = arith.constant 0 : index
    %c0_177 = arith.constant 0 : index
    %469 = vector.load %arg12[%c4_175, %c0_176, %c0_177] : memref<5x32x2xbf16, #tpu.memory_space<vmem>>, vector<1x32x2xbf16>
    %470 = vector.shape_cast %469 : vector<1x32x2xbf16> to vector<32x2xbf16>
    %cst_178 = arith.constant dense<0.000000e+00> : vector<8x2xf32>
    %471 = tpu.matmul %468, %470, %cst_178 {dimension_numbers = #tpu.dot_dimension_numbers<[1], [0], [0], [1], [0, 0, 1, 1], [], []>} : vector<8x32xbf16>, vector<32x2xbf16>, vector<8x2xf32> -> vector<8x2xf32>
    %472 = vector.broadcast %466 : vector<8x1xf32> to vector<8x2xf32>
    %473 = arith.mulf %472, %471 : vector<8x2xf32>
    %474 = arith.addf %455, %473 : vector<8x2xf32>
    %c0_179 = arith.constant 0 : index
    %c0_180 = arith.constant 0 : index
    %475 = vector.load %arg13[%c0_179, %c0_180] : memref<1x2xf32, #tpu.memory_space<vmem>>, vector<1x2xf32>
    %476 = vector.broadcast %475 : vector<1x2xf32> to vector<8x2xf32>
    %477 = arith.addf %474, %476 : vector<8x2xf32>
    %478 = vector.extract_strided_slice %477 {offsets = [0, 0], sizes = [8, 1], strides = [1, 1]} : vector<8x2xf32> to vector<8x1xf32>
    %479 = vector.extract_strided_slice %477 {offsets = [0, 1], sizes = [8, 1], strides = [1, 1]} : vector<8x2xf32> to vector<8x1xf32>
    %480 = arith.negf %479 : vector<8x1xf32>
    %481 = math.exp %480 : vector<8x1xf32>
    %cst_181 = arith.constant 1.000000e+00 : f32
    %482 = vector.broadcast %cst_181 : f32 to vector<8x1xf32>
    %483 = arith.addf %482, %481 : vector<8x1xf32>
    %484 = arith.divf %482, %483 : vector<8x1xf32>
    %485 = arith.mulf %478, %484 : vector<8x1xf32>
    %486 = arith.negf %485 : vector<8x1xf32>
    %487 = math.exp %486 : vector<8x1xf32>
    %cst_182 = arith.constant 1.000000e+00 : f32
    %488 = vector.broadcast %cst_182 : f32 to vector<8x1xf32>
    %489 = arith.addf %488, %487 : vector<8x1xf32>
    %490 = arith.divf %488, %489 : vector<8x1xf32>
    %491 = arith.mulf %485, %490 : vector<8x1xf32>
    %492 = tpu.iota {dimensions = array<i32: 1>} : vector<2x8xi32>
    %493 = tpu.iota {dimensions = array<i32: 0>} : vector<2x8xi32>
    %c4_i32_183 = arith.constant 4 : i32
    %494 = vector.broadcast %c4_i32_183 : i32 to vector<2x8xi32>
    %495 = arith.muli %493, %494 : vector<2x8xi32>
    %496 = arith.cmpi sge, %492, %495 : vector<2x8xi32>
    %c1_i32_184 = arith.constant 1 : i32
    %497 = vector.broadcast %c1_i32_184 : i32 to vector<2x8xi32>
    %498 = arith.addi %493, %497 : vector<2x8xi32>
    %c4_i32_185 = arith.constant 4 : i32
    %499 = vector.broadcast %c4_i32_185 : i32 to vector<2x8xi32>
    %500 = arith.muli %498, %499 : vector<2x8xi32>
    %501 = arith.cmpi slt, %492, %500 : vector<2x8xi32>
    %502 = arith.andi %496, %501 : vector<2x8xi1>
    %503 = arith.extui %502 : vector<2x8xi1> to vector<2x8xi32>
    %504 = arith.sitofp %503 : vector<2x8xi32> to vector<2x8xf32>
    %505 = tpu.iota {dimensions = array<i32: 0>} : vector<8x4xi32>
    %506 = tpu.iota {dimensions = array<i32: 1>} : vector<8x4xi32>
    %c3_i32_186 = arith.constant 3 : i32
    %507 = vector.broadcast %c3_i32_186 : i32 to vector<8x4xi32>
    %508 = arith.andi %505, %507 : vector<8x4xi32>
    %509 = arith.cmpi eq, %508, %506 : vector<8x4xi32>
    %510 = arith.extui %509 : vector<8x4xi1> to vector<8x4xi32>
    %511 = arith.sitofp %510 : vector<8x4xi32> to vector<8x4xf32>
    %512 = vector.broadcast %491 : vector<8x1xf32> to vector<8x4xf32>
    %513 = arith.mulf %512, %511 : vector<8x4xf32>
    %cst_187 = arith.constant dense<0.000000e+00> : vector<2x4xf32>
    %514 = tpu.matmul %504, %513, %cst_187 {dimension_numbers = #tpu.dot_dimension_numbers<[1], [0], [0], [1], [0, 0, 1, 1], [], []>} : vector<2x8xf32>, vector<8x4xf32>, vector<2x4xf32> -> vector<2x4xf32>
    %515 = arith.mulf %514, %514 : vector<2x4xf32>
    %cst_188 = arith.constant dense<0.000000e+00> : vector<2xf32>
    %516 = vector.multi_reduction <add>, %515, %cst_188 [1] : vector<2x4xf32> to vector<2xf32>
    %517 = vector.shape_cast %516 : vector<2xf32> to vector<2x1xf32>
    %cst_189 = arith.constant 4.000000e+00 : f32
    %518 = vector.broadcast %cst_189 : f32 to vector<2x1xf32>
    %519 = arith.divf %517, %518 : vector<2x1xf32>
    %cst_190 = arith.constant 9.99999974E-6 : f32
    %520 = vector.broadcast %cst_190 : f32 to vector<2x1xf32>
    %521 = arith.addf %519, %520 : vector<2x1xf32>
    %522 = math.rsqrt %521 : vector<2x1xf32>
    %523 = vector.broadcast %522 : vector<2x1xf32> to vector<2x4xf32>
    %524 = arith.mulf %514, %523 : vector<2x4xf32>
    %c0_191 = arith.constant 0 : index
    %c0_192 = arith.constant 0 : index
    %525 = vector.load %arg14[%c0_191, %c0_192] : memref<1x4xf32, #tpu.memory_space<vmem>>, vector<1x4xf32>
    %526 = vector.broadcast %525 : vector<1x4xf32> to vector<2x4xf32>
    %527 = arith.mulf %524, %526 : vector<2x4xf32>
    %c0_193 = arith.constant 0 : index
    %c0_194 = arith.constant 0 : index
    %528 = vector.load %arg15[%c0_193, %c0_194] : memref<4x1xf32, #tpu.memory_space<vmem>>, vector<4x1xf32>
    %cst_195 = arith.constant dense<0.000000e+00> : vector<2x1xf32>
    %529 = tpu.matmul %527, %528, %cst_195 {dimension_numbers = #tpu.dot_dimension_numbers<[1], [0], [0], [1], [0, 0, 1, 1], [], []>} : vector<2x4xf32>, vector<4x1xf32>, vector<2x1xf32> -> vector<2x1xf32>
    %c0_196 = arith.constant 0 : index
    %c0_197 = arith.constant 0 : index
    %c0_198 = arith.constant 0 : index
    %530 = vector.load %arg16[%c0_196, %c0_197, %c0_198] : memref<2x1x1xf32, #tpu.memory_space<vmem>>, vector<2x1x1xf32>
    %531 = vector.shape_cast %530 : vector<2x1x1xf32> to vector<2x1xf32>
    %532 = vector.shape_cast %529 : vector<2x1xf32> to vector<2x1x1xf32>
    tpu.vector_store %arg16[%c0_196, %c0_197, %c0_198], %532 {strides = array<i32>} : memref<2x1x1xf32, #tpu.memory_space<vmem>>, vector<2x1x1xf32>,
    return
  }
  func.func @transform_0(%arg0: i32) -> (i32, i32, i32) {
    %c0_i32 = arith.constant 0 : i32
    %c0_i32_0 = arith.constant 0 : i32
    %c0_i32_1 = arith.constant 0 : i32
    return %arg0, %c0_i32, %c0_i32_0 : i32, i32, i32
  }
  func.func @transform_1(%arg0: i32) -> (i32, i32) {
    %c0_i32 = arith.constant 0 : i32
    %c0_i32_0 = arith.constant 0 : i32
    %c0_i32_1 = arith.constant 0 : i32
    return %c0_i32, %c0_i32_0 : i32, i32
  }
  func.func @transform_2(%arg0: i32) -> (i32, i32) {
    %c0_i32 = arith.constant 0 : i32
    %c0_i32_0 = arith.constant 0 : i32
    %c0_i32_1 = arith.constant 0 : i32
    return %c0_i32, %c0_i32_0 : i32, i32
  }
  func.func @transform_3(%arg0: i32) -> (i32, i32) {
    %c0_i32 = arith.constant 0 : i32
    %c0_i32_0 = arith.constant 0 : i32
    %c0_i32_1 = arith.constant 0 : i32
    return %c0_i32, %c0_i32_0 : i32, i32
  }
  func.func @transform_4(%arg0: i32) -> (i32, i32, i32) {
    %c0_i32 = arith.constant 0 : i32
    %c0_i32_0 = arith.constant 0 : i32
    %c0_i32_1 = arith.constant 0 : i32
    %c0_i32_2 = arith.constant 0 : i32
    return %c0_i32, %c0_i32_0, %c0_i32_1 : i32, i32, i32
  }
  func.func @transform_5(%arg0: i32) -> (i32, i32, i32) {
    %c0_i32 = arith.constant 0 : i32
    %c0_i32_0 = arith.constant 0 : i32
    %c0_i32_1 = arith.constant 0 : i32
    %c0_i32_2 = arith.constant 0 : i32
    return %c0_i32, %c0_i32_0, %c0_i32_1 : i32, i32, i32
  }
  func.func @transform_6(%arg0: i32) -> (i32, i32, i32) {
    %c0_i32 = arith.constant 0 : i32
    %c0_i32_0 = arith.constant 0 : i32
    %c0_i32_1 = arith.constant 0 : i32
    %c0_i32_2 = arith.constant 0 : i32
    return %c0_i32, %c0_i32_0, %c0_i32_1 : i32, i32, i32
  }
  func.func @transform_7(%arg0: i32) -> (i32, i32, i32) {
    %c0_i32 = arith.constant 0 : i32
    %c0_i32_0 = arith.constant 0 : i32
    %c0_i32_1 = arith.constant 0 : i32
    %c0_i32_2 = arith.constant 0 : i32
    return %c0_i32, %c0_i32_0, %c0_i32_1 : i32, i32, i32
  }
  func.func @transform_8(%arg0: i32) -> (i32, i32, i32) {
    %c0_i32 = arith.constant 0 : i32
    %c0_i32_0 = arith.constant 0 : i32
    %c0_i32_1 = arith.constant 0 : i32
    %c0_i32_2 = arith.constant 0 : i32
    return %c0_i32, %c0_i32_0, %c0_i32_1 : i32, i32, i32
  }
  func.func @transform_9(%arg0: i32) -> (i32, i32, i32) {
    %c0_i32 = arith.constant 0 : i32
    %c0_i32_0 = arith.constant 0 : i32
    %c0_i32_1 = arith.constant 0 : i32
    %c0_i32_2 = arith.constant 0 : i32
    return %c0_i32, %c0_i32_0, %c0_i32_1 : i32, i32, i32
  }
  func.func @transform_10(%arg0: i32) -> (i32, i32) {
    %c0_i32 = arith.constant 0 : i32
    %c0_i32_0 = arith.constant 0 : i32
    %c0_i32_1 = arith.constant 0 : i32
    return %c0_i32, %c0_i32_0 : i32, i32
  }
  func.func @transform_11(%arg0: i32) -> (i32, i32, i32) {
    %c0_i32 = arith.constant 0 : i32
    %c0_i32_0 = arith.constant 0 : i32
    %c0_i32_1 = arith.constant 0 : i32
    %c0_i32_2 = arith.constant 0 : i32
    return %c0_i32, %c0_i32_0, %c0_i32_1 : i32, i32, i32
  }
  func.func @transform_12(%arg0: i32) -> (i32, i32) {
    %c0_i32 = arith.constant 0 : i32
    %c0_i32_0 = arith.constant 0 : i32
    %c0_i32_1 = arith.constant 0 : i32
    return %c0_i32, %c0_i32_0 : i32, i32
  }
  func.func @transform_13(%arg0: i32) -> (i32, i32) {
    %c0_i32 = arith.constant 0 : i32
    %c0_i32_0 = arith.constant 0 : i32
    %c0_i32_1 = arith.constant 0 : i32
    return %c0_i32, %c0_i32_0 : i32, i32
  }
  func.func @transform_14(%arg0: i32) -> (i32, i32) {
    %c0_i32 = arith.constant 0 : i32
    %c0_i32_0 = arith.constant 0 : i32
    %c0_i32_1 = arith.constant 0 : i32
    return %c0_i32, %c0_i32_0 : i32, i32
  }
  func.func @transform_15(%arg0: i32) -> (i32, i32, i32) {
    %c0_i32 = arith.constant 0 : i32
    %c0_i32_0 = arith.constant 0 : i32
    %c0_i32_1 = arith.constant 0 : i32
    return %arg0, %c0_i32, %c0_i32_0 : i32, i32, i32
  }
}

</mosaic_0001>

<bundles_post_ra>
// kernel: tpu_custom_call.1
= control target key start
LH: loop header
LB: loop body
LE: loop exit
PB: predicated region body
PF: predicated region fallthrough
CT: control target
= control target key end

     0   :  { %vm67_vm0 = vcmask 261120   ;;  %s4656_s21 = smov 96   ;;  %s4657_s24 = smov 32   ;;  %vm4659_vm1 = vmmov 0   ;;  %vm366_vm2 = vcmask 64512   ;;  %vm468_vm3 = vcmask 130048   ;;  %s5538_s0 = inlined_call_operand.vmem [shape: f32[2,16,32], index: 0, kind: input, shape index: {}]   ;;  %s5539_s5 = inlined_call_operand.vmem [shape: bf16[2,32,96], index: 5, kind: input, shape index: {}]   ;;  %s5540_s4 = inlined_call_operand.vmem [shape: f32[2,1,32], index: 4, kind: input, shape index: {}]   ;;  %s5541_s3 = inlined_call_operand.vmem [shape: bf16[32,32], index: 3, kind: input, shape index: {}]   ;;  %s5542_s1 = inlined_call_operand.vmem [shape: f32[16,32], index: 1, kind: input, shape index: {}]   ;;  %s5543_s2 = inlined_call_operand.vmem [shape: f32[16,32], index: 2, kind: input, shape index: {}]   ;;  %s5544_s6 = inlined_call_operand.vmem [shape: bf16[2,32,32], index: 6, kind: input, shape index: {}]   ;;  %s5545_s8 = inlined_call_operand.vmem [shape: bf16[2,32,128], index: 8, kind: input, shape index: {}]   ;;  %s5546_s7 = inlined_call_operand.vmem [shape: f32[2,1,32], index: 7, kind: input, shape index: {}]   ;;  %s5547_s9 = inlined_call_operand.vmem [shape: bf16[2,64,32], index: 9, kind: input, shape index: {}]   ;;  %s5548_s11 = inlined_call_operand.vmem [shape: bf16[5,32,2], index: 11, kind: input, shape index: {}]   ;;  %s5549_s10 = inlined_call_operand.vmem [shape: f32[1,32], index: 10, kind: input, shape index: {}]   ;;  %s5550_s12 = inlined_call_operand.vmem [shape: f32[1,2], index: 12, kind: input, shape index: {}]   ;;  %s5551_s14 = inlined_call_operand.vmem [shape: f32[4,1], index: 14, kind: input, shape index: {}]   ;;  %s5552_s13 = inlined_call_operand.vmem [shape: f32[1,4], index: 13, kind: input, shape index: {}]   ;;  %s5553_s15 = inlined_call_operand.vmem [shape: f32[2,1,1], index: 15, kind: output, shape index: {}]  }
   0x1   :  { %v57_v0 = vld [vmem:[%s5538_s0 + $0x10] sm:$0xff]  ;;  %v55_v1 = vld [vmem:[%s5538_s0] sm:$0xff]  ;;  %v58_v2 = vld [vmem:[%s5538_s0 + $0x18] sm:$0xff]  ;;  %s4660_s16 = smov 64   ;;  %s4661_s17 = smov 88   ;;  %vm1405_vm4 = vcmask 195584  }
   0x2   :  { %v65_v3 = vmul.f32 %v57_v0, %v57_v0  ;;  %v63_v4 = vmul.f32 %v55_v1, %v55_v1  ;;  %v66_v5 = vmul.f32 %v58_v2, %v58_v2  ;;  %v56_v6 = vld [vmem:[%s5538_s0 + $0x8] sm:$0xff]  ;;  %v4463_v13 = vld [vmem:[%s5539_s5] sm:$0xff]   ;;  %s4662_s18 = smov 120   ;;  %s4663_s19 = smov 56   ;;  %vm1685_vm5 = vcmask 523264  }
   0x3   :  { %v64_v7 = vmul.f32 %v56_v6, %v56_v6  ;;  %v4462_v12 = vld [vmem:[%s5539_s5 + $0x8] sm:$0xff]   ;;  %v3772_v31 = vld [vmem:[%s5540_s4] ss:$0 sm:$0xff]  ;;  %s4664_s20 = smov 80   ;;  %s4665_s22 = smov 112   ;;  %vm2102_vm6 = vcmask 1043456  }
   0x4   :  { %v74_v8 = vsel %vm67_vm0, %v65_v3, 0.0  ;;  %v68_v9 = vsel %vm67_vm0, %v63_v4, 0.0  ;;  %v77_v10 = vsel %vm67_vm0, %v66_v5, 0.0  ;;  %4050 = vmatprep.subr.bf16.mxu0 %v4462_v12  ;;  %v4464_v41 = vld [vmem:[%s5541_s3 + $0x8] sm:$0xff]   ;;  %v4465_v42 = vld [vmem:[%s5541_s3] sm:$0xff]   ;;  %s5563_s23 = smov 48  }
   0x5   :  { %75 = vadd.xlane.f32.xlu1 %v74_v8  ;;  %69 = vadd.xlane.f32.xlu0 %v68_v9  ;;  %v71_v11 = vsel %vm67_vm0, %v64_v7, 0.0  ;;  %v59_v49 = vld [vmem:[%s5542_s1] sm:$0xff]  ;;  %v60_v50 = vld [vmem:[%s5542_s1 + $0x8] sm:$0xff]  ;;  %s5561_s25 = smov 72   ;;  %s5558_s26 = smov 104   ;;  %vm3171_vm7 = vcmask 254976  }
   0x6   :  { %4051 = vmatpush3.bf16.msra.mxu0 %v4462_v12  ;;  %4058 = vmatprep.subr.bf16.mxu1 %v4464_v41  ;;  %v61_v53 = vld [vmem:[%s5543_s2] sm:$0xff]  ;;  %v62_v56 = vld [vmem:[%s5543_s2 + $0x8] sm:$0xff]  ;;  %s5556_s27 = smov 40   ;;  %s5555_s28 = smov 8  }
   0x7   :  { %4052 = vmatprep.subr.bf16.mxu0 %v4463_v13  ;;  %4059 = vmatpush3.bf16.msra.mxu1 %v4464_v41  ;;  %s5554_s29 = smov 16  }
   0x8   :  { %4060 = vmatprep.subr.bf16.mxu1 %v4465_v42 }
   0x9   :  { %78 = vadd.xlane.f32.xlu1 %v77_v10  ;;  %72 = vadd.xlane.f32.xlu0 %v71_v11 }
   0xa   :  { %4053 = vmatpush3.bf16.msra.mxu0 %v4463_v13 }
   0xb   :  { %4066 = vmatprep.subr.bf16.mxu0 %v4464_v41  ;;  %4061 = vmatpush3.bf16.msra.mxu1 %v4465_v42 }
  0x8e   :  { %v76_v14 = vpop.xlane.xlu1 %75  ;;  %v70_v15 = vpop.xlane.xlu0 %69 }
  0x8f   :  { %v83_v16 = vmul.f32 0.03125, %v76_v14  ;;  %v81_v17 = vmul.f32 0.03125, %v70_v15 }
  0x91   :  { %v87_v18 = vadd.f32 1e-05, %v83_v16  ;;  %v85_v19 = vadd.f32 1e-05, %v81_v17 }
  0x92   :  { %v79_v20 = vpop.xlane.xlu1 %78  ;;  %v73_v21 = vpop.xlane.xlu0 %72 }
  0x93   :  { %4494 = vrsqrt.f32 %v87_v18  ;;  %v84_v22 = vmul.f32 0.03125, %v79_v20  ;;  %v82_v23 = vmul.f32 0.03125, %v73_v21  ;;  %v4658_v18 = vmov 0.0  }
  0x94   :  { %4496 = vrsqrt.f32 %v85_v19  ;;  %4074 = vmatprep.subr.bf16.mxu1 %v4658_v18 }
  0x95   :  { %v88_v24 = vadd.f32 1e-05, %v84_v22  ;;  %v86_v25 = vadd.f32 1e-05, %v82_v23 }
  0x97   :  { %4498 = vrsqrt.f32 %v88_v24 }
  0x98   :  { %4500 = vrsqrt.f32 %v86_v25 }
  0xa0   :  { %v4495_v26 = vpop.eup %4494 }
  0xa1   :  { %v4497_v27 = vpop.eup %4496  ;;  %v95_v28 = vmul.f32 %v4495_v26, %v57_v0 }
  0xa2   :  { %v93_v30 = vmul.f32 %v4497_v27, %v55_v1 }
  0xa3   :  { %v106_v35 = vmul.f32 %v3772_v31, %v95_v28 }
  0xa4   :  { %v4499_v29 = vpop.eup %4498  ;;  %v104_v37 = vmul.f32 %v3772_v31, %v93_v30 }
  0xa5   :  { %v4501_v32 = vpop.eup %4500  ;;  %v96_v33 = vmul.f32 %v4499_v29, %v58_v2 }
  0xa6   :  { %v94_v34 = vmul.f32 %v4501_v32, %v56_v6 }
  0xa7   :  { %v107_v36 = vmul.f32 %v3772_v31, %v96_v33 }
  0xa8   :  { %v105_v38 = vmul.f32 %v3772_v31, %v94_v34 }
  0xa9   :  { %v109_v39 = vpack.c.bf16 %v107_v36, %v106_v35 }
  0xaa   :  { %v108_v40 = vpack.c.bf16 %v105_v38, %v104_v37 }
  0xac   :  { %4054 = vmatprep.mubr.msk.bf16.mxu0 %vm67_vm0, %v108_v40 }
  0xad   :  { %4055 = vmatmul.mubr.msk.bf16.vlgmr.msra.gmra.mxu0 %vm67_vm0, %v109_v39 }
  0xae   :  { %4067 = vmatpush3.bf16.msra.mxu0 %v4464_v41 }
  0xaf   :  { %4068 = vmatprep.subr.bf16.mxu0 %v4465_v42 }
  0xb2   :  { %4069 = vmatpush3.bf16.msra.mxu0 %v4465_v42 }
  0xb3   :  { %4080 = vmatprep.subr.bf16.mxu0 %v4658_v18 }
 0x16d   :  { %v4789_v43 = vpop.f32.mrf.mxu0 }
 0x16e   :  { %v313_v59 = vmul.f32 %v4789_v43, %v59_v49 }
 0x16f   :  { %v166_v44 = vpop.f32.mrf.mxu0 }
 0x170   :  { %v311_v63 = vmul.f32 %v166_v44, %v59_v49 }
 0x171   :  { %v4791_v45 = vpop.f32.mrf.mxu0 }
 0x172   :  { %v4795_v46 = vpack.c.bf16 %v4791_v45, %v4789_v43  ;;  %v314_v60 = vmul.f32 %v4791_v45, %v60_v50 }
 0x173   :  { %v169_v47 = vpop.f32.mrf.mxu0 }
 0x174   :  { %v4797_v48 = vpack.c.bf16 %v169_v47, %v166_v44  ;;  %254 = vrot.lane.b32.xlu1 %v4795_v46, %s4656_s21  ;;  %v312_v1 = vmul.f32 %v169_v47, %v60_v50 }
 0x176   :  { %252 = vrot.lane.b32.xlu0 %v4797_v48, %s4656_s21  ;;  %4062 = vmatprep.mubr.msk.bf16.mxu1 %vm67_vm0, %v4797_v48 }
 0x177   :  { %4063 = vmatmul.mubr.msk.bf16.vlgmr.msra.gmra.mxu1 %vm67_vm0, %v4795_v46 }
 0x178   :  { %325 = vrot.lane.b32.xlu1 %v59_v49, %s4657_s24  ;;  %4076 = vmatprep.mubr.msk.bf16.mxu1 %vm4659_vm1, %v4658_v18 }
 0x17c   :  { %327 = vrot.lane.b32.xlu1 %v60_v50, %s4657_s24 }
 0x1e6   :  { %v255_v52 = vpop.permute.xlu1 %254 }
 0x1e8   :  { %v253_v51 = vpop.permute.xlu0 %252 }
 0x1e9   :  { %4070 = vmatprep.mubr.msk.bf16.mxu0 %vm67_vm0, %v253_v51 }
 0x1ea   :  { %4071 = vmatmul.mubr.msk.bf16.vlgmr.msra.gmra.mxu0 %vm67_vm0, %v255_v52  ;;  %v326_v17 = vpop.permute.xlu1 %325 }
 0x1eb   :  { %4082 = vmatprep.mubr.msk.bf16.mxu0 %vm4659_vm1, %v4658_v18  ;;  %v331_v21 = vmul.f32 %v326_v17, %v166_v44  ;;  %v333_v27 = vmul.f32 %v4789_v43, %v326_v17 }
 0x1ee   :  { %v328_v19 = vpop.permute.xlu1 %327 }
 0x1ef   :  { %v332_v22 = vmul.f32 %v328_v19, %v169_v47  ;;  %v334_v28 = vmul.f32 %v4791_v45, %v328_v19 }
 0x237   :  { %v4064_v54 = vpop.f32.mrf.mxu1 }
 0x238   :  { %v317_v57 = vmul.f32 %v4064_v54, %v61_v53 }
 0x239   :  { %v235_v55 = vpop.f32.mrf.mxu1 }
 0x23a   :  { %v315_v61 = vmul.f32 %v235_v55, %v61_v53  ;;  %v321_v2 = vadd.f32 %v317_v57, %v313_v59 }
 0x23b   :  { %v4065_v58 = vpop.f32.mrf.mxu1 }
 0x23c   :  { %v318_v62 = vmul.f32 %v4065_v58, %v62_v56  ;;  %v319_v5 = vadd.f32 %v315_v61, %v311_v63 }
 0x23d   :  { %v238_v0 = vpop.f32.mrf.mxu1 }
 0x23e   :  { %v322_v3 = vadd.f32 %v318_v62, %v314_v60  ;;  %v316_v4 = vmul.f32 %v238_v0, %v62_v56 }
 0x240   :  { %v4825_v6 = vpack.c.bf16 %v322_v3, %v321_v2  ;;  %v320_v7 = vadd.f32 %v316_v4, %v312_v1 }
 0x242   :  { %v4827_v8 = vpack.c.bf16 %v320_v7, %v319_v5 }
 0x2aa   :  { %v4072_v9 = vpop.f32.mrf.mxu0 }
 0x2ab   :  { %v337_v14 = vmul.f32 %v4072_v9, %v61_v53 }
 0x2ac   :  { %v296_v10 = vpop.f32.mrf.mxu0 }
 0x2ad   :  { %v335_v11 = vmul.f32 %v296_v10, %v61_v53 }
 0x2ae   :  { %v4073_v12 = vpop.f32.mrf.mxu0 }
 0x2af   :  { %343 = vrot.lane.b32.xlu0 %v335_v11, %s4657_s24  ;;  %v338_v16 = vmul.f32 %v4073_v12, %v62_v56 }
 0x2b0   :  { %v299_v13 = vpop.f32.mrf.mxu0 }
 0x2b1   :  { %v336_v15 = vmul.f32 %v299_v13, %v62_v56 }
 0x2b3   :  { %347 = vrot.lane.b32.xlu0 %v337_v14, %s4657_s24  ;;  %345 = vrot.lane.b32.xlu1 %v336_v15, %s4657_s24 }
 0x2b7   :  { %349 = vrot.lane.b32.xlu1 %v338_v16, %s4657_s24 }
 0x321   :  { %v344_v20 = vpop.permute.xlu0 %343 }
 0x322   :  { %v355_v24 = vadd.f32 %v344_v20, %v331_v21 }
 0x325   :  { %v346_v23 = vpop.permute.xlu1 %345  ;;  %v348_v26 = vpop.permute.xlu0 %347 }
 0x326   :  { %v356_v25 = vadd.f32 %v346_v23, %v332_v22  ;;  %v357_v31 = vadd.f32 %v348_v26, %v333_v27 }
 0x328   :  { %v4841_v29 = vpack.c.bf16 %v356_v25, %v355_v24 }
 0x329   :  { %v350_v30 = vpop.permute.xlu1 %349 }
 0x32a   :  { %v358_v32 = vadd.f32 %v350_v30, %v334_v28  ;;  %364 = vrot.lane.b32.xlu0 %v4841_v29, %s4656_s21 }
 0x32c   :  { %v4845_v33 = vpack.c.bf16 %v358_v32, %v357_v31 }
 0x32e   :  { %415 = vrot.lane.b32.xlu1 %v4845_v33, %s4656_s21 }
 0x39c   :  { %v365_v34 = vpop.permute.xlu0 %364 }
 0x39d   :  { %v371_v35 = vsel %vm366_vm2, %v365_v34, 0 }
 0x39e   :  { %4075 = vmatpush3.bf16.xpose.msra.mxu1 %v371_v35 }
 0x39f   :  { %4086 = vmatprep.subr.bf16.mxu1 %v4658_v18 }
 0x3a0   :  { %v416_v36 = vpop.permute.xlu1 %415 }
 0x3a1   :  { %v421_v37 = vsel %vm366_vm2, %v416_v36, 0 }
 0x3a2   :  { %4081 = vmatpush3.bf16.xpose.msra.mxu0 %v421_v37 }
 0x3a3   :  { %4092 = vmatprep.subr.bf16.mxu0 %v4658_v18 }
 0x3a5   :  { %4077 = vmatmul.mubr.msk.bf16.vlgmr.msra.gmra.mxu1 %vm366_vm2, %v4827_v8 }
 0x3a6   :  { %4088 = vmatprep.mubr.msk.bf16.mxu1 %vm4659_vm1, %v4658_v18 }
 0x3a9   :  { %4083 = vmatmul.mubr.msk.bf16.vlgmr.msra.gmra.mxu0 %vm366_vm2, %v4825_v6 }
 0x3aa   :  { %4094 = vmatprep.mubr.msk.bf16.mxu0 %vm4659_vm1, %v4658_v18 }
 0x465   :  { %v407_v38 = vpop.f32.mrf.mxu1 }
 0x466   :  { %v464_v39 = vmul.f32 0.35355338, %v407_v38 }
 0x467   :  { %v4078_v40 = vpop.f32.mrf.mxu1 }
 0x468   :  { %v469_v41 = vsel %vm468_vm3, %v464_v39, -inf }
 0x469   :  { %v457_v42 = vpop.f32.mrf.mxu0  ;;  %470 = vmax.xlane.f32.xlu0 %v469_v41  ;;  %v410_v43 = vpop.f32.mrf.mxu1 }
 0x46a   :  { %v466_v44 = vmul.f32 0.35355338, %v457_v42  ;;  %v465_v45 = vmul.f32 0.35355338, %v410_v43 }
 0x46b   :  { %v4079_v47 = vpop.f32.mrf.mxu1  ;;  %v4084_v49 = vpop.f32.mrf.mxu0 }
 0x46c   :  { %v475_v50 = vsel %vm468_vm3, %v466_v44, -inf  ;;  %v472_v51 = vsel %vm468_vm3, %v465_v45, -inf }
 0x46d   :  { %v460_v52 = vpop.f32.mrf.mxu0  ;;  %476 = vmax.xlane.f32.xlu0 %v475_v50  ;;  %473 = vmax.xlane.f32.xlu1 %v472_v51 }
 0x46e   :  { %v467_v53 = vmul.f32 0.35355338, %v460_v52 }
 0x46f   :  { %v4085_v54 = vpop.f32.mrf.mxu0 }
 0x470   :  { %v478_v55 = vsel %vm468_vm3, %v467_v53, -inf }
 0x471   :  { %479 = vmax.xlane.f32.xlu0 %v478_v55 }
 0x47e   :  { %562 = vrot.lane.b32.xlu1 %v4795_v46, %s4660_s16 }
 0x482   :  { %612 = vrot.lane.b32.xlu1 %v4841_v29, %s4661_s17 }
 0x4f2   :  { %v471_v56 = vpop.xlane.xlu0 %470 }
 0x4f3   :  { %v481_v57 = vsub.f32 %v464_v39, %v471_v56 }
 0x4f5   :  { %v485_v61 = vmul.f32 1.442695, %v481_v57 }
 0x4f6   :  { %v477_v58 = vpop.xlane.xlu0 %476  ;;  %v474_v59 = vpop.xlane.xlu1 %473 }
 0x4f7   :  { %v483_v60 = vsub.f32 %v466_v44, %v477_v58  ;;  %v482_v63 = vsub.f32 %v465_v45, %v474_v59 }
 0x4f9   :  { %v489_v62 = vmul.f32 1.442695, %v483_v60  ;;  %v487_v3 = vmul.f32 1.442695, %v482_v63 }
 0x4fa   :  { %v480_v0 = vpop.xlane.xlu0 %479  ;;  %v563_v1 = vpop.permute.xlu1 %562 }
 0x4fb   :  { %4502 = vpow2.f32 %v489_v62  ;;  %v484_v2 = vsub.f32 %v467_v53, %v480_v0  ;;  %4093 = vmatpush3.bf16.msra.mxu0 %v563_v1 }
 0x4fc   :  { %4104 = vmatprep.subr.bf16.mxu0 %v4658_v18  ;;  %4504 = vpow2.f32 %v485_v61 }
 0x4fd   :  { %v491_v4 = vmul.f32 1.442695, %v484_v2 }
 0x4fe   :  { %v613_v15 = vpop.permute.xlu1 %612 }
 0x4ff   :  { %4506 = vpow2.f32 %v491_v4  ;;  %v618_v36 = vsel %vm366_vm2, %v613_v15, 0 }
 0x500   :  { %4508 = vpow2.f32 %v487_v3 }
 0x508   :  { %v4503_v5 = vpop.eup %4502 }
 0x509   :  { %v499_v7 = vsel %vm468_vm3, %v4503_v5, 0.0  ;;  %v4505_v9 = vpop.eup %4504 }
 0x50a   :  { %500 = vadd.xlane.f32.xlu0 %v499_v7  ;;  %v493_v11 = vsel %vm468_vm3, %v4505_v9, 0.0 }
 0x50c   :  { %v4507_v10 = vpop.eup %4506 }
 0x50d   :  { %v502_v12 = vsel %vm468_vm3, %v4507_v10, 0.0  ;;  %v4509_v13 = vpop.eup %4508 }
 0x50e   :  { %494 = vadd.xlane.f32.xlu0 %v493_v11  ;;  %503 = vadd.xlane.f32.xlu1 %v502_v12  ;;  %v496_v14 = vsel %vm468_vm3, %v4509_v13, 0.0 }
 0x512   :  { %497 = vadd.xlane.f32.xlu1 %v496_v14 }
 0x523   :  { %664 = vrot.lane.b32.xlu1 %v4845_v33, %s4661_s17 }
 0x524   :  { %515 = vrot.lane.b32.xlu0 %v4797_v48, %s4660_s16 }
 0x527   :  { %662 = vrot.lane.b32.xlu1 %v4825_v6, %s4662_s18 }
 0x528   :  { %610 = vrot.lane.b32.xlu0 %v4827_v8, %s4662_s18 }
 0x593   :  { %v501_v16 = vpop.xlane.xlu0 %500 }
 0x594   :  { %4510 = vrcp.f32 %v501_v16 }
 0x597   :  { %v495_v17 = vpop.xlane.xlu0 %494  ;;  %v504_v19 = vpop.xlane.xlu1 %503 }
 0x598   :  { %4512 = vrcp.f32 %v504_v19 }
 0x599   :  { %4514 = vrcp.f32 %v495_v17 }
 0x59b   :  { %v516_v20 = vpop.permute.xlu0 %515  ;;  %v498_v21 = vpop.xlane.xlu1 %497 }
 0x59c   :  { %4516 = vrcp.f32 %v498_v21  ;;  %4087 = vmatpush3.bf16.msra.mxu1 %v516_v20 }
 0x59d   :  { %4098 = vmatprep.subr.bf16.mxu1 %v4658_v18 }
 0x59f   :  { %v665_v27 = vpop.permute.xlu1 %664  ;;  %v611_v38 = vpop.permute.xlu0 %610 }
 0x5a0   :  { %v670_v34 = vsel %vm366_vm2, %v665_v27, 0 }
 0x5a1   :  { %v4511_v22 = vpop.eup %4510 }
 0x5a2   :  { %v511_v25 = vmul.f32 %v4511_v22, %v4503_v5 }
 0x5a3   :  { %v663_v37 = vpop.permute.xlu1 %662 }
 0x5a5   :  { %v4513_v23 = vpop.eup %4512 }
 0x5a6   :  { %v4515_v24 = vpop.eup %4514  ;;  %v512_v26 = vmul.f32 %v4513_v23, %v4507_v10 }
 0x5a7   :  { %v509_v31 = vmul.f32 %v4515_v24, %v4505_v9 }
 0x5a8   :  { %v514_v30 = vpack.c.bf16 %v512_v26, %v511_v25 }
 0x5a9   :  { %v4517_v28 = vpop.eup %4516 }
 0x5aa   :  { %v510_v32 = vmul.f32 %v4517_v28, %v4509_v13  ;;  %4095 = vmatmul.mubr.msk.bf16.vlgmr.msra.gmra.mxu0 %vm468_vm3, %v514_v30 }
 0x5ab   :  { %4105 = vmatpush3.bf16.xpose.msra.mxu0 %v670_v34  ;;  %4106 = vmatprep.mubr.msk.bf16.mxu0 %vm4659_vm1, %v4658_v18 }
 0x5ac   :  { %v513_v35 = vpack.c.bf16 %v510_v32, %v509_v31  ;;  %4116 = vmatprep.subr.bf16.mxu0 %v4658_v18 }
 0x5ae   :  { %4089 = vmatmul.mubr.msk.bf16.vlgmr.msra.gmra.mxu1 %vm468_vm3, %v513_v35 }
 0x5af   :  { %4099 = vmatpush3.bf16.xpose.msra.mxu1 %v618_v36  ;;  %4100 = vmatprep.mubr.msk.bf16.mxu1 %vm4659_vm1, %v4658_v18 }
 0x5b0   :  { %4110 = vmatprep.subr.bf16.mxu1 %v4658_v18 }
 0x5b2   :  { %4107 = vmatmul.mubr.msk.bf16.vlgmr.msra.gmra.mxu0 %vm366_vm2, %v663_v37 }
 0x5b3   :  { %4118 = vmatprep.mubr.msk.bf16.mxu0 %vm4659_vm1, %v4658_v18 }
 0x5b6   :  { %4101 = vmatmul.mubr.msk.bf16.vlgmr.msra.gmra.mxu1 %vm366_vm2, %v611_v38 }
 0x5b7   :  { %4112 = vmatprep.mubr.msk.bf16.mxu1 %vm4659_vm1, %v4658_v18 }
 0x66a   :  { %v4899_v39 = vpop.f32.mrf.mxu0 }
 0x66c   :  { %v4096_v40 = vpop.f32.mrf.mxu0 }
 0x66e   :  { %v4901_v41 = vpop.f32.mrf.mxu1  ;;  %v4903_v42 = vpop.f32.mrf.mxu0 }
 0x670   :  { %v4090_v43 = vpop.f32.mrf.mxu1  ;;  %v4097_v44 = vpop.f32.mrf.mxu0 }
 0x672   :  { %v4905_v45 = vpop.f32.mrf.mxu1  ;;  %v706_v47 = vpop.f32.mrf.mxu0 }
 0x673   :  { %v715_v55 = vmul.f32 0.35355338, %v706_v47 }
 0x674   :  { %v4091_v49 = vpop.f32.mrf.mxu1  ;;  %v4108_v50 = vpop.f32.mrf.mxu0 }
 0x675   :  { %v723_v62 = vsel %vm468_vm3, %v715_v55, -inf }
 0x676   :  { %v654_v51 = vpop.f32.mrf.mxu1  ;;  %v709_v53 = vpop.f32.mrf.mxu0 }
 0x677   :  { %v713_v52 = vmul.f32 0.35355338, %v654_v51  ;;  %v716_v61 = vmul.f32 0.35355338, %v709_v53 }
 0x678   :  { %v4102_v54 = vpop.f32.mrf.mxu1  ;;  %v4109_v56 = vpop.f32.mrf.mxu0 }
 0x679   :  { %v717_v57 = vsel %vm468_vm3, %v713_v52, -inf  ;;  %v726_v0 = vsel %vm468_vm3, %v716_v61, -inf }
 0x67a   :  { %718 = vmax.xlane.f32.xlu0 %v717_v57  ;;  %v657_v58 = vpop.f32.mrf.mxu1 }
 0x67b   :  { %v714_v59 = vmul.f32 0.35355338, %v657_v58 }
 0x67c   :  { %v4103_v60 = vpop.f32.mrf.mxu1 }
 0x67d   :  { %v720_v63 = vsel %vm468_vm3, %v714_v59, -inf }
 0x67e   :  { %724 = vmax.xlane.f32.xlu0 %v723_v62  ;;  %721 = vmax.xlane.f32.xlu1 %v720_v63 }
 0x682   :  { %727 = vmax.xlane.f32.xlu0 %v726_v0 }
 0x68f   :  { %810 = vrot.lane.b32.xlu1 %v4795_v46, %s4663_s19 }
 0x693   :  { %859 = vrot.lane.b32.xlu1 %v4841_v29, %s4664_s20 }
 0x703   :  { %v719_v1 = vpop.xlane.xlu0 %718 }
 0x704   :  { %v729_v2 = vsub.f32 %v713_v52, %v719_v1 }
 0x706   :  { %v733_v7 = vmul.f32 1.442695, %v729_v2 }
 0x707   :  { %v725_v3 = vpop.xlane.xlu0 %724  ;;  %v722_v4 = vpop.xlane.xlu1 %721 }
 0x708   :  { %v731_v5 = vsub.f32 %v715_v55, %v725_v3  ;;  %v730_v10 = vsub.f32 %v714_v59, %v722_v4 }
 0x70a   :  { %v737_v9 = vmul.f32 1.442695, %v731_v5  ;;  %v735_v14 = vmul.f32 1.442695, %v730_v10 }
 0x70b   :  { %v728_v11 = vpop.xlane.xlu0 %727  ;;  %v811_v12 = vpop.permute.xlu1 %810 }
 0x70c   :  { %4518 = vpow2.f32 %v737_v9  ;;  %v732_v13 = vsub.f32 %v716_v61, %v728_v11  ;;  %4117 = vmatpush3.bf16.msra.mxu0 %v811_v12 }
 0x70d   :  { %4128 = vmatprep.subr.bf16.mxu0 %v4658_v18  ;;  %4520 = vpow2.f32 %v733_v7 }
 0x70e   :  { %v739_v15 = vmul.f32 1.442695, %v732_v13 }
 0x70f   :  { %v860_v25 = vpop.permute.xlu1 %859 }
 0x710   :  { %4522 = vpow2.f32 %v739_v15  ;;  %v865_v51 = vsel %vm366_vm2, %v860_v25, 0 }
 0x711   :  { %4524 = vpow2.f32 %v735_v14 }
 0x719   :  { %v4519_v16 = vpop.eup %4518 }
 0x71a   :  { %v747_v17 = vsel %vm468_vm3, %v4519_v16, 0.0  ;;  %v4521_v19 = vpop.eup %4520 }
 0x71b   :  { %748 = vadd.xlane.f32.xlu0 %v747_v17  ;;  %v741_v21 = vsel %vm468_vm3, %v4521_v19, 0.0 }
 0x71d   :  { %v4523_v20 = vpop.eup %4522 }
 0x71e   :  { %v750_v22 = vsel %vm468_vm3, %v4523_v20, 0.0  ;;  %v4525_v23 = vpop.eup %4524 }
 0x71f   :  { %742 = vadd.xlane.f32.xlu0 %v741_v21  ;;  %751 = vadd.xlane.f32.xlu1 %v750_v22  ;;  %v744_v24 = vsel %vm468_vm3, %v4525_v23, 0.0 }
 0x723   :  { %745 = vadd.xlane.f32.xlu1 %v744_v24 }
 0x734   :  { %910 = vrot.lane.b32.xlu1 %v4845_v33, %s4664_s20 }
 0x735   :  { %763 = vrot.lane.b32.xlu0 %v4797_v48, %s4663_s19 }
 0x738   :  { %908 = vrot.lane.b32.xlu1 %v4825_v6, %s4665_s22 }
 0x739   :  { %857 = vrot.lane.b32.xlu0 %v4827_v8, %s4665_s22 }
 0x7a4   :  { %v749_v26 = vpop.xlane.xlu0 %748 }
 0x7a5   :  { %4526 = vrcp.f32 %v749_v26 }
 0x7a8   :  { %v743_v27 = vpop.xlane.xlu0 %742  ;;  %v752_v28 = vpop.xlane.xlu1 %751 }
 0x7a9   :  { %4528 = vrcp.f32 %v752_v28 }
 0x7aa   :  { %4530 = vrcp.f32 %v743_v27 }
 0x7ac   :  { %v764_v30 = vpop.permute.xlu0 %763  ;;  %v746_v31 = vpop.xlane.xlu1 %745 }
 0x7ad   :  { %4532 = vrcp.f32 %v746_v31  ;;  %4111 = vmatpush3.bf16.msra.mxu1 %v764_v30 }
 0x7ae   :  { %4122 = vmatprep.subr.bf16.mxu1 %v4658_v18 }
 0x7b0   :  { %v911_v38 = vpop.permute.xlu1 %910  ;;  %v858_v53 = vpop.permute.xlu0 %857 }
 0x7b1   :  { %v916_v49 = vsel %vm366_vm2, %v911_v38, 0 }
 0x7b2   :  { %v4527_v32 = vpop.eup %4526 }
 0x7b3   :  { %v759_v36 = vmul.f32 %v4527_v32, %v4519_v16 }
 0x7b4   :  { %v909_v52 = vpop.permute.xlu1 %908 }
 0x7b6   :  { %v4529_v34 = vpop.eup %4528 }
 0x7b7   :  { %v4531_v35 = vpop.eup %4530  ;;  %v760_v37 = vmul.f32 %v4529_v34, %v4523_v20 }
 0x7b8   :  { %v757_v44 = vmul.f32 %v4531_v35, %v4521_v19 }
 0x7b9   :  { %v762_v43 = vpack.c.bf16 %v760_v37, %v759_v36 }
 0x7ba   :  { %v4533_v40 = vpop.eup %4532 }
 0x7bb   :  { %v758_v47 = vmul.f32 %v4533_v40, %v4525_v23  ;;  %4119 = vmatmul.mubr.msk.bf16.vlgmr.msra.gmra.mxu0 %vm468_vm3, %v762_v43 }
 0x7bc   :  { %4129 = vmatpush3.bf16.xpose.msra.mxu0 %v916_v49  ;;  %4130 = vmatprep.mubr.msk.bf16.mxu0 %vm4659_vm1, %v4658_v18 }
 0x7bd   :  { %v761_v50 = vpack.c.bf16 %v758_v47, %v757_v44  ;;  %4140 = vmatprep.subr.bf16.mxu0 %v4658_v18 }
 0x7bf   :  { %4113 = vmatmul.mubr.msk.bf16.vlgmr.msra.gmra.mxu1 %vm468_vm3, %v761_v50 }
 0x7c0   :  { %4123 = vmatpush3.bf16.xpose.msra.mxu1 %v865_v51  ;;  %4124 = vmatprep.mubr.msk.bf16.mxu1 %vm4659_vm1, %v4658_v18 }
 0x7c1   :  { %4134 = vmatprep.subr.bf16.mxu1 %v4658_v18 }
 0x7c3   :  { %4131 = vmatmul.mubr.msk.bf16.vlgmr.msra.gmra.mxu0 %vm366_vm2, %v909_v52 }
 0x7c4   :  { %4142 = vmatprep.mubr.msk.bf16.mxu0 %vm4659_vm1, %v4658_v18 }
 0x7c7   :  { %4125 = vmatmul.mubr.msk.bf16.vlgmr.msra.gmra.mxu1 %vm366_vm2, %v858_v53 }
 0x7c8   :  { %4136 = vmatprep.mubr.msk.bf16.mxu1 %vm4659_vm1, %v4658_v18 }
 0x87b   :  { %v4945_v54 = vpop.f32.mrf.mxu0 }
 0x87d   :  { %v4120_v55 = vpop.f32.mrf.mxu0 }
 0x87f   :  { %v4947_v56 = vpop.f32.mrf.mxu1  ;;  %v4949_v57 = vpop.f32.mrf.mxu0 }
 0x880   :  { %v4421_v58 = vpack.i.bf16 %v4949_v57, %v4945_v54 }
 0x881   :  { %v4114_v59 = vpop.f32.mrf.mxu1  ;;  %v4121_v60 = vpop.f32.mrf.mxu0 }
 0x883   :  { %v4953_v61 = vpop.f32.mrf.mxu1  ;;  %v952_v63 = vpop.f32.mrf.mxu0 }
 0x884   :  { %v4416_v62 = vpack.i.bf16 %v4953_v61, %v4947_v56  ;;  %v961_v7 = vmul.f32 0.35355338, %v952_v63 }
 0x885   :  { %v4115_v0 = vpop.f32.mrf.mxu1  ;;  %v4132_v1 = vpop.f32.mrf.mxu0 }
 0x886   :  { %v969_v15 = vsel %vm468_vm3, %v961_v7, -inf }
 0x887   :  { %v901_v2 = vpop.f32.mrf.mxu1  ;;  %v955_v4 = vpop.f32.mrf.mxu0 }
 0x888   :  { %v959_v3 = vmul.f32 0.35355338, %v901_v2  ;;  %v962_v14 = vmul.f32 0.35355338, %v955_v4 }
 0x889   :  { %v4126_v5 = vpop.f32.mrf.mxu1  ;;  %v4133_v9 = vpop.f32.mrf.mxu0 }
 0x88a   :  { %v963_v10 = vsel %vm468_vm3, %v959_v3, -inf  ;;  %v972_v17 = vsel %vm468_vm3, %v962_v14, -inf }
 0x88b   :  { %964 = vmax.xlane.f32.xlu0 %v963_v10  ;;  %v904_v11 = vpop.f32.mrf.mxu1 }
 0x88c   :  { %v960_v12 = vmul.f32 0.35355338, %v904_v11 }
 0x88d   :  { %v4127_v13 = vpop.f32.mrf.mxu1 }
 0x88e   :  { %v966_v16 = vsel %vm468_vm3, %v960_v12, -inf }
 0x88f   :  { %970 = vmax.xlane.f32.xlu0 %v969_v15  ;;  %967 = vmax.xlane.f32.xlu1 %v966_v16 }
 0x893   :  { %973 = vmax.xlane.f32.xlu0 %v972_v17 }
 0x8a0   :  { %1056 = vrot.lane.b32.xlu1 %v4795_v46, %s5563_s23 }
 0x8a4   :  { %1105 = vrot.lane.b32.xlu1 %v4841_v29, %s5561_s25 }
 0x914   :  { %v965_v19 = vpop.xlane.xlu0 %964 }
 0x915   :  { %v975_v20 = vsub.f32 %v959_v3, %v965_v19 }
 0x917   :  { %v979_v24 = vmul.f32 1.442695, %v975_v20 }
 0x918   :  { %v971_v21 = vpop.xlane.xlu0 %970  ;;  %v968_v22 = vpop.xlane.xlu1 %967 }
 0x919   :  { %v977_v23 = vsub.f32 %v961_v7, %v971_v21  ;;  %v976_v26 = vsub.f32 %v960_v12, %v968_v22 }
 0x91b   :  { %v983_v25 = vmul.f32 1.442695, %v977_v23  ;;  %v981_v31 = vmul.f32 1.442695, %v976_v26 }
 0x91c   :  { %v974_v27 = vpop.xlane.xlu0 %973  ;;  %v1057_v28 = vpop.permute.xlu1 %1056 }
 0x91d   :  { %4534 = vpow2.f32 %v983_v25  ;;  %v978_v30 = vsub.f32 %v962_v14, %v974_v27  ;;  %4141 = vmatpush3.bf16.msra.mxu0 %v1057_v28 }
 0x91e   :  { %4152 = vmatprep.subr.bf16.mxu0 %v4658_v18  ;;  %4536 = vpow2.f32 %v979_v24 }
 0x91f   :  { %v985_v32 = vmul.f32 1.442695, %v978_v30 }
 0x920   :  { %v1106_v44 = vpop.permute.xlu1 %1105 }
 0x921   :  { %4538 = vpow2.f32 %v985_v32  ;;  %v1111_v4 = vsel %vm366_vm2, %v1106_v44, 0 }
 0x922   :  { %4540 = vpow2.f32 %v981_v31 }
 0x92a   :  { %v4535_v29 = vpop.eup %4534 }
 0x92b   :  { %v993_v34 = vsel %vm468_vm3, %v4535_v29, 0.0  ;;  %v4537_v35 = vpop.eup %4536 }
 0x92c   :  { %994 = vadd.xlane.f32.xlu0 %v993_v34  ;;  %v987_v37 = vsel %vm468_vm3, %v4537_v35, 0.0 }
 0x92e   :  { %v4539_v36 = vpop.eup %4538 }
 0x92f   :  { %v996_v38 = vsel %vm468_vm3, %v4539_v36, 0.0  ;;  %v4541_v40 = vpop.eup %4540 }
 0x930   :  { %988 = vadd.xlane.f32.xlu0 %v987_v37  ;;  %997 = vadd.xlane.f32.xlu1 %v996_v38  ;;  %v990_v43 = vsel %vm468_vm3, %v4541_v40, 0.0 }
 0x934   :  { %991 = vadd.xlane.f32.xlu1 %v990_v43 }
 0x945   :  { %1156 = vrot.lane.b32.xlu1 %v4845_v33, %s5561_s25 }
 0x946   :  { %1009 = vrot.lane.b32.xlu0 %v4797_v48, %s5563_s23 }
 0x949   :  { %1154 = vrot.lane.b32.xlu1 %v4825_v6, %s5558_s26 }
 0x94a   :  { %1103 = vrot.lane.b32.xlu0 %v4827_v8, %s5558_s26  ;;  %s5560_s26 = smov 24  }
 0x9b5   :  { %v995_v47 = vpop.xlane.xlu0 %994 }
 0x9b6   :  { %4542 = vrcp.f32 %v995_v47 }
 0x9b9   :  { %v989_v49 = vpop.xlane.xlu0 %988  ;;  %v998_v50 = vpop.xlane.xlu1 %997 }
 0x9ba   :  { %4544 = vrcp.f32 %v998_v50 }
 0x9bb   :  { %4546 = vrcp.f32 %v989_v49 }
 0x9bd   :  { %v1010_v51 = vpop.permute.xlu0 %1009  ;;  %v992_v52 = vpop.xlane.xlu1 %991 }
 0x9be   :  { %4548 = vrcp.f32 %v992_v52  ;;  %4135 = vmatpush3.bf16.msra.mxu1 %v1010_v51 }
 0x9bf   :  { %4146 = vmatprep.subr.bf16.mxu1 %v4658_v18 }
 0x9c1   :  { %v1157_v60 = vpop.permute.xlu1 %1156  ;;  %v1104_v7 = vpop.permute.xlu0 %1103 }
 0x9c2   :  { %v1162_v2 = vsel %vm366_vm2, %v1157_v60, 0 }
 0x9c3   :  { %v4543_v33 = vpop.eup %4542 }
 0x9c4   :  { %v1005_v6 = vmul.f32 %v4543_v33, %v4535_v29 }
 0x9c5   :  { %v1155_v5 = vpop.permute.xlu1 %1154 }
 0x9c7   :  { %v4545_v53 = vpop.eup %4544 }
 0x9c8   :  { %v4547_v55 = vpop.eup %4546  ;;  %v1006_v59 = vmul.f32 %v4545_v53, %v4539_v36 }
 0x9c9   :  { %v1003_v0 = vmul.f32 %v4547_v55, %v4537_v35 }
 0x9ca   :  { %v1008_v63 = vpack.c.bf16 %v1006_v59, %v1005_v6 }
 0x9cb   :  { %v4549_v8 = vpop.eup %4548 }
 0x9cc   :  { %v1004_v1 = vmul.f32 %v4549_v8, %v4541_v40  ;;  %4143 = vmatmul.mubr.msk.bf16.vlgmr.msra.gmra.mxu0 %vm468_vm3, %v1008_v63 }
 0x9cd   :  { %4153 = vmatpush3.bf16.xpose.msra.mxu0 %v1162_v2  ;;  %4154 = vmatprep.mubr.msk.bf16.mxu0 %vm4659_vm1, %v4658_v18 }
 0x9ce   :  { %v1007_v3 = vpack.c.bf16 %v1004_v1, %v1003_v0  ;;  %4164 = vmatprep.subr.bf16.mxu0 %v4658_v18 }
 0x9d0   :  { %4137 = vmatmul.mubr.msk.bf16.vlgmr.msra.gmra.mxu1 %vm468_vm3, %v1007_v3 }
 0x9d1   :  { %4147 = vmatpush3.bf16.xpose.msra.mxu1 %v1111_v4  ;;  %4148 = vmatprep.mubr.msk.bf16.mxu1 %vm4659_vm1, %v4658_v18 }
 0x9d2   :  { %4158 = vmatprep.subr.bf16.mxu1 %v4658_v18 }
 0x9d4   :  { %4155 = vmatmul.mubr.msk.bf16.vlgmr.msra.gmra.mxu0 %vm366_vm2, %v1155_v5 }
 0x9d5   :  { %4166 = vmatprep.mubr.msk.bf16.mxu0 %vm4659_vm1, %v4658_v18 }
 0x9d8   :  { %4149 = vmatmul.mubr.msk.bf16.vlgmr.msra.gmra.mxu1 %vm366_vm2, %v1104_v7 }
 0x9d9   :  { %4160 = vmatprep.mubr.msk.bf16.mxu1 %vm4659_vm1, %v4658_v18 }
 0xa8c   :  { %v4995_v9 = vpop.f32.mrf.mxu0 }
 0xa8e   :  { %v4144_v10 = vpop.f32.mrf.mxu0 }
 0xa90   :  { %v1049_v11 = vpop.f32.mrf.mxu1  ;;  %v4997_v12 = vpop.f32.mrf.mxu0 }
 0xa91   :  { %v4431_v13 = vpack.i.bf16 %v4997_v12, %v4995_v9  ;;  %v4466_v12 = vld [vmem:[%s5544_s6 + $0x8] sm:$0xff]  }
 0xa92   :  { %v4138_v14 = vpop.f32.mrf.mxu1  ;;  %v4145_v15 = vpop.f32.mrf.mxu0 }
 0xa94   :  { %v1052_v16 = vpop.f32.mrf.mxu1  ;;  %v1198_v19 = vpop.f32.mrf.mxu0 }
 0xa95   :  { %v4426_v17 = vpack.i.bf16 %v1052_v16, %v1049_v11  ;;  %v1207_v26 = vmul.f32 0.35355338, %v1198_v19 }
 0xa96   :  { %v4139_v20 = vpop.f32.mrf.mxu1  ;;  %v4156_v21 = vpop.f32.mrf.mxu0 }
 0xa97   :  { %v1215_v34 = vsel %vm468_vm3, %v1207_v26, -inf }
 0xa98   :  { %v1147_v22 = vpop.f32.mrf.mxu1  ;;  %v1201_v24 = vpop.f32.mrf.mxu0 }
 0xa99   :  { %v1205_v23 = vmul.f32 0.35355338, %v1147_v22  ;;  %v1208_v29 = vmul.f32 0.35355338, %v1201_v24 }
 0xa9a   :  { %v4150_v25 = vpop.f32.mrf.mxu1  ;;  %v4157_v27 = vpop.f32.mrf.mxu0 }
 0xa9b   :  { %v1209_v28 = vsel %vm468_vm3, %v1205_v23, -inf  ;;  %v1218_v36 = vsel %vm468_vm3, %v1208_v29, -inf }
 0xa9c   :  { %1210 = vmax.xlane.f32.xlu0 %v1209_v28  ;;  %v1150_v30 = vpop.f32.mrf.mxu1 }
 0xa9d   :  { %v1206_v31 = vmul.f32 0.35355338, %v1150_v30 }
 0xa9e   :  { %v4151_v32 = vpop.f32.mrf.mxu1 }
 0xa9f   :  { %v1212_v35 = vsel %vm468_vm3, %v1206_v31, -inf }
 0xaa0   :  { %1216 = vmax.xlane.f32.xlu0 %v1215_v34  ;;  %1213 = vmax.xlane.f32.xlu1 %v1212_v35 }
 0xaa4   :  { %1219 = vmax.xlane.f32.xlu0 %v1218_v36 }
 0xb25   :  { %v1211_v37 = vpop.xlane.xlu0 %1210 }
 0xb26   :  { %v1221_v38 = vsub.f32 %v1205_v23, %v1211_v37 }
 0xb28   :  { %v1225_v47 = vmul.f32 1.442695, %v1221_v38 }
 0xb29   :  { %v1217_v40 = vpop.xlane.xlu0 %1216  ;;  %v1214_v43 = vpop.xlane.xlu1 %1213 }
 0xb2a   :  { %v1223_v44 = vsub.f32 %v1207_v26, %v1217_v40  ;;  %v1222_v50 = vsub.f32 %v1206_v31, %v1214_v43 }
 0xb2c   :  { %v1229_v49 = vmul.f32 1.442695, %v1223_v44  ;;  %v1227_v33 = vmul.f32 1.442695, %v1222_v50 }
 0xb2d   :  { %v1220_v51 = vpop.xlane.xlu0 %1219 }
 0xb2e   :  { %4550 = vpow2.f32 %v1229_v49  ;;  %v1224_v52 = vsub.f32 %v1208_v29, %v1220_v51 }
 0xb2f   :  { %4552 = vpow2.f32 %v1225_v47 }
 0xb30   :  { %v1231_v53 = vmul.f32 1.442695, %v1224_v52 }
 0xb32   :  { %4554 = vpow2.f32 %v1231_v53 }
 0xb33   :  { %4556 = vpow2.f32 %v1227_v33 }
 0xb3b   :  { %v4551_v55 = vpop.eup %4550 }
 0xb3c   :  { %v1239_v6 = vsel %vm468_vm3, %v4551_v55, 0.0  ;;  %v4553_v59 = vpop.eup %4552 }
 0xb3d   :  { %1240 = vadd.xlane.f32.xlu0 %v1239_v6  ;;  %v1233_v8 = vsel %vm468_vm3, %v4553_v59, 0.0 }
 0xb3f   :  { %v4555_v60 = vpop.eup %4554 }
 0xb40   :  { %v1242_v63 = vsel %vm468_vm3, %v4555_v60, 0.0  ;;  %v4557_v0 = vpop.eup %4556 }
 0xb41   :  { %1234 = vadd.xlane.f32.xlu0 %v1233_v8  ;;  %1243 = vadd.xlane.f32.xlu1 %v1242_v63  ;;  %v1236_v1 = vsel %vm468_vm3, %v4557_v0, 0.0 }
 0xb45   :  { %1237 = vadd.xlane.f32.xlu1 %v1236_v1  ;;  %v4650_v1 = vld [vmem:[%s5538_s0 + $0x10] sm:$0xff] }
 0xb56   :  { %1302 = vrot.lane.b32.xlu1 %v4795_v46, %s5556_s27 }
 0xb57   :  { %1255 = vrot.lane.b32.xlu0 %v4797_v48, %s5556_s27 }
 0xb5a   :  { %4417 = vrot.lane.b32.xlu1 %v4416_v62, %s5555_s28 }
 0xb5b   :  { %4427 = vrot.lane.b32.xlu0 %v4426_v17, %s5554_s29 }
 0xb5e   :  { %4422 = vrot.lane.b32.xlu1 %v4421_v58, %s5555_s28 }
 0xb62   :  { %4432 = vrot.lane.b32.xlu1 %v4431_v13, %s5554_s29  ;;  %v4467_v13 = vld [vmem:[%s5544_s6] sm:$0xff]  }
 0xbc6   :  { %v1241_v46 = vpop.xlane.xlu0 %1240 }
 0xbc7   :  { %4558 = vrcp.f32 %v1241_v46 }
 0xbca   :  { %v1235_v2 = vpop.xlane.xlu0 %1234  ;;  %v1244_v48 = vpop.xlane.xlu1 %1243 }
 0xbcb   :  { %4560 = vrcp.f32 %v1244_v48 }
 0xbcc   :  { %4562 = vrcp.f32 %v1235_v2  ;;  %v4651_v2 = vld [vmem:[%s5538_s0] sm:$0xff] }
 0xbce   :  { %v1256_v3 = vpop.permute.xlu0 %1255  ;;  %v1238_v4 = vpop.xlane.xlu1 %1237 }
 0xbcf   :  { %4564 = vrcp.f32 %v1238_v4  ;;  %4159 = vmatpush3.bf16.msra.mxu1 %v1256_v3 }
 0xbd0   :  { %4170 = vmatprep.subr.bf16.mxu1 %v4466_v12 }
 0xbd2   :  { %v1303_v56 = vpop.permute.xlu1 %1302  ;;  %v4428_v31 = vpop.permute.xlu0 %4427 }
 0xbd3   :  { %4165 = vmatpush3.bf16.msra.mxu0 %v1303_v56  ;;  %v4430_v44 = vunpack.i.h.bf16 %v4428_v31  ;;  %v4429_v47 = vunpack.i.l.bf16 %v4428_v31 }
 0xbd4   :  { %v4559_v61 = vpop.eup %4558 }
 0xbd5   :  { %v1251_v7 = vmul.f32 %v4559_v61, %v4551_v55  ;;  %v4652_v61 = vld [vmem:[%s5538_s0 + $0x18] sm:$0xff] }
 0xbd6   :  { %v4418_v25 = vpop.permute.xlu1 %4417 }
 0xbd7   :  { %v4420_v28 = vunpack.i.h.bf16 %v4418_v25  ;;  %v4419_v30 = vunpack.i.l.bf16 %v4418_v25 }
 0xbd8   :  { %v4561_v62 = vpop.eup %4560 }
 0xbd9   :  { %v4563_v5 = vpop.eup %4562  ;;  %v1252_v54 = vmul.f32 %v4561_v62, %v4555_v60  ;;  %v1398_v40 = vsel %vm366_vm2, %v4905_v45, %v4420_v28  ;;  %v1397_v43 = vsel %vm366_vm2, %v4901_v41, %v4419_v30 }
 0xbda   :  { %v1249_v9 = vmul.f32 %v4563_v5, %v4553_v59  ;;  %v4423_v26 = vpop.permute.xlu1 %4422  ;;  %v1401_v6 = vsel %vm468_vm3, %v1397_v43, %v4429_v47  ;;  %v1402_v59 = vsel %vm468_vm3, %v1398_v40, %v4430_v44  ;;  %v4653_v5 = vld [vmem:[%s5538_s0 + $0x8] sm:$0xff] }
 0xbdb   :  { %v1254_v58 = vpack.c.bf16 %v1252_v54, %v1251_v7  ;;  %v4425_v32 = vunpack.i.h.bf16 %v4423_v26  ;;  %v4424_v29 = vunpack.i.l.bf16 %v4423_v26 }
 0xbdc   :  { %v4565_v57 = vpop.eup %4564 }
 0xbdd   :  { %v1250_v10 = vmul.f32 %v4565_v57, %v4557_v0  ;;  %4167 = vmatmul.mubr.msk.bf16.vlgmr.msra.gmra.mxu0 %vm468_vm3, %v1254_v58  ;;  %v1400_v49 = vsel %vm366_vm2, %v4903_v42, %v4425_v32  ;;  %v1399_v50 = vsel %vm366_vm2, %v4899_v39, %v4424_v29  ;;  %v3803_v29 = vld [vmem:[%s5546_s7] ss:$0 sm:$0xff] }
 0xbde   :  { %v4433_v27 = vpop.permute.xlu1 %4432 }
 0xbdf   :  { %v1253_v11 = vpack.c.bf16 %v1250_v10, %v1249_v9  ;;  %v4435_v34 = vunpack.i.h.bf16 %v4433_v27  ;;  %v4434_v35 = vunpack.i.l.bf16 %v4433_v27 }
 0xbe1   :  { %4161 = vmatmul.mubr.msk.bf16.vlgmr.msra.gmra.mxu1 %vm468_vm3, %v1253_v11  ;;  %v1403_v52 = vsel %vm468_vm3, %v1399_v50, %v4434_v35  ;;  %v1404_v33 = vsel %vm468_vm3, %v1400_v49, %v4435_v34  ;;  %v4470_v50 = vld [vmem:[%s5547_s9 + $0x18] sm:$0xff]  }
 0xbe2   :  { %4171 = vmatpush3.bf16.msra.mxu1 %v4466_v12 }
 0xbe3   :  { %4172 = vmatprep.subr.bf16.mxu1 %v4467_v13 }
 0xbe6   :  { %4173 = vmatpush3.bf16.msra.mxu1 %v4467_v13  ;;  %v4468_v13 = vld [vmem:[%s5545_s8 + $0x8] sm:$0xff]  }
 0xbe7   :  { %4178 = vmatprep.subr.bf16.mxu0 %v4468_v13  ;;  %4186 = vmatprep.subr.bf16.mxu1 %v4470_v50 }
 0xbe8   :  { %4179 = vmatpush3.bf16.msra.mxu0 %v4468_v13 }
 0xc9d   :  { %v1342_v14 = vpop.f32.mrf.mxu0 }
 0xc9f   :  { %v4168_v15 = vpop.f32.mrf.mxu0 }
 0xca1   :  { %v1295_v16 = vpop.f32.mrf.mxu1  ;;  %v1345_v17 = vpop.f32.mrf.mxu0 }
 0xca2   :  { %v4441_v19 = vpack.i.bf16 %v1345_v17, %v1342_v14  ;;  %v4469_v14 = vld [vmem:[%s5545_s8] sm:$0xff]  }
 0xca3   :  { %v4162_v20 = vpop.f32.mrf.mxu1  ;;  %v4169_v21 = vpop.f32.mrf.mxu0  ;;  %4180 = vmatprep.subr.bf16.mxu0 %v4469_v14 }
 0xca4   :  { %4442 = vrot.lane.b32.xlu1 %v4441_v19, %s5560_s26  ;;  %4181 = vmatpush3.bf16.msra.mxu0 %v4469_v14 }
 0xca5   :  { %v1298_v22 = vpop.f32.mrf.mxu1  ;;  %4198 = vmatprep.subr.bf16.mxu0 %v4658_v18 }
 0xca6   :  { %v4436_v23 = vpack.i.bf16 %v1298_v22, %v1295_v16 }
 0xca7   :  { %v4163_v24 = vpop.f32.mrf.mxu1 }
 0xca8   :  { %4437 = vrot.lane.b32.xlu0 %v4436_v23, %s5560_s26 }
 0xd16   :  { %v4443_v36 = vpop.permute.xlu1 %4442 }
 0xd17   :  { %v4445_v37 = vunpack.i.h.bf16 %v4443_v36  ;;  %v4444_v38 = vunpack.i.l.bf16 %v4443_v36 }
 0xd19   :  { %v1408_v45 = vsel %vm1405_vm4, %v1403_v52, %v4444_v38  ;;  %v1409_v41 = vsel %vm1405_vm4, %v1404_v33, %v4445_v37  ;;  %v4472_v52 = vld [vmem:[%s5547_s9 + $0x8] sm:$0xff]   ;;  %v4473_v33 = vld [vmem:[%s5547_s9] sm:$0xff]  }
 0xd1a   :  { %v4438_v51 = vpop.permute.xlu0 %4437  ;;  %v1411_v8 = vpack.c.bf16 %v1409_v41, %v1408_v45 }
 0xd1b   :  { %v4440_v53 = vunpack.i.h.bf16 %v4438_v51  ;;  %v4439_v55 = vunpack.i.l.bf16 %v4438_v51  ;;  %v4471_v51 = vld [vmem:[%s5547_s9 + $0x10] sm:$0xff]  }
 0xd1d   :  { %v1407_v42 = vsel %vm1405_vm4, %v1402_v59, %v4440_v53  ;;  %v1406_v60 = vsel %vm1405_vm4, %v1401_v6, %v4439_v55 }
 0xd1e   :  { %v1410_v39 = vpack.c.bf16 %v1407_v42, %v1406_v60 }
 0xd20   :  { %4174 = vmatprep.mubr.msk.bf16.mxu1 %vm67_vm0, %v1410_v39 }
 0xd21   :  { %4175 = vmatmul.mubr.msk.bf16.vlgmr.msra.gmra.mxu1 %vm67_vm0, %v1411_v8 }
 0xd22   :  { %4187 = vmatpush3.bf16.msra.mxu1 %v4470_v50 }
 0xd23   :  { %4188 = vmatprep.subr.bf16.mxu1 %v4471_v51 }
 0xd26   :  { %4189 = vmatpush3.bf16.msra.mxu1 %v4471_v51 }
 0xd27   :  { %4190 = vmatprep.subr.bf16.mxu1 %v4472_v52 }
 0xd2a   :  { %4191 = vmatpush3.bf16.msra.mxu1 %v4472_v52 }
 0xd2b   :  { %4192 = vmatprep.subr.bf16.mxu1 %v4473_v33 }
 0xd2e   :  { %4193 = vmatpush3.bf16.msra.mxu1 %v4473_v33 }
 0xd2f   :  { %4214 = vmatprep.subr.bf16.mxu1 %v4658_v18 }
 0xde1   :  { %v4176_v63 = vpop.f32.mrf.mxu1 }
 0xde2   :  { %v5054_v46 = vadd.f32 %v4650_v1, %v4176_v63 }
 0xde3   :  { %v1468_v0 = vpop.f32.mrf.mxu1 }
 0xde4   :  { %v5059_v48 = vadd.f32 %v4651_v2, %v1468_v0  ;;  %v1489_v57 = vmul.f32 %v5054_v46, %v5054_v46 }
 0xde5   :  { %v4177_v3 = vpop.f32.mrf.mxu1 }
 0xde6   :  { %v1487_v4 = vmul.f32 %v5059_v48, %v5059_v48  ;;  %v5066_v62 = vadd.f32 %v4652_v61, %v4177_v3  ;;  %v1497_v9 = vsel %vm67_vm0, %v1489_v57, 0.0 }
 0xde7   :  { %v1471_v56 = vpop.f32.mrf.mxu1 }
 0xde8   :  { %v5071_v7 = vadd.f32 %v4653_v5, %v1471_v56  ;;  %v1491_v54 = vsel %vm67_vm0, %v1487_v4, 0.0  ;;  %v1490_v11 = vmul.f32 %v5066_v62, %v5066_v62 }
 0xde9   :  { %1492 = vadd.xlane.f32.xlu0 %v1491_v54 }
 0xdea   :  { %v1488_v58 = vmul.f32 %v5071_v7, %v5071_v7  ;;  %v1500_v12 = vsel %vm67_vm0, %v1490_v11, 0.0 }
 0xdec   :  { %v1494_v10 = vsel %vm67_vm0, %v1488_v58, 0.0 }
 0xded   :  { %1498 = vadd.xlane.f32.xlu0 %v1497_v9  ;;  %1495 = vadd.xlane.f32.xlu1 %v1494_v10 }
 0xdf1   :  { %1501 = vadd.xlane.f32.xlu0 %v1500_v12 }
 0xe72   :  { %v1493_v15 = vpop.xlane.xlu0 %1492 }
 0xe73   :  { %v1503_v16 = vmul.f32 0.03125, %v1493_v15 }
 0xe75   :  { %v1507_v17 = vadd.f32 1e-05, %v1503_v16 }
 0xe76   :  { %v1499_v19 = vpop.xlane.xlu0 %1498  ;;  %v1496_v20 = vpop.xlane.xlu1 %1495 }
 0xe77   :  { %v1505_v21 = vmul.f32 0.03125, %v1499_v19  ;;  %v1504_v22 = vmul.f32 0.03125, %v1496_v20  ;;  %4566 = vrsqrt.f32 %v1507_v17 }
 0xe79   :  { %v1509_v23 = vadd.f32 1e-05, %v1505_v21  ;;  %v1508_v24 = vadd.f32 1e-05, %v1504_v22  ;;  %v4654_v22 = vld [vmem:[%s5541_s3 + $0x8] sm:$0xff]  }
 0xe7a   :  { %v1502_v25 = vpop.xlane.xlu0 %1501 }
 0xe7b   :  { %4568 = vrsqrt.f32 %v1509_v23  ;;  %v1506_v26 = vmul.f32 0.03125, %v1502_v25  ;;  %v4655_v23 = vld [vmem:[%s5541_s3] sm:$0xff]   ;;  %s5571_s3 = smov 24  }
 0xe7c   :  { %4570 = vrsqrt.f32 %v1508_v24 }
 0xe7d   :  { %v1510_v27 = vadd.f32 1e-05, %v1506_v26 }
 0xe7f   :  { %4572 = vrsqrt.f32 %v1510_v27 }
 0xe84   :  { %v4567_v28 = vpop.eup %4566 }
 0xe85   :  { %v1515_v31 = vmul.f32 %v4567_v28, %v5059_v48 }
 0xe87   :  { %v1526_v37 = vmul.f32 %v3803_v29, %v1515_v31 }
 0xe88   :  { %v4569_v30 = vpop.eup %4568 }
 0xe89   :  { %v4571_v32 = vpop.eup %4570  ;;  %v1517_v35 = vmul.f32 %v4569_v30, %v5054_v46 }
 0xe8a   :  { %v1516_v34 = vmul.f32 %v4571_v32, %v5071_v7 }
 0xe8b   :  { %v1528_v44 = vmul.f32 %v3803_v29, %v1517_v35 }
 0xe8c   :  { %v4573_v36 = vpop.eup %4572  ;;  %v1527_v38 = vmul.f32 %v3803_v29, %v1516_v34 }
 0xe8d   :  { %v1518_v40 = vmul.f32 %v4573_v36, %v5066_v62 }
 0xe8e   :  { %v1530_v43 = vpack.c.bf16 %v1527_v38, %v1526_v37 }
 0xe8f   :  { %v1529_v47 = vmul.f32 %v3803_v29, %v1518_v40 }
 0xe90   :  { %4182 = vmatprep.mubr.msk.bf16.mxu0 %vm67_vm0, %v1530_v43 }
 0xe91   :  { %v1531_v49 = vpack.c.bf16 %v1529_v47, %v1528_v44  ;;  %v4474_v44 = vld [vmem:[%s5539_s5 + $0x18] sm:$0xff]   ;;  %v4475_v47 = vld [vmem:[%s5539_s5 + $0x10] sm:$0xff]  }
 0xe93   :  { %4183 = vmatmul.mubr.msk.bf16.vlgmr.msra.gmra.mxu0 %vm67_vm0, %v1531_v49  ;;  %v1760_v49 = vld [vmem:[%s5542_s1] sm:$0xff] }
 0xe94   :  { %4202 = vmatprep.mubr.msk.bf16.mxu0 %vm4659_vm1, %v4658_v18  ;;  %4199 = vmatpush3.bf16.msra.mxu0 %v4474_v44 }
 0xe95   :  { %4200 = vmatprep.subr.bf16.mxu0 %v4658_v18 }
 0xe98   :  { %4201 = vmatpush3.bf16.msra.mxu0 %v4475_v47 }
 0xe99   :  { %4206 = vmatprep.subr.bf16.mxu0 %v4658_v18 }
 0xf53   :  { %v4184_v53 = vpop.f32.mrf.mxu0 }
 0xf54   :  { %1639 = vrot.lane.b32.xlu1 %v4184_v53, %s4660_s16  ;;  %v3810_v42 = vmul.f32 -1.442695, %v4184_v53 }
 0xf55   :  { %v1588_v55 = vpop.f32.mrf.mxu0 }
 0xf56   :  { %1635 = vrot.lane.b32.xlu0 %v1588_v55, %s4660_s16  ;;  %v3808_v6 = vmul.f32 -1.442695, %v1588_v55 }
 0xf57   :  { %v4185_v45 = vpop.f32.mrf.mxu0 }
 0xf58   :  { %4574 = vpow2.f32 %v3808_v6  ;;  %v3811_v60 = vmul.f32 -1.442695, %v4185_v45 }
 0xf59   :  { %v1591_v41 = vpop.f32.mrf.mxu0 }
 0xf5a   :  { %1637 = vrot.lane.b32.xlu1 %v1591_v41, %s4660_s16  ;;  %v3809_v59 = vmul.f32 -1.442695, %v1591_v41 }
 0xf5c   :  { %4576 = vpow2.f32 %v3809_v59  ;;  %v3819_v59 = vld [vmem:[%s5540_s4 + $0x1] ss:$0 sm:$0xff]  ;;  %s4673_s4 = smov 127  }
 0xf5d   :  { %4578 = vpow2.f32 %v3810_v42 }
 0xf5e   :  { %1641 = vrot.lane.b32.xlu1 %v4185_v45, %s4660_s16  ;;  %4580 = vpow2.f32 %v3811_v60 }
 0xf65   :  { %v4575_v39 = vpop.eup %4574 }
 0xf66   :  { %v1615_v63 = vadd.f32 1.0, %v4575_v39 }
 0xf68   :  { %4582 = vrcp.f32 %v1615_v63 }
 0xf69   :  { %v4577_v8 = vpop.eup %4576 }
 0xf6a   :  { %v4579_v0 = vpop.eup %4578  ;;  %v1616_v1 = vadd.f32 1.0, %v4577_v8 }
 0xf6b   :  { %v4581_v2 = vpop.eup %4580  ;;  %v1617_v3 = vadd.f32 1.0, %v4579_v0 }
 0xf6c   :  { %v1618_v4 = vadd.f32 1.0, %v4581_v2  ;;  %4584 = vrcp.f32 %v1616_v1 }
 0xf6d   :  { %4586 = vrcp.f32 %v1617_v3 }
 0xf6e   :  { %4588 = vrcp.f32 %v1618_v4 }
 0xf75   :  { %v4583_v56 = vpop.eup %4582 }
 0xf76   :  { %v1627_v58 = vmul.f32 %v4583_v56, %v1588_v55  ;;  %v1761_v56 = vld [vmem:[%s5543_s2] sm:$0xff]  ;;  %s5565_s2 = smov 48  }
 0xf79   :  { %v4585_v61 = vpop.eup %4584 }
 0xf7a   :  { %v4587_v57 = vpop.eup %4586  ;;  %v1628_v9 = vmul.f32 %v4585_v61, %v1591_v41 }
 0xf7b   :  { %v4589_v10 = vpop.eup %4588  ;;  %v1629_v14 = vmul.f32 %v4587_v57, %v4184_v53 }
 0xf7c   :  { %v1630_v16 = vmul.f32 %v4589_v10, %v4185_v45 }
 0xfc6   :  { %v1640_v5 = vpop.permute.xlu1 %1639 }
 0xfc7   :  { %v1649_v19 = vmul.f32 %v1640_v5, %v1629_v14 }
 0xfc8   :  { %v1636_v54 = vpop.permute.xlu0 %1635 }
 0xfc9   :  { %v1647_v12 = vmul.f32 %v1636_v54, %v1627_v58 }
 0xfcc   :  { %v1638_v11 = vpop.permute.xlu1 %1637 }
 0xfcd   :  { %v1648_v13 = vmul.f32 %v1638_v11, %v1628_v9 }
 0xfcf   :  { %v1651_v15 = vpack.c.bf16 %v1648_v13, %v1647_v12 }
 0xfd0   :  { %v1642_v17 = vpop.permute.xlu1 %1641 }
 0xfd1   :  { %v1650_v20 = vmul.f32 %v1642_v17, %v1630_v16  ;;  %4194 = vmatprep.mubr.msk.bf16.mxu1 %vm1685_vm5, %v1651_v15 }
 0xfd3   :  { %v1652_v21 = vpack.c.bf16 %v1650_v20, %v1649_v19 }
 0xfd5   :  { %4195 = vmatmul.mubr.msk.bf16.vlgmr.msra.gmra.mxu1 %vm1685_vm5, %v1652_v21 }
 0xfd6   :  { %4215 = vmatpush3.bf16.msra.mxu1 %v4654_v22  ;;  %4218 = vmatprep.mubr.msk.bf16.mxu1 %vm4659_vm1, %v4658_v18 }
 0xfd7   :  { %4216 = vmatprep.subr.bf16.mxu1 %v4658_v18 }
 0xfda   :  { %4217 = vmatpush3.bf16.msra.mxu1 %v4655_v23 }
 0xfdb   :  { %4228 = vmatprep.subr.bf16.mxu1 %v4658_v18 }
0x1095   :  { %v4196_v24 = vpop.f32.mrf.mxu1 }
0x1096   :  { %v1743_v25 = vadd.f32 %v4196_v24, %v5054_v46 }
0x1097   :  { %v1726_v26 = vpop.f32.mrf.mxu1 }
0x1098   :  { %1747 = vst.msk [vmem:[#allocation2 + $0x10] sm:$0xff] %vm67_vm0, %v1743_v25  ;;  %v1741_v27 = vadd.f32 %v1726_v26, %v5059_v48 }
0x1099   :  { %v4197_v28 = vpop.f32.mrf.mxu1 }
0x109a   :  { %1745 = vst.msk [vmem:[#allocation2] sm:$0xff] %vm67_vm0, %v1741_v27  ;;  %v1744_v30 = vadd.f32 %v4197_v28, %v5066_v62 }
0x109b   :  { %v1729_v31 = vpop.f32.mrf.mxu1 }
0x109c   :  { %1748 = vst.msk [vmem:[#allocation2 + $0x18] sm:$0xff] %vm67_vm0, %v1744_v30  ;;  %v1742_v32 = vadd.f32 %v1729_v31, %v5071_v7 }
0x109e   :  { %1746 = vst.msk [vmem:[#allocation2 + $0x8] sm:$0xff] %vm67_vm0, %v1742_v32 }
0x10a3   :  { %v1751_v29 = vld [vmem:[#allocation2 + $0x10] ss:$2 sm:$0xff]  ;;  %v1755_v34 = vld [vmem:[#allocation2 + $0x11] ss:$2 sm:$0xff] }
0x10a4   :  { %v1757_v46 = vadd.f32 %v1755_v34, %v1751_v29 }
0x10a5   :  { %v1749_v35 = vld [vmem:[#allocation2] ss:$2 sm:$0xff]  ;;  %v1753_v36 = vld [vmem:[#allocation2 + $0x1] ss:$2 sm:$0xff] }
0x10a6   :  { %v5138_v37 = vmul.f32 0.5, %v1757_v46  ;;  %v1756_v48 = vadd.f32 %v1753_v36, %v1749_v35 }
0x10a8   :  { %v1763_v38 = vmul.f32 %v5138_v37, %v5138_v37  ;;  %v5142_v40 = vmul.f32 0.5, %v1756_v48 }
0x10aa   :  { %v1767_v62 = vsel %vm67_vm0, %v1763_v38, 0.0  ;;  %v1762_v7 = vmul.f32 %v5142_v40, %v5142_v40 }
0x10ab   :  { %1768 = vadd.xlane.f32.xlu1 %v1767_v62 }
0x10ac   :  { %v1764_v43 = vsel %vm67_vm0, %v1762_v7, 0.0 }
0x10ad   :  { %1765 = vadd.xlane.f32.xlu0 %v1764_v43 }
0x10bc   :  { %1949 = vrot.lane.b32.xlu1 %v1760_v49, %s4657_s24 }
0x1134   :  { %v1769_v50 = vpop.xlane.xlu1 %1768 }
0x1135   :  { %v1771_v51 = vmul.f32 0.03125, %v1769_v50 }
0x1136   :  { %v1766_v52 = vpop.xlane.xlu0 %1765 }
0x1137   :  { %v1773_v33 = vadd.f32 1e-05, %v1771_v51  ;;  %v1770_v53 = vmul.f32 0.03125, %v1766_v52 }
0x1138   :  { %v1950_v21 = vpop.permute.xlu1 %1949 }
0x1139   :  { %4590 = vrsqrt.f32 %v1773_v33  ;;  %v1772_v55 = vadd.f32 1e-05, %v1770_v53 }
0x113b   :  { %4592 = vrsqrt.f32 %v1772_v55 }
0x1146   :  { %v4591_v45 = vpop.eup %4590 }
0x1147   :  { %v1777_v41 = vmul.f32 %v4591_v45, %v5138_v37 }
0x1148   :  { %v4593_v6 = vpop.eup %4592 }
0x1149   :  { %v1776_v42 = vmul.f32 %v4593_v6, %v5142_v40  ;;  %v1787_v39 = vmul.f32 %v3819_v59, %v1777_v41 }
0x114b   :  { %v1786_v60 = vmul.f32 %v3819_v59, %v1776_v42 }
0x114d   :  { %v1788_v8 = vpack.c.bf16 %v1787_v39, %v1786_v60 }
0x114f   :  { %4203 = vmatmul.mubr.msk.bf16.vlgmr.msra.gmra.mxu0 %vm67_vm0, %v1788_v8 }
0x1150   :  { %4207 = vmatpush3.bf16.msra.mxu0 %v4654_v22  ;;  %4210 = vmatprep.mubr.msk.bf16.mxu0 %vm4659_vm1, %v4658_v18 }
0x1151   :  { %4208 = vmatprep.subr.bf16.mxu0 %v4658_v18 }
0x1154   :  { %4209 = vmatpush3.bf16.msra.mxu0 %v4655_v23 }
0x1155   :  { %4222 = vmatprep.subr.bf16.mxu0 %v4658_v18 }
0x120f   :  { %v5170_v63 = vpop.f32.mrf.mxu0 }
0x1210   :  { %v1942_v5 = vmul.f32 %v5170_v63, %v1760_v49  ;;  %v1952_v22 = vmul.f32 %v1950_v21, %v5170_v63 }
0x1211   :  { %v4204_v0 = vpop.f32.mrf.mxu0 }
0x1213   :  { %v5172_v1 = vpop.f32.mrf.mxu0 }
0x1214   :  { %v1850_v2 = vpack.c.bf16 %v5172_v1, %v5170_v63  ;;  %v1943_v10 = vmul.f32 %v5172_v1, %v1760_v49  ;;  %v1953_v26 = vmul.f32 %v1950_v21, %v5172_v1  ;;  %v5220_v33 = vpack.c.bf16 %v5172_v1, %v5172_v1 }
0x1215   :  { %v4205_v3 = vpop.f32.mrf.mxu0 }
0x1216   :  { %1896 = vrot.lane.b32.xlu0 %v1850_v2, %s4656_s21  ;;  %4211 = vmatmul.mubr.msk.bf16.vlgmr.msra.gmra.mxu0 %vm67_vm0, %v1850_v2  ;;  %v5236_v2 = vpack.c.bf16 %v5170_v63, %v5170_v63 }
0x1217   :  { %4224 = vmatprep.mubr.msk.bf16.mxu0 %vm4659_vm1, %v4658_v18 }
0x1288   :  { %v1897_v4 = vpop.permute.xlu0 %1896 }
0x1289   :  { %4219 = vmatmul.mubr.msk.bf16.vlgmr.msra.gmra.mxu1 %vm67_vm0, %v1897_v4 }
0x128a   :  { %4230 = vmatprep.mubr.msk.bf16.mxu1 %vm4659_vm1, %v4658_v18 }
0x12d6   :  { %v1888_v61 = vpop.f32.mrf.mxu0 }
0x12d7   :  { %v1944_v54 = vmul.f32 %v1888_v61, %v1761_v56 }
0x12d8   :  { %v4212_v57 = vpop.f32.mrf.mxu0 }
0x12d9   :  { %v1946_v58 = vadd.f32 %v1944_v54, %v1942_v5 }
0x12da   :  { %v1891_v9 = vpop.f32.mrf.mxu0 }
0x12db   :  { %v1945_v11 = vmul.f32 %v1891_v9, %v1761_v56  ;;  %v5203_v46 = vpack.c.bf16 %v1946_v58, %v1946_v58 }
0x12dc   :  { %v4213_v12 = vpop.f32.mrf.mxu0 }
0x12dd   :  { %v1947_v13 = vadd.f32 %v1945_v11, %v1943_v10 }
0x12df   :  { %v5210_v35 = vpack.c.bf16 %v1947_v13, %v1947_v13 }
0x1349   :  { %v1935_v14 = vpop.f32.mrf.mxu1 }
0x134a   :  { %v1954_v15 = vmul.f32 %v1935_v14, %v1761_v56 }
0x134b   :  { %v4220_v16 = vpop.f32.mrf.mxu1 }
0x134c   :  { %1958 = vrot.lane.b32.xlu0 %v1954_v15, %s4657_s24 }
0x134d   :  { %v1938_v17 = vpop.f32.mrf.mxu1 }
0x134e   :  { %v1955_v19 = vmul.f32 %v1938_v17, %v1761_v56 }
0x134f   :  { %v4221_v20 = vpop.f32.mrf.mxu1 }
0x1350   :  { %1960 = vrot.lane.b32.xlu1 %v1955_v19, %s4657_s24  ;;  %s5567_s24 = smov 104  }
0x13be   :  { %v1959_v23 = vpop.permute.xlu0 %1958 }
0x13bf   :  { %v1964_v24 = vadd.f32 %v1959_v23, %v1952_v22 }
0x13c1   :  { %v5191_v25 = vpack.c.bf16 %v1964_v24, %v1964_v24 }
0x13c2   :  { %v1961_v27 = vpop.permute.xlu1 %1960 }
0x13c3   :  { %v1965_v28 = vadd.f32 %v1961_v27, %v1953_v26  ;;  %1973 = vrot.lane.b32.xlu0 %v5191_v25, %s4656_s21 }
0x13c5   :  { %v5196_v30 = vpack.c.bf16 %v1965_v28, %v1965_v28 }
0x13c7   :  { %2022 = vrot.lane.b32.xlu1 %v5196_v30, %s4656_s21  ;;  %s5566_s21 = smov 72  }
0x1435   :  { %v1974_v31 = vpop.permute.xlu0 %1973 }
0x1436   :  { %v1979_v32 = vsel %vm366_vm2, %v1974_v31, 0 }
0x1437   :  { %4223 = vmatpush3.bf16.xpose.msra.mxu0 %v1979_v32 }
0x1438   :  { %4234 = vmatprep.subr.bf16.mxu0 %v4658_v18 }
0x1439   :  { %v2023_v29 = vpop.permute.xlu1 %2022 }
0x143a   :  { %v2028_v34 = vsel %vm366_vm2, %v2023_v29, 0 }
0x143b   :  { %4229 = vmatpush3.bf16.xpose.msra.mxu1 %v2028_v34 }
0x143c   :  { %4240 = vmatprep.subr.bf16.mxu1 %v4658_v18 }
0x143e   :  { %4225 = vmatmul.mubr.msk.bf16.vlgmr.msra.gmra.mxu0 %vm366_vm2, %v5203_v46 }
0x143f   :  { %4236 = vmatprep.mubr.msk.bf16.mxu0 %vm4659_vm1, %v4658_v18 }
0x1442   :  { %4231 = vmatmul.mubr.msk.bf16.vlgmr.msra.gmra.mxu1 %vm366_vm2, %v5210_v35 }
0x1443   :  { %4242 = vmatprep.mubr.msk.bf16.mxu1 %vm4659_vm1, %v4658_v18 }
0x14fe   :  { %v2015_v36 = vpop.f32.mrf.mxu0 }
0x14ff   :  { %v2070_v48 = vmul.f32 0.35355338, %v2015_v36 }
0x1500   :  { %v4226_v38 = vpop.f32.mrf.mxu0 }
0x1501   :  { %v2072_v62 = vsel %vm366_vm2, %v2070_v48, -inf }
0x1502   :  { %v2064_v7 = vpop.f32.mrf.mxu1  ;;  %2073 = vmax.xlane.f32.xlu0 %v2072_v62  ;;  %v2018_v43 = vpop.f32.mrf.mxu0 }
0x1503   :  { %v2071_v44 = vmul.f32 0.35355338, %v2064_v7 }
0x1504   :  { %v4227_v47 = vpop.f32.mrf.mxu0  ;;  %v4232_v49 = vpop.f32.mrf.mxu1 }
0x1505   :  { %v2075_v50 = vsel %vm366_vm2, %v2071_v44, -inf }
0x1506   :  { %2076 = vmax.xlane.f32.xlu1 %v2075_v50  ;;  %v2067_v51 = vpop.f32.mrf.mxu1 }
0x1508   :  { %v4233_v52 = vpop.f32.mrf.mxu1 }
0x1517   :  { %2147 = vrot.lane.b32.xlu1 %v5220_v33, %s4660_s16 }
0x151b   :  { %2198 = vrot.lane.b32.xlu1 %v5191_v25, %s4661_s17 }
0x151f   :  { %2249 = vrot.lane.b32.xlu1 %v5196_v30, %s4661_s17  ;;  %s5568_s17 = smov 40  }
0x1523   :  { %2247 = vrot.lane.b32.xlu1 %v5210_v35, %s4662_s18 }
0x158b   :  { %v2074_v53 = vpop.xlane.xlu0 %2073 }
0x158c   :  { %v2078_v55 = vsub.f32 %v2070_v48, %v2074_v53 }
0x158e   :  { %v2080_v45 = vmul.f32 1.442695, %v2078_v55 }
0x158f   :  { %v2077_v41 = vpop.xlane.xlu1 %2076 }
0x1590   :  { %4594 = vpow2.f32 %v2080_v45  ;;  %v2079_v6 = vsub.f32 %v2071_v44, %v2077_v41 }
0x1592   :  { %v2082_v59 = vmul.f32 1.442695, %v2079_v6 }
0x1593   :  { %v2148_v42 = vpop.permute.xlu1 %2147 }
0x1594   :  { %4596 = vpow2.f32 %v2082_v59  ;;  %v2153_v60 = vsel %vm2102_vm6, %v2148_v42, 0 }
0x1595   :  { %4241 = vmatpush3.bf16.msra.mxu1 %v2153_v60 }
0x1596   :  { %4252 = vmatprep.subr.bf16.mxu1 %v4658_v18 }
0x1597   :  { %v2199_v54 = vpop.permute.xlu1 %2198 }
0x1598   :  { %v2204_v9 = vsel %vm366_vm2, %v2199_v54, 0 }
0x159b   :  { %v2250_v11 = vpop.permute.xlu1 %2249 }
0x159c   :  { %v2255_v13 = vsel %vm366_vm2, %v2250_v11, 0 }
0x159d   :  { %v4595_v39 = vpop.eup %4594 }
0x159e   :  { %v2084_v8 = vsel %vm366_vm2, %v4595_v39, 0.0 }
0x159f   :  { %2085 = vadd.xlane.f32.xlu0 %v2084_v8  ;;  %v2248_v15 = vpop.permute.xlu1 %2247 }
0x15a1   :  { %v4597_v0 = vpop.eup %4596 }
0x15a2   :  { %v2087_v1 = vsel %vm366_vm2, %v4597_v0, 0.0 }
0x15a3   :  { %2088 = vadd.xlane.f32.xlu0 %v2087_v1 }
0x15b9   :  { %2097 = vrot.lane.b32.xlu0 %v5236_v2, %s4660_s16 }
0x15bd   :  { %2196 = vrot.lane.b32.xlu0 %v5203_v46, %s4662_s18  ;;  %s5569_s18 = smov 8  }
0x1628   :  { %v2086_v3 = vpop.xlane.xlu0 %2085 }
0x1629   :  { %4598 = vrcp.f32 %v2086_v3 }
0x162c   :  { %v2089_v4 = vpop.xlane.xlu0 %2088 }
0x162d   :  { %4600 = vrcp.f32 %v2089_v4 }
0x1630   :  { %v2098_v56 = vpop.permute.xlu0 %2097 }
0x1631   :  { %v2104_v61 = vsel %vm2102_vm6, %v2098_v56, 0 }
0x1632   :  { %4235 = vmatpush3.bf16.msra.mxu0 %v2104_v61 }
0x1633   :  { %4246 = vmatprep.subr.bf16.mxu0 %v4658_v18 }
0x1634   :  { %v2197_v14 = vpop.permute.xlu0 %2196 }
0x1636   :  { %v4599_v5 = vpop.eup %4598 }
0x1637   :  { %v2092_v63 = vmul.f32 %v4599_v5, %v4595_v39 }
0x1639   :  { %v2094_v57 = vpack.c.bf16 %v2092_v63, %v2092_v63 }
0x163a   :  { %v4601_v58 = vpop.eup %4600 }
0x163b   :  { %4237 = vmatmul.mubr.msk.bf16.vlgmr.msra.gmra.mxu0 %vm366_vm2, %v2094_v57  ;;  %v2093_v10 = vmul.f32 %v4601_v58, %v4597_v0 }
0x163c   :  { %4247 = vmatpush3.bf16.xpose.msra.mxu0 %v2204_v9  ;;  %4248 = vmatprep.mubr.msk.bf16.mxu0 %vm4659_vm1, %v4658_v18 }
0x163d   :  { %v2095_v12 = vpack.c.bf16 %v2093_v10, %v2093_v10  ;;  %4258 = vmatprep.subr.bf16.mxu0 %v4658_v18 }
0x163f   :  { %4243 = vmatmul.mubr.msk.bf16.vlgmr.msra.gmra.mxu1 %vm366_vm2, %v2095_v12 }
0x1640   :  { %4253 = vmatpush3.bf16.xpose.msra.mxu1 %v2255_v13  ;;  %4254 = vmatprep.mubr.msk.bf16.mxu1 %vm4659_vm1, %v4658_v18 }
0x1641   :  { %4264 = vmatprep.subr.bf16.mxu1 %v4658_v18 }
0x1643   :  { %4249 = vmatmul.mubr.msk.bf16.vlgmr.msra.gmra.mxu0 %vm366_vm2, %v2197_v14 }
0x1644   :  { %4260 = vmatprep.mubr.msk.bf16.mxu0 %vm4659_vm1, %v4658_v18 }
0x1647   :  { %4255 = vmatmul.mubr.msk.bf16.vlgmr.msra.gmra.mxu1 %vm366_vm2, %v2248_v15 }
0x1648   :  { %4266 = vmatprep.mubr.msk.bf16.mxu1 %vm4659_vm1, %v4658_v18 }
0x16fb   :  { %v5260_v16 = vpop.f32.mrf.mxu0 }
0x16fd   :  { %v4238_v17 = vpop.f32.mrf.mxu0 }
0x16ff   :  { %v2143_v19 = vpop.f32.mrf.mxu0  ;;  %v5262_v20 = vpop.f32.mrf.mxu1 }
0x1701   :  { %v4239_v21 = vpop.f32.mrf.mxu0  ;;  %v4244_v22 = vpop.f32.mrf.mxu1 }
0x1703   :  { %v2192_v23 = vpop.f32.mrf.mxu1  ;;  %v2240_v24 = vpop.f32.mrf.mxu0 }
0x1704   :  { %v2297_v26 = vmul.f32 0.35355338, %v2240_v24 }
0x1705   :  { %v4245_v27 = vpop.f32.mrf.mxu1  ;;  %v4250_v28 = vpop.f32.mrf.mxu0 }
0x1706   :  { %v2299_v31 = vsel %vm366_vm2, %v2297_v26, -inf }
0x1707   :  { %v2291_v32 = vpop.f32.mrf.mxu1  ;;  %2300 = vmax.xlane.f32.xlu0 %v2299_v31  ;;  %v2243_v29 = vpop.f32.mrf.mxu0 }
0x1708   :  { %v2298_v34 = vmul.f32 0.35355338, %v2291_v32 }
0x1709   :  { %v4251_v36 = vpop.f32.mrf.mxu0  ;;  %v4256_v48 = vpop.f32.mrf.mxu1 }
0x170a   :  { %v2302_v38 = vsel %vm366_vm2, %v2298_v34, -inf }
0x170b   :  { %2303 = vmax.xlane.f32.xlu1 %v2302_v38  ;;  %v2294_v62 = vpop.f32.mrf.mxu1 }
0x170d   :  { %v4257_v7 = vpop.f32.mrf.mxu1 }
0x171c   :  { %2371 = vrot.lane.b32.xlu1 %v5220_v33, %s4663_s19 }
0x1720   :  { %2421 = vrot.lane.b32.xlu1 %v5191_v25, %s4664_s20 }
0x1724   :  { %2471 = vrot.lane.b32.xlu1 %v5196_v30, %s4664_s20 }
0x1728   :  { %2469 = vrot.lane.b32.xlu1 %v5210_v35, %s4665_s22 }
0x1790   :  { %v2301_v43 = vpop.xlane.xlu0 %2300 }
0x1791   :  { %v2305_v44 = vsub.f32 %v2297_v26, %v2301_v43 }
0x1793   :  { %v2307_v47 = vmul.f32 1.442695, %v2305_v44 }
0x1794   :  { %v2304_v49 = vpop.xlane.xlu1 %2303 }
0x1795   :  { %4602 = vpow2.f32 %v2307_v47  ;;  %v2306_v50 = vsub.f32 %v2298_v34, %v2304_v49 }
0x1797   :  { %v2309_v51 = vmul.f32 1.442695, %v2306_v50 }
0x1798   :  { %v2372_v52 = vpop.permute.xlu1 %2371 }
0x1799   :  { %4604 = vpow2.f32 %v2309_v51  ;;  %v2377_v53 = vsel %vm2102_vm6, %v2372_v52, 0 }
0x179a   :  { %4265 = vmatpush3.bf16.msra.mxu1 %v2377_v53 }
0x179b   :  { %4276 = vmatprep.subr.bf16.mxu1 %v4658_v18 }
0x179c   :  { %v2422_v0 = vpop.permute.xlu1 %2421 }
0x179d   :  { %v2427_v56 = vsel %vm366_vm2, %v2422_v0, 0 }
0x17a0   :  { %v2472_v5 = vpop.permute.xlu1 %2471 }
0x17a1   :  { %v2477_v63 = vsel %vm366_vm2, %v2472_v5, 0 }
0x17a2   :  { %v4603_v55 = vpop.eup %4602 }
0x17a3   :  { %v2311_v45 = vsel %vm366_vm2, %v4603_v55, 0.0 }
0x17a4   :  { %2312 = vadd.xlane.f32.xlu0 %v2311_v45  ;;  %v2470_v58 = vpop.permute.xlu1 %2469 }
0x17a6   :  { %v4605_v41 = vpop.eup %4604 }
0x17a7   :  { %v2314_v6 = vsel %vm366_vm2, %v4605_v41, 0.0 }
0x17a8   :  { %2315 = vadd.xlane.f32.xlu0 %v2314_v6 }
0x17be   :  { %2323 = vrot.lane.b32.xlu0 %v5236_v2, %s4663_s19  ;;  %s5570_s19 = smov 16  }
0x17c2   :  { %2419 = vrot.lane.b32.xlu0 %v5203_v46, %s4665_s22 }
0x182d   :  { %v2313_v59 = vpop.xlane.xlu0 %2312 }
0x182e   :  { %4606 = vrcp.f32 %v2313_v59 }
0x1831   :  { %v2316_v42 = vpop.xlane.xlu0 %2315 }
0x1832   :  { %4608 = vrcp.f32 %v2316_v42 }
0x1835   :  { %v2324_v60 = vpop.permute.xlu0 %2323 }
0x1836   :  { %v2329_v39 = vsel %vm2102_vm6, %v2324_v60, 0 }
0x1837   :  { %4259 = vmatpush3.bf16.msra.mxu0 %v2329_v39 }
0x1838   :  { %4270 = vmatprep.subr.bf16.mxu0 %v4658_v18 }
0x1839   :  { %v2420_v57 = vpop.permute.xlu0 %2419 }
0x183b   :  { %v4607_v8 = vpop.eup %4606 }
0x183c   :  { %v2319_v1 = vmul.f32 %v4607_v8, %v4603_v55 }
0x183e   :  { %v2321_v3 = vpack.c.bf16 %v2319_v1, %v2319_v1 }
0x183f   :  { %v4609_v4 = vpop.eup %4608 }
0x1840   :  { %4261 = vmatmul.mubr.msk.bf16.vlgmr.msra.gmra.mxu0 %vm366_vm2, %v2321_v3  ;;  %v2320_v61 = vmul.f32 %v4609_v4, %v4605_v41 }
0x1841   :  { %4271 = vmatpush3.bf16.xpose.msra.mxu0 %v2427_v56  ;;  %4272 = vmatprep.mubr.msk.bf16.mxu0 %vm4659_vm1, %v4658_v18 }
0x1842   :  { %v2322_v54 = vpack.c.bf16 %v2320_v61, %v2320_v61  ;;  %4282 = vmatprep.subr.bf16.mxu0 %v4658_v18 }
0x1844   :  { %4267 = vmatmul.mubr.msk.bf16.vlgmr.msra.gmra.mxu1 %vm366_vm2, %v2322_v54 }
0x1845   :  { %4277 = vmatpush3.bf16.xpose.msra.mxu1 %v2477_v63  ;;  %4278 = vmatprep.mubr.msk.bf16.mxu1 %vm4659_vm1, %v4658_v18 }
0x1846   :  { %4288 = vmatprep.subr.bf16.mxu1 %v4658_v18 }
0x1848   :  { %4273 = vmatmul.mubr.msk.bf16.vlgmr.msra.gmra.mxu0 %vm366_vm2, %v2420_v57 }
0x1849   :  { %4284 = vmatprep.mubr.msk.bf16.mxu0 %vm4659_vm1, %v4658_v18 }
0x184c   :  { %4279 = vmatmul.mubr.msk.bf16.vlgmr.msra.gmra.mxu1 %vm366_vm2, %v2470_v58 }
0x184d   :  { %4290 = vmatprep.mubr.msk.bf16.mxu1 %vm4659_vm1, %v4658_v18 }
0x1900   :  { %v5300_v9 = vpop.f32.mrf.mxu0 }
0x1902   :  { %v4262_v10 = vpop.f32.mrf.mxu0 }
0x1904   :  { %v2368_v11 = vpop.f32.mrf.mxu0  ;;  %v5302_v12 = vpop.f32.mrf.mxu1 }
0x1905   :  { %v4446_v13 = vpack.i.bf16 %v5302_v12, %v5300_v9 }
0x1906   :  { %v4263_v14 = vpop.f32.mrf.mxu0  ;;  %v4268_v15 = vpop.f32.mrf.mxu1 }
0x1908   :  { %v2416_v17 = vpop.f32.mrf.mxu1  ;;  %v2463_v19 = vpop.f32.mrf.mxu0 }
0x1909   :  { %v2519_v21 = vmul.f32 0.35355338, %v2463_v19 }
0x190a   :  { %v4269_v22 = vpop.f32.mrf.mxu1  ;;  %v4274_v23 = vpop.f32.mrf.mxu0 }
0x190b   :  { %v2521_v24 = vsel %vm366_vm2, %v2519_v21, -inf }
0x190c   :  { %v2513_v26 = vpop.f32.mrf.mxu1  ;;  %2522 = vmax.xlane.f32.xlu0 %v2521_v24  ;;  %v2466_v27 = vpop.f32.mrf.mxu0 }
0x190d   :  { %v2520_v28 = vmul.f32 0.35355338, %v2513_v26 }
0x190e   :  { %v4275_v31 = vpop.f32.mrf.mxu0  ;;  %v4280_v32 = vpop.f32.mrf.mxu1 }
0x190f   :  { %v2524_v29 = vsel %vm366_vm2, %v2520_v28, -inf }
0x1910   :  { %2525 = vmax.xlane.f32.xlu1 %v2524_v29  ;;  %v2516_v34 = vpop.f32.mrf.mxu1 }
0x1912   :  { %v4281_v36 = vpop.f32.mrf.mxu1 }
0x1921   :  { %2593 = vrot.lane.b32.xlu1 %v5220_v33, %s5565_s2 }
0x1925   :  { %2643 = vrot.lane.b32.xlu1 %v5191_v25, %s5566_s21 }
0x1929   :  { %2693 = vrot.lane.b32.xlu1 %v5196_v30, %s5566_s21 }
0x192d   :  { %2691 = vrot.lane.b32.xlu1 %v5210_v35, %s5567_s24 }
0x1995   :  { %v2523_v48 = vpop.xlane.xlu0 %2522 }
0x1996   :  { %v2527_v38 = vsub.f32 %v2519_v21, %v2523_v48 }
0x1998   :  { %v2529_v62 = vmul.f32 1.442695, %v2527_v38 }
0x1999   :  { %v2526_v7 = vpop.xlane.xlu1 %2525 }
0x199a   :  { %4610 = vpow2.f32 %v2529_v62  ;;  %v2528_v43 = vsub.f32 %v2520_v28, %v2526_v7 }
0x199c   :  { %v2531_v44 = vmul.f32 1.442695, %v2528_v43 }
0x199d   :  { %v2594_v47 = vpop.permute.xlu1 %2593 }
0x199e   :  { %4612 = vpow2.f32 %v2531_v44  ;;  %v2599_v49 = vsel %vm2102_vm6, %v2594_v47, 0 }
0x199f   :  { %4289 = vmatpush3.bf16.msra.mxu1 %v2599_v49 }
0x19a0   :  { %4300 = vmatprep.subr.bf16.mxu1 %v4658_v18 }
0x19a1   :  { %v2644_v41 = vpop.permute.xlu1 %2643 }
0x19a2   :  { %v2649_v60 = vsel %vm366_vm2, %v2644_v41, 0 }
0x19a5   :  { %v2694_v39 = vpop.permute.xlu1 %2693 }
0x19a6   :  { %v2699_v0 = vsel %vm366_vm2, %v2694_v39, 0 }
0x19a7   :  { %v4611_v25 = vpop.eup %4610 }
0x19a8   :  { %v2533_v30 = vsel %vm366_vm2, %v4611_v25, 0.0 }
0x19a9   :  { %2534 = vadd.xlane.f32.xlu0 %v2533_v30  ;;  %v2692_v3 = vpop.permute.xlu1 %2691 }
0x19ab   :  { %v4613_v50 = vpop.eup %4612 }
0x19ac   :  { %v2536_v35 = vsel %vm366_vm2, %v4613_v50, 0.0 }
0x19ad   :  { %2537 = vadd.xlane.f32.xlu0 %v2536_v35 }
0x19c3   :  { %2545 = vrot.lane.b32.xlu0 %v5236_v2, %s5565_s2 }
0x19c7   :  { %2641 = vrot.lane.b32.xlu0 %v5203_v46, %s5567_s24 }
0x1a32   :  { %v2535_v51 = vpop.xlane.xlu0 %2534 }
0x1a33   :  { %4614 = vrcp.f32 %v2535_v51  ;;  %v4476_v51 = vld [vmem:[%s5544_s6 + $0x18] sm:$0xff]  }
0x1a36   :  { %v2538_v52 = vpop.xlane.xlu0 %2537 }
0x1a37   :  { %4616 = vrcp.f32 %v2538_v52  ;;  %v4477_v52 = vld [vmem:[%s5544_s6 + $0x10] sm:$0xff]  }
0x1a3a   :  { %v2546_v53 = vpop.permute.xlu0 %2545 }
0x1a3b   :  { %v2551_v55 = vsel %vm2102_vm6, %v2546_v53, 0 }
0x1a3c   :  { %4283 = vmatpush3.bf16.msra.mxu0 %v2551_v55 }
0x1a3d   :  { %4294 = vmatprep.subr.bf16.mxu0 %v4658_v18 }
0x1a3e   :  { %v2642_v1 = vpop.permute.xlu0 %2641 }
0x1a40   :  { %v4615_v45 = vpop.eup %4614 }
0x1a41   :  { %v2541_v6 = vmul.f32 %v4615_v45, %v4611_v25 }
0x1a43   :  { %v2543_v59 = vpack.c.bf16 %v2541_v6, %v2541_v6 }
0x1a44   :  { %v4617_v42 = vpop.eup %4616 }
0x1a45   :  { %4285 = vmatmul.mubr.msk.bf16.vlgmr.msra.gmra.mxu0 %vm366_vm2, %v2543_v59  ;;  %v2542_v46 = vmul.f32 %v4617_v42, %v4613_v50 }
0x1a46   :  { %4295 = vmatpush3.bf16.xpose.msra.mxu0 %v2649_v60  ;;  %4296 = vmatprep.mubr.msk.bf16.mxu0 %vm4659_vm1, %v4658_v18 }
0x1a47   :  { %v2544_v8 = vpack.c.bf16 %v2542_v46, %v2542_v46  ;;  %4306 = vmatprep.subr.bf16.mxu0 %v4658_v18 }
0x1a49   :  { %4291 = vmatmul.mubr.msk.bf16.vlgmr.msra.gmra.mxu1 %vm366_vm2, %v2544_v8 }
0x1a4a   :  { %4301 = vmatpush3.bf16.xpose.msra.mxu1 %v2699_v0  ;;  %4302 = vmatprep.mubr.msk.bf16.mxu1 %vm4659_vm1, %v4658_v18 }
0x1a4b   :  { %4312 = vmatprep.subr.bf16.mxu1 %v4658_v18 }
0x1a4d   :  { %4297 = vmatmul.mubr.msk.bf16.vlgmr.msra.gmra.mxu0 %vm366_vm2, %v2642_v1 }
0x1a4e   :  { %4308 = vmatprep.mubr.msk.bf16.mxu0 %vm4659_vm1, %v4658_v18 }
0x1a51   :  { %4303 = vmatmul.mubr.msk.bf16.vlgmr.msra.gmra.mxu1 %vm366_vm2, %v2692_v3 }
0x1a52   :  { %4314 = vmatprep.mubr.msk.bf16.mxu1 %vm4659_vm1, %v4658_v18 }
0x1b05   :  { %v2587_v4 = vpop.f32.mrf.mxu0 }
0x1b07   :  { %v4286_v56 = vpop.f32.mrf.mxu0 }
0x1b09   :  { %v2590_v61 = vpop.f32.mrf.mxu0  ;;  %v2635_v5 = vpop.f32.mrf.mxu1 }
0x1b0a   :  { %v4451_v28 = vpack.i.bf16 %v2635_v5, %v2587_v4 }
0x1b0b   :  { %v4287_v54 = vpop.f32.mrf.mxu0  ;;  %v4292_v63 = vpop.f32.mrf.mxu1 }
0x1b0d   :  { %v2638_v57 = vpop.f32.mrf.mxu1  ;;  %v2685_v58 = vpop.f32.mrf.mxu0 }
0x1b0e   :  { %v2741_v10 = vmul.f32 0.35355338, %v2685_v58 }
0x1b0f   :  { %v4293_v11 = vpop.f32.mrf.mxu1  ;;  %v4298_v14 = vpop.f32.mrf.mxu0 }
0x1b10   :  { %v2743_v15 = vsel %vm366_vm2, %v2741_v10, -inf }
0x1b11   :  { %v2735_v17 = vpop.f32.mrf.mxu1  ;;  %2744 = vmax.xlane.f32.xlu0 %v2743_v15  ;;  %v2688_v19 = vpop.f32.mrf.mxu0 }
0x1b12   :  { %v2742_v21 = vmul.f32 0.35355338, %v2735_v17 }
0x1b13   :  { %v4299_v22 = vpop.f32.mrf.mxu0  ;;  %v4304_v23 = vpop.f32.mrf.mxu1 }
0x1b14   :  { %v2746_v24 = vsel %vm366_vm2, %v2742_v21, -inf }
0x1b15   :  { %2747 = vmax.xlane.f32.xlu1 %v2746_v24  ;;  %v2738_v26 = vpop.f32.mrf.mxu1 }
0x1b17   :  { %v4305_v27 = vpop.f32.mrf.mxu1 }
0x1b26   :  { %2815 = vrot.lane.b32.xlu1 %v5220_v33, %s5568_s17 }
0x1b2a   :  { %4447 = vrot.lane.b32.xlu1 %v4446_v13, %s5569_s18 }
0x1b2e   :  { %4452 = vrot.lane.b32.xlu1 %v4451_v28, %s5570_s19 }
0x1b9a   :  { %v2745_v31 = vpop.xlane.xlu0 %2744 }
0x1b9b   :  { %v2749_v32 = vsub.f32 %v2741_v10, %v2745_v31 }
0x1b9d   :  { %v2751_v29 = vmul.f32 1.442695, %v2749_v32 }
0x1b9e   :  { %v2748_v34 = vpop.xlane.xlu1 %2747 }
0x1b9f   :  { %4618 = vpow2.f32 %v2751_v29  ;;  %v2750_v36 = vsub.f32 %v2742_v21, %v2748_v34 }
0x1ba1   :  { %v2753_v48 = vmul.f32 1.442695, %v2750_v36 }
0x1ba2   :  { %v2816_v38 = vpop.permute.xlu1 %2815 }
0x1ba3   :  { %4620 = vpow2.f32 %v2753_v48  ;;  %v2821_v62 = vsel %vm2102_vm6, %v2816_v38, 0 }
0x1ba4   :  { %4313 = vmatpush3.bf16.msra.mxu1 %v2821_v62  ;;  %v3853_v62 = vld [vmem:[%s5546_s7 + $0x1] ss:$0 sm:$0xff] }
0x1ba5   :  { %4326 = vmatprep.subr.bf16.mxu1 %v4658_v18 }
0x1ba6   :  { %v4448_v39 = vpop.permute.xlu1 %4447 }
0x1ba7   :  { %v4450_v0 = vunpack.i.h.bf16 %v4448_v39  ;;  %v4449_v1 = vunpack.i.l.bf16 %v4448_v39 }
0x1ba9   :  { %v2888_v61 = vsel %vm366_vm2, %v5262_v20, %v4450_v0  ;;  %v2887_v5 = vsel %vm366_vm2, %v5260_v16, %v4449_v1 }
0x1baa   :  { %v4453_v8 = vpop.permute.xlu1 %4452 }
0x1bab   :  { %v4455_v3 = vunpack.i.h.bf16 %v4453_v8  ;;  %v4454_v4 = vunpack.i.l.bf16 %v4453_v8 }
0x1bac   :  { %v4619_v33 = vpop.eup %4618 }
0x1bad   :  { %v2755_v9 = vsel %vm366_vm2, %v4619_v33, 0.0  ;;  %v2890_v57 = vsel %vm468_vm3, %v2888_v61, %v4455_v3  ;;  %v2889_v58 = vsel %vm468_vm3, %v2887_v5, %v4454_v4 }
0x1bae   :  { %2756 = vadd.xlane.f32.xlu0 %v2755_v9 }
0x1bb0   :  { %v4621_v12 = vpop.eup %4620 }
0x1bb1   :  { %v2758_v13 = vsel %vm366_vm2, %v4621_v12, 0.0 }
0x1bb2   :  { %2759 = vadd.xlane.f32.xlu0 %v2758_v13 }
0x1bc8   :  { %2767 = vrot.lane.b32.xlu0 %v5236_v2, %s5568_s17 }
0x1c37   :  { %v2757_v7 = vpop.xlane.xlu0 %2756 }
0x1c38   :  { %4622 = vrcp.f32 %v2757_v7  ;;  %v4480_v7 = vld [vmem:[%s5547_s9 + $0x38] sm:$0xff]  }
0x1c3b   :  { %v2760_v43 = vpop.xlane.xlu0 %2759 }
0x1c3c   :  { %4624 = vrcp.f32 %v2760_v43  ;;  %v4481_v43 = vld [vmem:[%s5547_s9 + $0x30] sm:$0xff]  }
0x1c3f   :  { %v2768_v44 = vpop.permute.xlu0 %2767 }
0x1c40   :  { %v2773_v47 = vsel %vm2102_vm6, %v2768_v44, 0  ;;  %v4482_v44 = vld [vmem:[%s5547_s9 + $0x28] sm:$0xff]  }
0x1c41   :  { %4307 = vmatpush3.bf16.msra.mxu0 %v2773_v47  ;;  %v4483_v47 = vld [vmem:[%s5547_s9 + $0x20] sm:$0xff]  }
0x1c42   :  { %4318 = vmatprep.subr.bf16.mxu0 %v4658_v18 }
0x1c45   :  { %v4623_v49 = vpop.eup %4622 }
0x1c46   :  { %v2763_v25 = vmul.f32 %v4623_v49, %v4619_v33 }
0x1c48   :  { %v2765_v30 = vpack.c.bf16 %v2763_v25, %v2763_v25 }
0x1c49   :  { %v4625_v50 = vpop.eup %4624 }
0x1c4a   :  { %4309 = vmatmul.mubr.msk.bf16.vlgmr.msra.gmra.mxu0 %vm366_vm2, %v2765_v30  ;;  %v2764_v35 = vmul.f32 %v4625_v50, %v4621_v12 }
0x1c4b   :  { %4322 = vmatprep.mubr.msk.bf16.mxu0 %vm4659_vm1, %v4658_v18  ;;  %4319 = vmatpush3.bf16.msra.mxu0 %v4476_v51 }
0x1c4c   :  { %v2766_v2 = vpack.c.bf16 %v2764_v35, %v2764_v35  ;;  %4320 = vmatprep.subr.bf16.mxu0 %v4658_v18 }
0x1c4e   :  { %4315 = vmatmul.mubr.msk.bf16.vlgmr.msra.gmra.mxu1 %vm366_vm2, %v2766_v2 }
0x1c4f   :  { %4330 = vmatprep.mubr.msk.bf16.mxu1 %vm4659_vm1, %v4658_v18  ;;  %4321 = vmatpush3.bf16.msra.mxu0 %v4477_v52 }
0x1c50   :  { %4334 = vmatprep.subr.bf16.mxu0 %v4658_v18 }
0x1d0a   :  { %v2809_v53 = vpop.f32.mrf.mxu0 }
0x1d0c   :  { %v4310_v55 = vpop.f32.mrf.mxu0 }
0x1d0e   :  { %v2812_v45 = vpop.f32.mrf.mxu0  ;;  %v2857_v41 = vpop.f32.mrf.mxu1 }
0x1d0f   :  { %v4456_v6 = vpack.i.bf16 %v2857_v41, %v2809_v53 }
0x1d10   :  { %v4311_v59 = vpop.f32.mrf.mxu0  ;;  %v4316_v42 = vpop.f32.mrf.mxu1 }
0x1d11   :  { %4457 = vrot.lane.b32.xlu0 %v4456_v6, %s5571_s3 }
0x1d12   :  { %v2860_v60 = vpop.f32.mrf.mxu1 }
0x1d14   :  { %v4317_v46 = vpop.f32.mrf.mxu1 }
0x1d83   :  { %v4458_v56 = vpop.permute.xlu0 %4457 }
0x1d84   :  { %v4460_v54 = vunpack.i.h.bf16 %v4458_v56  ;;  %v4459_v63 = vunpack.i.l.bf16 %v4458_v56 }
0x1d86   :  { %v2892_v10 = vsel %vm1405_vm4, %v2890_v57, %v4460_v54  ;;  %v2891_v11 = vsel %vm1405_vm4, %v2889_v58, %v4459_v63 }
0x1d87   :  { %v2893_v14 = vpack.c.bf16 %v2892_v10, %v2891_v11  ;;  %v4484_v11 = vld [vmem:[%s5548_s11 + $0x8] sm:$0xff]  }
0x1d89   :  { %4323 = vmatmul.mubr.msk.bf16.vlgmr.msra.gmra.mxu0 %vm67_vm0, %v2893_v14  ;;  %v4485_v14 = vld [vmem:[%s5548_s11 + $0x28] sm:$0xff]  }
0x1d8a   :  { %4342 = vmatprep.mubr.msk.bf16.mxu0 %vm4659_vm1, %v4658_v18  ;;  %4335 = vmatpush3.bf16.msra.mxu0 %v4480_v7 }
0x1d8b   :  { %4336 = vmatprep.subr.bf16.mxu0 %v4658_v18 }
0x1d8e   :  { %4337 = vmatpush3.bf16.msra.mxu0 %v4481_v43 }
0x1d8f   :  { %4338 = vmatprep.subr.bf16.mxu0 %v4658_v18 }
0x1d92   :  { %4339 = vmatpush3.bf16.msra.mxu0 %v4482_v44 }
0x1d93   :  { %4340 = vmatprep.subr.bf16.mxu0 %v4658_v18 }
0x1d96   :  { %4341 = vmatpush3.bf16.msra.mxu0 %v4483_v47 }
0x1d97   :  { %4362 = vmatprep.subr.bf16.mxu0 %v4658_v18 }
0x1e49   :  { %v2948_v20 = vpop.f32.mrf.mxu0 }
0x1e4a   :  { %v5386_v15 = vadd.f32 %v2948_v20, %v5142_v40  ;;  %v4478_v40 = vld [vmem:[%s5545_s8 + $0x18] sm:$0xff]   ;;  %v4486_v20 = vld [vmem:[%s5548_s11] sm:$0xff]  }
0x1e4b   :  { %v4324_v16 = vpop.f32.mrf.mxu0  ;;  %4327 = vmatpush3.bf16.msra.mxu1 %v4478_v40 }
0x1e4c   :  { %v2957_v17 = vmul.f32 %v5386_v15, %v5386_v15  ;;  %4328 = vmatprep.subr.bf16.mxu1 %v4658_v18 }
0x1e4d   :  { %v2951_v19 = vpop.f32.mrf.mxu0 }
0x1e4e   :  { %v5391_v21 = vadd.f32 %v2951_v19, %v5138_v37  ;;  %v2959_v22 = vsel %vm67_vm0, %v2957_v17, 0.0  ;;  %v4479_v37 = vld [vmem:[%s5545_s8 + $0x10] sm:$0xff]  }
0x1e4f   :  { %2960 = vadd.xlane.f32.xlu1 %v2959_v22  ;;  %v4325_v23 = vpop.f32.mrf.mxu0  ;;  %4329 = vmatpush3.bf16.msra.mxu1 %v4479_v37  ;;  %v3876_v22 = vld [vmem:[%s5549_s10] ss:$0 sm:$0xff] }
0x1e50   :  { %v2958_v24 = vmul.f32 %v5391_v21, %v5391_v21  ;;  %4346 = vmatprep.subr.bf16.mxu1 %v4658_v18 }
0x1e52   :  { %v2962_v26 = vsel %vm67_vm0, %v2958_v24, 0.0 }
0x1e53   :  { %2963 = vadd.xlane.f32.xlu0 %v2962_v26  ;;  %v4488_v26 = vld [vmem:[%s5548_s11 + $0x18] sm:$0xff]  }
0x1ed8   :  { %v2961_v27 = vpop.xlane.xlu1 %2960 }
0x1ed9   :  { %v2965_v28 = vmul.f32 0.03125, %v2961_v27  ;;  %v4489_v27 = vld [vmem:[%s5548_s11 + $0x48] sm:$0xff]  }
0x1edb   :  { %v2967_v31 = vadd.f32 1e-05, %v2965_v28 }
0x1edc   :  { %v2964_v32 = vpop.xlane.xlu0 %2963 }
0x1edd   :  { %4626 = vrsqrt.f32 %v2967_v31  ;;  %v2966_v29 = vmul.f32 0.03125, %v2964_v32  ;;  %v4490_v32 = vld [vmem:[%s5548_s11 + $0x10] sm:$0xff]  }
0x1edf   :  { %v2968_v34 = vadd.f32 1e-05, %v2966_v29  ;;  %v4491_v29 = vld [vmem:[%s5548_s11 + $0x40] sm:$0xff]  }
0x1ee1   :  { %4628 = vrsqrt.f32 %v2968_v34 }
0x1eea   :  { %v4627_v36 = vpop.eup %4626 }
0x1eeb   :  { %v2971_v48 = vmul.f32 %v4627_v36, %v5386_v15 }
0x1eed   :  { %v2981_v9 = vmul.f32 %v3853_v62, %v2971_v48  ;;  %v4492_v48 = vld [vmem:[%s5548_s11 + $0x38] sm:$0xff]  }
0x1eee   :  { %v4629_v38 = vpop.eup %4628 }
0x1eef   :  { %v2972_v33 = vmul.f32 %v4629_v38, %v5391_v21 }
0x1ef1   :  { %v2982_v12 = vmul.f32 %v3853_v62, %v2972_v33  ;;  %v4493_v33 = vld [vmem:[%s5548_s11 + $0x30] sm:$0xff]  }
0x1ef3   :  { %v2983_v13 = vpack.c.bf16 %v2982_v12, %v2981_v9 }
0x1ef5   :  { %4331 = vmatmul.mubr.msk.bf16.vlgmr.msra.gmra.mxu1 %vm67_vm0, %v2983_v13  ;;  %v3175_v13 = vlaneseq }
0x1ef6   :  { %4350 = vmatprep.mubr.msk.bf16.mxu1 %vm4659_vm1, %v4658_v18  ;;  %4347 = vmatpush3.bf16.msra.mxu1 %v4484_v11  ;;  %v3912_v11 = vld [vmem:[%s5550_s12] ss:$0 sm:$0xff] }
0x1ef7   :  { %4348 = vmatprep.subr.bf16.mxu1 %v4658_v18  ;;  %v5498_v7 = vshrl.u32 %v3175_v13, 7 }
0x1ef9   :  { %v5501_v43 = vand.u32 3, %v5498_v7 }
0x1efa   :  { %4349 = vmatpush3.bf16.msra.mxu1 %v4486_v20 }
0x1efb   :  { %4354 = vmatprep.subr.bf16.mxu1 %v4658_v18  ;;  %v3247_v44 = vadd.s32 4294967295, %v5501_v43 }
0x1efd   :  { %vm3248_vm8 = vcmp.ge.s32.totalorder %v3247_v44, 0  ;;  %v3662_v44 = vld [vmem:[%s5551_s14] sm:$0xf] }
0x1fb5   :  { %v3038_v49 = vpop.f32.mrf.mxu1 }
0x1fb6   :  { %3061 = vrot.lane.b32.xlu0 %v3038_v49, %s4660_s16  ;;  %v3861_v35 = vmul.f32 -1.442695, %v3038_v49 }
0x1fb7   :  { %v4332_v25 = vpop.f32.mrf.mxu1 }
0x1fb8   :  { %4630 = vpow2.f32 %v3861_v35  ;;  %v3178_v25 = vadd.s32 4294967294, %v5501_v43 }
0x1fb9   :  { %v3041_v30 = vpop.f32.mrf.mxu1 }
0x1fba   :  { %3063 = vrot.lane.b32.xlu1 %v3041_v30, %s4660_s16  ;;  %v3862_v2 = vmul.f32 -1.442695, %v3041_v30  ;;  %vm3179_vm9 = vcmp.ge.s32.totalorder %v3178_v25, 0 }
0x1fbb   :  { %v4333_v50 = vpop.f32.mrf.mxu1 }
0x1fbc   :  { %4632 = vpow2.f32 %v3862_v2 }
0x1fc5   :  { %v4631_v51 = vpop.eup %4630 }
0x1fc6   :  { %v3051_v53 = vadd.f32 1.0, %v4631_v51 }
0x1fc8   :  { %4634 = vrcp.f32 %v3051_v53  ;;  %v3881_v53 = vsel %vm3248_vm8, 1.0, %v4658_v18 }
0x1fc9   :  { %v4633_v52 = vpop.eup %4632 }
0x1fca   :  { %v3052_v55 = vadd.f32 1.0, %v4633_v52 }
0x1fcc   :  { %4636 = vrcp.f32 %v3052_v55  ;;  %v3386_v55 = vadd.s32 1, %v5501_v43 }
0x1fce   :  { %vm3388_vm10 = vcmp.lt.s32.totalorder %v3386_v55, 4 }
0x1fd5   :  { %v4635_v45 = vpop.eup %4634 }
0x1fd6   :  { %v3057_v59 = vmul.f32 %v4635_v45, %v3038_v49  ;;  %v3877_v45 = vsel %vm3179_vm9, 1.0, %v4658_v18 }
0x1fd9   :  { %v4637_v41 = vpop.eup %4636 }
0x1fda   :  { %v3058_v42 = vmul.f32 %v4637_v41, %v3041_v30 }
0x2028   :  { %v3062_v6 = vpop.permute.xlu0 %3061 }
0x2029   :  { %v3067_v46 = vmul.f32 %v3062_v6, %v3057_v59 }
0x202c   :  { %v3064_v60 = vpop.permute.xlu1 %3063 }
0x202d   :  { %v3068_v39 = vmul.f32 %v3064_v60, %v3058_v42  ;;  %v3456_v42 = vadd.s32 2, %v5501_v43 }
0x202f   :  { %v3069_v8 = vpack.c.bf16 %v3068_v39, %v3067_v46  ;;  %vm3458_vm11 = vcmp.lt.s32.totalorder %v3456_v42, 4 }
0x2031   :  { %4343 = vmatmul.mubr.msk.bf16.vlgmr.msra.gmra.mxu0 %vm1685_vm5, %v3069_v8 }
0x2032   :  { %4366 = vmatprep.mubr.msk.bf16.mxu0 %vm4659_vm1, %v4658_v18  ;;  %4363 = vmatpush3.bf16.msra.mxu0 %v4485_v14 }
0x2033   :  { %4364 = vmatprep.subr.bf16.mxu0 %v4658_v18 }
0x20f1   :  { %v3140_v0 = vpop.f32.mrf.mxu0 }
0x20f2   :  { %v3147_v1 = vadd.f32 %v3140_v0, %v5386_v15  ;;  %v4487_v15 = vld [vmem:[%s5548_s11 + $0x20] sm:$0xff]  }
0x20f3   :  { %v4344_v3 = vpop.f32.mrf.mxu0  ;;  %4365 = vmatpush3.bf16.msra.mxu0 %v4487_v15 }
0x20f4   :  { %3149 = vst.msk [vmem:[#allocation2] sm:$0xff] %vm67_vm0, %v3147_v1  ;;  %4378 = vmatprep.subr.bf16.mxu0 %v4658_v18 }
0x20f5   :  { %v3143_v4 = vpop.f32.mrf.mxu0 }
0x20f6   :  { %v3148_v56 = vadd.f32 %v3143_v4, %v5391_v21 }
0x20f7   :  { %v4345_v61 = vpop.f32.mrf.mxu0 }
0x20f8   :  { %3150 = vst.msk [vmem:[#allocation2 + $0x8] sm:$0xff] %vm67_vm0, %v3148_v56  ;;  %v3896_v56 = vsel %vm3388_vm10, 1.0, %v4658_v18  ;;  %v3904_v61 = vsel %vm3458_vm11, 1.0, %v4658_v18 }
0x20ff   :  { %v3151_v5 = vld [vmem:[#allocation2] ss:$2 sm:$0xff]  ;;  %v3152_v54 = vld [vmem:[#allocation2 + $0x1] ss:$2 sm:$0xff] }
0x2100   :  { %v3153_v63 = vadd.f32 %v3152_v54, %v3151_v5  ;;  %3172 = vst.msk [vmem:[#allocation2] sm:$0x3] %vm3171_vm7, %v4658_v18  ;;  %3174 = vst.msk [vmem:[#allocation2 + $0xa] sm:$0x3] %vm3171_vm7, %v4658_v18 }
0x2102   :  { %v3154_v57 = vmul.f32 0.5, %v3153_v63 }
0x2104   :  { %v3155_v58 = vmul.f32 %v3154_v57, %v3154_v57 }
0x2106   :  { %v3156_v10 = vsel %vm67_vm0, %v3155_v58, 0.0 }
0x2107   :  { %3157 = vadd.xlane.f32.xlu1 %v3156_v10 }
0x2190   :  { %v3158_v16 = vpop.xlane.xlu1 %3157 }
0x2191   :  { %v3159_v17 = vmul.f32 0.03125, %v3158_v16 }
0x2193   :  { %v3160_v19 = vadd.f32 1e-05, %v3159_v17 }
0x2195   :  { %4638 = vrsqrt.f32 %v3160_v19 }
0x21a2   :  { %v4639_v21 = vpop.eup %4638 }
0x21a3   :  { %v3162_v23 = vmul.f32 %v4639_v21, %v3154_v57 }
0x21a5   :  { %v3170_v24 = vmul.f32 %v3876_v22, %v3162_v23  ;;  %v4674_v23 = vmov 0  }
0x21a6   :  { %4461 = vset.pattern.permute.xlu0 %v4674_v23 }
0x21a7   :  { %3173 = vst.msk [vmem:[#allocation2 + $0x2] sm:$0xff] %vm67_vm0, %v3170_v24 }
0x21ae   :  { %v3184_v40 = vld [vmem:[#allocation2] sm:$0xff] }
0x21af   :  { %v3322_v37 = vld [vmem:[#allocation2 + $0x2] sm:$0xff]  ;;  %v3185_v28 = vpack.c.bf16 %v3184_v40, %v3184_v40 }
0x21b0   :  { %v3323_v31 = vpack.c.bf16 %v3322_v37, %v3322_v37  ;;  %v3253_v34 = vld [vmem:[#allocation2 + $0x1] sm:$0xff] }
0x21b1   :  { %4351 = vmatmul.mubr.msk.bf16.vlgmr.msra.gmra.mxu1 %vm67_vm0, %v3185_v28  ;;  %v3462_v36 = vld [vmem:[#allocation2 + $0x4] sm:$0xff]  ;;  %v3254_v38 = vpack.c.bf16 %v3253_v34, %v3253_v34  ;;  %v3554_v34 = vmul.u32 4, %v5498_v7 }
0x21b2   :  { %4367 = vmatmul.mubr.msk.bf16.vlgmr.msra.gmra.mxu0 %vm67_vm0, %v3323_v31  ;;  %4355 = vmatpush3.bf16.msra.mxu1 %v4488_v26  ;;  %v3463_v62 = vpack.c.bf16 %v3462_v36, %v3462_v36  ;;  %v3392_v9 = vld [vmem:[#allocation2 + $0x3] sm:$0xff] }
0x21b3   :  { %4379 = vmatpush3.bf16.msra.mxu0 %v4489_v27  ;;  %4356 = vmatprep.subr.bf16.mxu1 %v4658_v18  ;;  %v3393_v12 = vpack.c.bf16 %v3392_v9, %v3392_v9 }
0x21b4   :  { %4380 = vmatprep.subr.bf16.mxu0 %v4658_v18  ;;  %4358 = vmatprep.mubr.msk.bf16.mxu1 %vm4659_vm1, %v4658_v18 }
0x21b5   :  { %4382 = vmatprep.mubr.msk.bf16.mxu0 %vm4659_vm1, %v4658_v18 }
0x21b6   :  { %4357 = vmatpush3.bf16.msra.mxu1 %v4490_v32  ;;  %v3556_v32 = vadd.s32 1, %v5498_v7 }
0x21b7   :  { %4381 = vmatpush3.bf16.msra.mxu0 %v4491_v29  ;;  %4370 = vmatprep.subr.bf16.mxu1 %v4658_v18  ;;  %v3553_v29 = vand.u32 127, %v3175_v13 }
0x21b8   :  { %v3557_v36 = vmul.u32 4, %v3556_v32 }
0x21b9   :  { %4359 = vmatmul.mubr.msk.bf16.vlgmr.msra.gmra.mxu1 %vm67_vm0, %v3254_v38  ;;  %vm3562_vm12 = vcmp.eq.s32.totalorder %v5501_v43, %v3553_v29  ;;  %vm3555_vm13 = vcmp.ge.s32.totalorder %v3553_v29, %v3554_v34 }
0x21ba   :  { %4383 = vmatmul.mubr.msk.bf16.vlgmr.msra.gmra.mxu0 %vm67_vm0, %v3463_v62  ;;  %4371 = vmatpush3.bf16.msra.mxu1 %v4492_v48  ;;  %vm3558_vm14 = vcmp.lt.s32.totalorder %v3553_v29, %v3557_v36  ;;  %v3916_v48 = vsel %vm3562_vm12, 1.0, %v4658_v18 }
0x21bb   :  { %4374 = vmatprep.mubr.msk.bf16.mxu1 %vm4659_vm1, %v4658_v18  ;;  %4372 = vmatprep.subr.bf16.mxu1 %v4658_v18  ;;  %vm3559_vm15 = vmand %vm3555_vm13, %vm3558_vm14 }
0x21be   :  { %4373 = vmatpush3.bf16.msra.mxu1 %v4493_v33  ;;  %v3915_v33 = vsel %vm3559_vm15, 1.0, %v4658_v18 }
0x21bf   :  { %4386 = vmatprep.subr.mxu1 %v4658_v18 }
0x21c1   :  { %4375 = vmatmul.mubr.msk.bf16.vlgmr.msra.gmra.mxu1 %vm67_vm0, %v3393_v12  ;;  %vm3645_vm0 = vcmask 25600  }
0x21c2   :  { %4388 = vmatprep.mubr.msk.f32.mxu1 %vm4659_vm1, %v4658_v18 }
0x2271   :  { %v3239_v47 = vpop.f32.mrf.mxu1 }
0x2272   :  { %v3378_v49 = vpop.f32.mrf.mxu0  ;;  %v3245_v39 = vmul.f32 %v3877_v45, %v3239_v47 }
0x2273   :  { %v4352_v30 = vpop.f32.mrf.mxu1 }
0x2274   :  { %v4368_v50 = vpop.f32.mrf.mxu0 }
0x2275   :  { %v3242_v35 = vpop.f32.mrf.mxu1 }
0x2276   :  { %v3381_v2 = vpop.f32.mrf.mxu0 }
0x2277   :  { %v4353_v51 = vpop.f32.mrf.mxu1  ;;  %v4675_v2 = vmov 1966171168  }
0x2278   :  { %v4369_v52 = vpop.f32.mrf.mxu0  ;;  %v3742_v51 = vunpack.c.l.s4 %v4675_v2 }
0x2279   :  { %v3309_v41 = vpop.f32.mrf.mxu1 }
0x227a   :  { %v3518_v6 = vpop.f32.mrf.mxu0  ;;  %v3315_v59 = vmul.f32 %v3881_v53, %v3309_v41  ;;  %v3743_v52 = vunpack.c.0.s8 %v3742_v51 }
0x227b   :  { %v4360_v60 = vpop.f32.mrf.mxu1  ;;  %v3524_v58 = vmul.f32 %v3904_v61, %v3518_v6 }
0x227c   :  { %v4384_v46 = vpop.f32.mrf.mxu0  ;;  %v3316_v1 = vadd.f32 %v3315_v59, %v3245_v39  ;;  %v3746_v53 = vsub.s32 %v3743_v52, %v5498_v7 }
0x227d   :  { %v3312_v8 = vpop.f32.mrf.mxu1 }
0x227e   :  { %v3521_v0 = vpop.f32.mrf.mxu0  ;;  %v3385_v54 = vadd.f32 %v3378_v49, %v3316_v1 }
0x227f   :  { %v4361_v3 = vpop.f32.mrf.mxu1 }
0x2280   :  { %v4385_v4 = vpop.f32.mrf.mxu0 }
0x2281   :  { %v3448_v5 = vpop.f32.mrf.mxu1 }
0x2282   :  { %v3454_v63 = vmul.f32 %v3896_v56, %v3448_v5 }
0x2283   :  { %v4376_v57 = vpop.f32.mrf.mxu1 }
0x2284   :  { %v3455_v10 = vadd.f32 %v3454_v63, %v3385_v54 }
0x2285   :  { %v3451_v14 = vpop.f32.mrf.mxu1 }
0x2286   :  { %v3525_v20 = vadd.f32 %v3524_v58, %v3455_v10 }
0x2287   :  { %v4377_v15 = vpop.f32.mrf.mxu1 }
0x2288   :  { %v3533_v16 = vadd.f32 %v3912_v11, %v3525_v20 }
0x228a   :  { %v3913_v17 = vmul.f32 -1.442695, %v3533_v16 }
0x228c   :  { %4640 = vpow2.f32 %v3913_v17 }
0x2299   :  { %v4641_v19 = vpop.eup %4640 }
0x229a   :  { %v3537_v21 = vadd.f32 1.0, %v4641_v19 }
0x229c   :  { %4642 = vrcp.f32 %v3537_v21 }
0x22a9   :  { %v4643_v22 = vpop.eup %4642 }
0x22aa   :  { %3541 = vrot.lane.b32.xlu0 %v4643_v22, %s4673_s4 }
0x231c   :  { %v3542_v24 = vpop.permute.xlu0 %3541 }
0x231d   :  { %v3544_v26 = vmul.f32 %v3542_v24, %v3533_v16 }
0x231f   :  { %v3914_v40 = vmul.f32 -1.442695, %v3544_v26 }
0x2321   :  { %4644 = vpow2.f32 %v3914_v40 }
0x232e   :  { %v4645_v37 = vpop.eup %4644 }
0x232f   :  { %v3548_v27 = vadd.f32 1.0, %v4645_v37 }
0x2331   :  { %4646 = vrcp.f32 %v3548_v27 }
0x233e   :  { %v4647_v28 = vpop.eup %4646 }
0x233f   :  { %v3551_v31 = vmul.f32 %v4647_v28, %v3544_v26 }
0x2341   :  { %3567 = vperm.xlu0 %4461, %v3551_v31  }
0x23bc   :  { %v3568_v38 = vpop.permute.xlu0 %3567 }
0x23bd   :  { %v3570_v62 = vmul.f32 %v3916_v48, %v3568_v38 }
0x23bf   :  { %4387 = vmatpush3.msra.mxu1 %v3570_v62 }
0x23c0   :  { %4389 = vmatmul.mubr.msk.f32.vlgmr.msra.gmra.mxu1 %vm366_vm2, %v3915_v33  ;;  %4391 = vmatprep.subr.mxu1 %v4658_v18  ;;  %vm3765_vm2 = vcmask 0  }
0x23c1   :  { %4393 = vmatprep.mubr.msk.f32.mxu1 %vm4659_vm1, %v4658_v18  ;;  %4392 = vmatpush3.msk.msra.mxu1 %vm2102_vm6, %v3662_v44  ;;  %v3918_v18 = vld [vmem:[%s5552_s13] ss:$0 sm:$0xff]  ;;  %vm3663_vm1 = vcmask 31744  }
0x2480   :  { %v3640_v9 = vpop.f32.mrf.mxu1 }
0x2481   :  { %v3644_v12 = vmul.f32 %v3640_v9, %v3640_v9 }
0x2482   :  { %v4390_v13 = vpop.f32.mrf.mxu1 }
0x2483   :  { %v3646_v43 = vsel %vm3645_vm0, %v3644_v12, 0.0 }
0x2484   :  { %3647 = vadd.xlane.f32.xlu0 %v3646_v43 }
0x250d   :  { %v3648_v47 = vpop.xlane.xlu0 %3647 }
0x250e   :  { %v3650_v49 = vmul.f32 0.25, %v3648_v47 }
0x2510   :  { %v3651_v25 = vadd.f32 1e-05, %v3650_v49 }
0x2512   :  { %4648 = vrsqrt.f32 %v3651_v25 }
0x251f   :  { %v4649_v30 = vpop.eup %4648 }
0x2520   :  { %v3653_v50 = vmul.f32 %v4649_v30, %v3640_v9 }
0x2522   :  { %v3661_v35 = vmul.f32 %v3918_v18, %v3653_v50 }
0x2524   :  { %4394 = vmatmul.mubr.msk.f32.vlgmr.msra.gmra.mxu1 %vm3663_vm1, %v3661_v35 }
0x25e4   :  { %v3736_v55 = vpop.f32.mrf.mxu1 }
0x25e5   :  { %v3747_v45 = vrot.slane %v3736_v55, %v3746_v53 }
0x25e6   :  { %v4395_v41 = vpop.f32.mrf.mxu1 }
0x25e7   :  { %v3748_v6 = vcombine.high %v3747_v45, %v3747_v45  ;;  %v3755_v59 = vrot.slane %v3747_v45, %v3746_v53 }
0x25e9   :  { %v3762_v42 = vrot.slane %v3748_v6, %v3746_v53  ;;  %3766 = vst.msk [vmem:[%s5553_s15] sm:$0x1] %vm3765_vm2, %v3755_v59 }
0x25eb   :  { %3767 = vst.msk [vmem:[%s5553_s15 + $0x1] sm:$0x1] %vm3765_vm2, %v3762_v42 }

</bundles_post_ra>
